<compile_context>
chip_gen: v5e
topology: v5e:2x2
jax: 0.10.0
libtpu: 0.0.40
codegen_flags: <defaults>
</compile_context>

<pallas_src>
import jax
import jax.numpy as jnp
from jax.experimental import pallas as pl
from jax.experimental.pallas import tpu as pltpu

EPS = 1e-5
_VMEM_LIMIT = 32 * 1024 * 1024


def _fold_bn(gamma, beta, mean, var):
    scale = gamma / jnp.sqrt(var + EPS)
    shift = beta - mean * scale
    return scale.astype(jnp.float32), shift.astype(jnp.float32)


# ------------------- lane-packed ("row slab") weight builders -------------------
# Activations are (rows=H, lanes=W*C) slabs: pixel w occupies lanes [w*C, (w+1)*C).
# A 1x1 conv is a matmul with a block-diagonal weight; a 3x3 conv is 9 lane/sublane
# shifted slabs matmul'd against 9 block-diagonal taps (in-kernel im2col).

def _bd(w2d, width, dtype):
    """(Cin, Cout) -> block-diagonal (width*Cin, width*Cout)."""
    cin, cout = w2d.shape
    eye = jnp.eye(width, dtype=jnp.float32)
    out = jnp.einsum('uv,co->ucvo', eye, w2d.astype(jnp.float32))
    return out.reshape(width * cin, width * cout).astype(dtype)


def _conv_bd(w4d, width, dtype=jnp.bfloat16):
    """(3,3,Cin,Cout) BN-folded conv weight -> (9*width*Cin, width*Cout), taps dy-major."""
    taps = [_bd(w4d[dy, dx], width, jnp.float32) for dy in range(3) for dx in range(3)]
    return jnp.concatenate(taps, axis=0).astype(dtype)


def _tile_bias(b, width):
    return jnp.tile(b, width).reshape(1, width * b.shape[0]).astype(jnp.float32)


# ------------------------------- fused kernel -------------------------------

def _make_chain_kernel(h, w, cout, ct, proj_flags):
    """AttentionBlock + concat + num_block BasicBlocks, one padded image per grid step."""

    def pad_slab(x, c):
        # zero 'same' padding of an interior (h, w*c) slab -> (h+2, (w+2)*c), in VMEM/vregs.
        zc = jnp.zeros((x.shape[0], c), x.dtype)
        x = jnp.concatenate([zc, x, zc], axis=1)
        zr = jnp.zeros((1, x.shape[1]), x.dtype)
        return jnp.concatenate([zr, x, zr], axis=0)

    def conv3x3(xpad, c, w_ref, b_ref):
        # in-kernel im2col: 9 static shifts, each matmul'd against its block-diag tap.
        acc = jnp.zeros((h, w * cout), jnp.float32) + b_ref[...]
        t = 0
        for dy in range(3):
            for dx in range(3):
                piece = xpad[dy:dy + h, dx * c:dx * c + w * c].astype(jnp.bfloat16)
                acc = acc + jnp.dot(piece, w_ref[t * w * c:(t + 1) * w * c, :],
                                    preferred_element_type=jnp.float32)
                t += 1
        return acc

    def kernel(*refs):
        xu_ref, watt_ref, batt_ref, wpsi_ref, bpsi_ref, gmat_ref = refs[:6]
        rest = refs[6:]
        blk_refs, i = [], 0
        for has_proj in proj_flags:
            k = 6 if has_proj else 4
            blk_refs.append(rest[i:i + k])
            i += k
        out_ref = rest[i]

        # ----- AttentionBlock (1x1 convs as block-diag matmuls, BN folded) -----
        xu = xu_ref[...]                                                   # (Hp, Wp*Ct) bf16
        ha = jnp.dot(xu, watt_ref[...], preferred_element_type=jnp.float32)
        ha = jnp.maximum(ha + batt_ref[...], 0.0)                          # (Hp, Wp*Ci)
        plog = jnp.dot(ha, wpsi_ref[...],
                       preferred_element_type=jnp.float32) + bpsi_ref[0, 0]  # (Hp, Wp)
        psi = jax.nn.sigmoid(plog)
        gate = jnp.dot(psi, gmat_ref[...],
                       preferred_element_type=jnp.float32)                 # psi on x2 lanes
        lane = jax.lax.broadcasted_iota(jnp.int32, (1, gate.shape[1]), 1)
        gate = gate + (lane % ct >= cout).astype(jnp.float32)              # 1 on upsampled lanes
        cur = xu.astype(jnp.float32) * gate        # padded cat([x2*psi, up]) slab, f32
        cur_c = ct

        # ----- BasicBlocks: conv3x3-bn-relu, conv3x3-bn, +shortcut, relu (fully fused) -----
        for bi, (has_proj, blk) in enumerate(zip(proj_flags, blk_refs)):
            w1_ref, b1_ref, w2_ref, b2_ref = blk[:4]
            a1 = jnp.maximum(conv3x3(cur, cur_c, w1_ref, b1_ref), 0.0)     # (H, W*Cout)
            a2 = conv3x3(pad_slab(a1, cout), cout, w2_ref, b2_ref)
            x_int = cur[1:1 + h, cur_c:cur_c + w * cur_c]                  # block input interior
            if has_proj:
                sc = jnp.dot(x_int.astype(jnp.bfloat16), blk[4][...],
                             preferred_element_type=jnp.float32) + blk[5][...]
            else:
                sc = x_int
            a2 = jnp.maximum(a2 + sc, 0.0)
            if bi + 1 < len(proj_flags):
                cur = pad_slab(a2, cout)
                cur_c = cout
            else:
                out_ref[...] = a2.astype(out_ref.dtype)                    # lane-dense store

    return kernel


def _wspec(x):
    shape = tuple(x.shape)
    return pl.BlockSpec(shape, lambda i, _n=len(shape): (0,) * _n)


def fused_attention_chain(xu, packed, *, h, w, cout, ct):
    n, hp, wpct = xu.shape
    proj_flags = tuple('wsc' in blk for blk in packed['blocks'])
    kernel = _make_chain_kernel(h, w, cout, ct, proj_flags)

    args = [xu, packed['watt'], packed['batt'], packed['wpsi'], packed['bpsi'], packed['gmat']]
    in_specs = [
        pl.BlockSpec((None, hp, wpct), lambda i: (i, 0, 0)),
        _wspec(packed['watt']), _wspec(packed['batt']), _wspec(packed['wpsi']),
        pl.BlockSpec(memory_space=pltpu.MemorySpace.SMEM),      # (1,1) psi BN-bias scalar
        _wspec(packed['gmat']),
    ]
    for blk in packed['blocks']:
        for name in ('w1', 'b1', 'w2', 'b2', 'wsc', 'bsc'):
            if name in blk:
                args.append(blk[name])
                in_specs.append(_wspec(blk[name]))

    return pl.pallas_call(
        kernel,
        out_shape=jax.ShapeDtypeStruct((n, h, w * cout), jnp.bfloat16),
        grid=(n,),
        in_specs=in_specs,
        out_specs=pl.BlockSpec((None, h, w * cout), lambda i: (i, 0, 0)),
        compiler_params=pltpu.CompilerParams(
            dimension_semantics=("parallel",),
            vmem_limit_bytes=_VMEM_LIMIT),
    )(*args)


# --------------------------- JAX glue (resize etc.) --------------------------

def _interp_matrix(out_size, in_size):
    """Row-stochastic bilinear (align_corners=True) interpolation matrix."""
    if in_size == 1:
        return jnp.ones((out_size, 1), jnp.float32)
    if out_size == 1:
        return jnp.zeros((1, in_size), jnp.float32).at[0, 0].set(1.0)
    src = jnp.arange(out_size, dtype=jnp.float32) * (in_size - 1) / (out_size - 1)
    lo = jnp.clip(jnp.floor(src).astype(jnp.int32), 0, in_size - 2)
    frac = src - lo.astype(jnp.float32)
    rows = jnp.arange(out_size)
    m = jnp.zeros((out_size, in_size), jnp.float32)
    m = m.at[rows, lo].add(1.0 - frac)
    m = m.at[rows, lo + 1].add(frac)
    return m


def attention_up_block_forward(packed, x1_nchw, x2_nchw):
    x1 = jnp.transpose(x1_nchw, (0, 2, 3, 1)).astype(jnp.float32)   # NHWC
    x2 = jnp.transpose(x2_nchw, (0, 2, 3, 1)).astype(jnp.float32)
    n, hin, win, cin = x1.shape
    _, h, w, cout = x2.shape
    ct = cout + cin

    # F.interpolate(x1, size=x2.shape[2:], mode='bilinear', align_corners=True)
    ah = _interp_matrix(h, hin)
    aw = _interp_matrix(w, win)
    up = jnp.einsum('oh,nhwc->nowc', ah, x1)
    up = jnp.einsum('pw,nowc->nopc', aw, up)                        # (N, H, W, Cin)

    # [x2 | up] channel concat, spatial zero pad (the convs' 'same' pad), lane packed.
    xu = jnp.concatenate([x2, up], axis=-1)
    xu = jnp.pad(xu, ((0, 0), (1, 1), (1, 1), (0, 0)))
    xu = xu.reshape(n, h + 2, (w + 2) * ct).astype(jnp.bfloat16)

    out = fused_attention_chain(xu, packed, h=h, w=w, cout=cout, ct=ct)
    out = out.reshape(n, h, w, cout).astype(jnp.float32)
    return jnp.transpose(out, (0, 3, 1, 2))                          # NCHW


# ----------------------------- parameter handling -----------------------------

def init_params(key, in_ch, out_ch, num_block):
    int_ch = out_ch // 2
    keys = iter(jax.random.split(key, 64))

    def conv_w(cin, cout, k):
        fan = cin * k * k
        return jax.random.normal(next(keys), (k, k, cin, cout), jnp.float32) / jnp.sqrt(fan)

    def bn(c):
        gamma = 0.8 + 0.4 * jax.random.uniform(next(keys), (c,), jnp.float32)
        beta = 0.1 * jax.random.normal(next(keys), (c,), jnp.float32)
        mean = 0.1 * jax.random.normal(next(keys), (c,), jnp.float32)
        var = 0.5 + jax.random.uniform(next(keys), (c,), jnp.float32)
        return _fold_bn(gamma, beta, mean, var)

    p = {}
    # AttentionBlock(g_ch=in_ch, l_ch=out_ch, int_ch=out_ch//2); BN folded into weights.
    wg = conv_w(in_ch, int_ch, 1)[0, 0]
    sg, bg = bn(int_ch)
    wx = conv_w(out_ch, int_ch, 1)[0, 0]
    sx, bx = bn(int_ch)
    wpsi = conv_w(int_ch, 1, 1)[0, 0, :, 0]
    sp, bp = bn(1)
    # Row order matches the per-pixel [x2 | up] channel concat.
    p['wxg'] = jnp.concatenate([wx * sx[None, :], wg * sg[None, :]], axis=0)   # (Ct, Ci)
    p['bxg'] = bx + bg
    p['wpf'] = wpsi * sp
    p['bp'] = bp

    blocks = []
    cin = in_ch + out_ch
    for _ in range(num_block):
        blk = {}
        w1 = conv_w(cin, out_ch, 3)
        s1, b1 = bn(out_ch)
        w2 = conv_w(out_ch, out_ch, 3)
        s2, b2 = bn(out_ch)
        blk['w1'] = w1 * s1
        blk['b1'] = b1
        blk['w2'] = w2 * s2
        blk['b2'] = b2
        if cin != out_ch:   # 1x1 projection shortcut (+BN), fused into the block kernel
            wsc = conv_w(cin, out_ch, 1)[0, 0]
            ssc, bsc = bn(out_ch)
            blk['wsc'] = wsc * ssc
            blk['bsc'] = bsc
        blocks.append(blk)
        cin = out_ch
    p['blocks'] = blocks
    return p


def pack_params(params, h, w):
    """Build lane-packed (block-diagonal) kernel weights once for a given output size."""
    del h
    wp = w + 2
    wxg = params['wxg']
    ct, ci = wxg.shape
    cout = params['blocks'][0]['w1'].shape[-1]
    mask = (jnp.arange(ct) < cout).astype(jnp.float32)
    gmat = jnp.einsum('uv,c->uvc', jnp.eye(wp, dtype=jnp.float32), mask).reshape(wp, wp * ct)

    packed = {
        'watt': _bd(wxg, wp, jnp.bfloat16),                           # (Wp*Ct, Wp*Ci)
        'batt': _tile_bias(params['bxg'], wp),                        # (1, Wp*Ci)
        'wpsi': _bd(params['wpf'].reshape(ci, 1), wp, jnp.float32),   # (Wp*Ci, Wp)
        'bpsi': params['bp'].reshape(1, 1).astype(jnp.float32),
        'gmat': gmat,                                                 # psi -> x2-lane gate
        'blocks': [],
    }
    for blk in params['blocks']:
        b = {
            'w1': _conv_bd(blk['w1'], w),
            'b1': _tile_bias(blk['b1'], w),
            'w2': _conv_bd(blk['w2'], w),
            'b2': _tile_bias(blk['b2'], w),
        }
        if 'wsc' in blk:
            b['wsc'] = _bd(blk['wsc'], w, jnp.bfloat16)
            b['bsc'] = _tile_bias(blk['bsc'], w)
        packed['blocks'].append(b)
    return packed


# ----------------------------------- main -------------------------------------

if __name__ == "__main__":
    key = jax.random.PRNGKey(0)
    kp, k1, k2 = jax.random.split(key, 3)

    N, in_ch, out_ch, num_block = 4, 8, 8, 2
    H1 = W1 = 8      # low-resolution feature (x1)
    H2 = W2 = 16     # skip-connection feature (x2); W2*out_ch = 128 -> lane-dense stores

    params = init_params(kp, in_ch, out_ch, num_block)
    packed = pack_params(params, H2, W2)   # built once, like moving a torch module to device

    x1 = jax.random.normal(k1, (N, in_ch, H1, W1), jnp.float32)   # NCHW, like PyTorch
    x2 = jax.random.normal(k2, (N, out_ch, H2, W2), jnp.float32)

    out = jax.jit(attention_up_block_forward)(packed, x1, x2)
    out = jax.block_until_ready(out)

    assert out.shape == (N, out_ch, H2, W2), out.shape
    assert bool(jnp.all(jnp.isfinite(out)))
    print("KERNEL_OK")
</pallas_src>

<mosaic_0001>
module attributes {stable_mosaic.version = 11 : i64} {
  func.func @kernel(%arg0: i32, %arg1: memref<1x18x288xbf16, #tpu.memory_space<vmem>>, %arg2: memref<288x72xbf16, #tpu.memory_space<vmem>>, %arg3: memref<1x72xf32, #tpu.memory_space<vmem>>, %arg4: memref<72x18xf32, #tpu.memory_space<vmem>>, %arg5: memref<1x1xf32, #tpu.memory_space<smem>>, %arg6: memref<18x288xf32, #tpu.memory_space<vmem>>, %arg7: memref<2304x128xbf16, #tpu.memory_space<vmem>>, %arg8: memref<1x128xf32, #tpu.memory_space<vmem>>, %arg9: memref<1152x128xbf16, #tpu.memory_space<vmem>>, %arg10: memref<1x128xf32, #tpu.memory_space<vmem>>, %arg11: memref<256x128xbf16, #tpu.memory_space<vmem>>, %arg12: memref<1x128xf32, #tpu.memory_space<vmem>>, %arg13: memref<1152x128xbf16, #tpu.memory_space<vmem>>, %arg14: memref<1x128xf32, #tpu.memory_space<vmem>>, %arg15: memref<1152x128xbf16, #tpu.memory_space<vmem>>, %arg16: memref<1x128xf32, #tpu.memory_space<vmem>>, %arg17: memref<1x16x128xbf16, #tpu.memory_space<vmem>>) attributes {dimension_semantics = [#tpu.dimension_semantics<parallel>], iteration_bounds = array<i64: 4>, scalar_prefetch = 0 : i64, scratch_operands = 0 : i64, tpu.core_type = #tpu.core_type<tc>, window_params = [{transform_indices = @transform_0, window_bounds = array<i64: 1, 18, 288>}, {pipeline_mode = #tpu.pipeline_mode<synchronous>, transform_indices = @transform_1, window_bounds = array<i64: 288, 72>}, {pipeline_mode = #tpu.pipeline_mode<synchronous>, transform_indices = @transform_2, window_bounds = array<i64: 1, 72>}, {pipeline_mode = #tpu.pipeline_mode<synchronous>, transform_indices = @transform_3, window_bounds = array<i64: 72, 18>}, {transform_indices = @transform_4, window_bounds = array<i64: 1, 1>}, {pipeline_mode = #tpu.pipeline_mode<synchronous>, transform_indices = @transform_5, window_bounds = array<i64: 18, 288>}, {pipeline_mode = #tpu.pipeline_mode<synchronous>, transform_indices = @transform_6, window_bounds = array<i64: 2304, 128>}, {pipeline_mode = #tpu.pipeline_mode<synchronous>, transform_indices = @transform_7, window_bounds = array<i64: 1, 128>}, {pipeline_mode = #tpu.pipeline_mode<synchronous>, transform_indices = @transform_8, window_bounds = array<i64: 1152, 128>}, {pipeline_mode = #tpu.pipeline_mode<synchronous>, transform_indices = @transform_9, window_bounds = array<i64: 1, 128>}, {pipeline_mode = #tpu.pipeline_mode<synchronous>, transform_indices = @transform_10, window_bounds = array<i64: 256, 128>}, {pipeline_mode = #tpu.pipeline_mode<synchronous>, transform_indices = @transform_11, window_bounds = array<i64: 1, 128>}, {pipeline_mode = #tpu.pipeline_mode<synchronous>, transform_indices = @transform_12, window_bounds = array<i64: 1152, 128>}, {pipeline_mode = #tpu.pipeline_mode<synchronous>, transform_indices = @transform_13, window_bounds = array<i64: 1, 128>}, {pipeline_mode = #tpu.pipeline_mode<synchronous>, transform_indices = @transform_14, window_bounds = array<i64: 1152, 128>}, {pipeline_mode = #tpu.pipeline_mode<synchronous>, transform_indices = @transform_15, window_bounds = array<i64: 1, 128>}, {transform_indices = @transform_16, window_bounds = array<i64: 1, 16, 128>}]} {
    %c0 = arith.constant 0 : index
    %c0_0 = arith.constant 0 : index
    %c0_1 = arith.constant 0 : index
    %0 = vector.load %arg1[%c0, %c0_0, %c0_1] : memref<1x18x288xbf16, #tpu.memory_space<vmem>>, vector<1x18x288xbf16>
    %1 = vector.shape_cast %0 : vector<1x18x288xbf16> to vector<18x288xbf16>
    %c0_2 = arith.constant 0 : index
    %c0_3 = arith.constant 0 : index
    %2 = vector.load %arg2[%c0_2, %c0_3] : memref<288x72xbf16, #tpu.memory_space<vmem>>, vector<288x72xbf16>
    %cst = arith.constant dense<0.000000e+00> : vector<18x72xf32>
    %3 = tpu.matmul %1, %2, %cst {dimension_numbers = #tpu.dot_dimension_numbers<[1], [0], [0], [1], [0, 0, 1, 1], [], []>} : vector<18x288xbf16>, vector<288x72xbf16>, vector<18x72xf32> -> vector<18x72xf32>
    %c0_4 = arith.constant 0 : index
    %c0_5 = arith.constant 0 : index
    %4 = vector.load %arg3[%c0_4, %c0_5] : memref<1x72xf32, #tpu.memory_space<vmem>>, vector<1x72xf32>
    %5 = vector.broadcast %4 : vector<1x72xf32> to vector<18x72xf32>
    %6 = arith.addf %3, %5 : vector<18x72xf32>
    %cst_6 = arith.constant 0.000000e+00 : f32
    %7 = vector.broadcast %cst_6 : f32 to vector<18x72xf32>
    %8 = arith.maximumf %6, %7 : vector<18x72xf32>
    %c0_7 = arith.constant 0 : index
    %c0_8 = arith.constant 0 : index
    %9 = vector.load %arg4[%c0_7, %c0_8] : memref<72x18xf32, #tpu.memory_space<vmem>>, vector<72x18xf32>
    %cst_9 = arith.constant dense<0.000000e+00> : vector<18x18xf32>
    %10 = tpu.matmul %8, %9, %cst_9 {dimension_numbers = #tpu.dot_dimension_numbers<[1], [0], [0], [1], [0, 0, 1, 1], [], []>} : vector<18x72xf32>, vector<72x18xf32>, vector<18x18xf32> -> vector<18x18xf32>
    %c0_10 = arith.constant 0 : index
    %c0_11 = arith.constant 0 : index
    %11 = memref.load %arg5[%c0_10, %c0_11] : memref<1x1xf32, #tpu.memory_space<smem>>
    %12 = vector.broadcast %11 : f32 to vector<18x18xf32>
    %13 = arith.addf %10, %12 : vector<18x18xf32>
    %14 = arith.negf %13 : vector<18x18xf32>
    %15 = math.exp %14 : vector<18x18xf32>
    %cst_12 = arith.constant 1.000000e+00 : f32
    %16 = vector.broadcast %cst_12 : f32 to vector<18x18xf32>
    %17 = arith.addf %16, %15 : vector<18x18xf32>
    %18 = arith.divf %16, %17 : vector<18x18xf32>
    %c0_13 = arith.constant 0 : index
    %c0_14 = arith.constant 0 : index
    %19 = vector.load %arg6[%c0_13, %c0_14] : memref<18x288xf32, #tpu.memory_space<vmem>>, vector<18x288xf32>
    %cst_15 = arith.constant dense<0.000000e+00> : vector<18x288xf32>
    %20 = tpu.matmul %18, %19, %cst_15 {dimension_numbers = #tpu.dot_dimension_numbers<[1], [0], [0], [1], [0, 0, 1, 1], [], []>} : vector<18x18xf32>, vector<18x288xf32>, vector<18x288xf32> -> vector<18x288xf32>
    %21 = tpu.iota {dimensions = array<i32: 1>} : vector<1x288xi32>
    %c16_i32 = arith.constant 16 : i32
    %c0_i32 = arith.constant 0 : i32
    %22 = arith.cmpi eq, %c16_i32, %c0_i32 : i32
    %c1_i32 = arith.constant 1 : i32
    %23 = arith.select %22, %c1_i32, %c16_i32 : i32
    %24 = vector.broadcast %23 : i32 to vector<1x288xi32>
    %25 = arith.remsi %21, %24 : vector<1x288xi32>
    %c0_i32_16 = arith.constant 0 : i32
    %26 = vector.broadcast %c0_i32_16 : i32 to vector<1x288xi32>
    %27 = arith.cmpi ne, %25, %26 : vector<1x288xi32>
    %c0_i32_17 = arith.constant 0 : i32
    %28 = vector.broadcast %c0_i32_17 : i32 to vector<1x288xi32>
    %29 = arith.cmpi slt, %25, %28 : vector<1x288xi32>
    %c0_i32_18 = arith.constant 0 : i32
    %30 = arith.cmpi slt, %23, %c0_i32_18 : i32
    %31 = vector.broadcast %30 : i1 to vector<1x288xi1>
    %32 = vector.broadcast %31 : vector<1x288xi1> to vector<1x288xi1>
    %33 = arith.xori %29, %32 : vector<1x288xi1>
    %34 = arith.andi %33, %27 : vector<1x288xi1>
    %35 = vector.broadcast %23 : i32 to vector<1x288xi32>
    %36 = arith.addi %25, %35 : vector<1x288xi32>
    %37 = arith.select %34, %36, %25 : vector<1x288xi1>, vector<1x288xi32>
    %c8_i32 = arith.constant 8 : i32
    %38 = vector.broadcast %c8_i32 : i32 to vector<1x288xi32>
    %39 = arith.cmpi sge, %37, %38 : vector<1x288xi32>
    %40 = arith.extui %39 : vector<1x288xi1> to vector<1x288xi32>
    %41 = arith.sitofp %40 : vector<1x288xi32> to vector<1x288xf32>
    %42 = vector.broadcast %41 : vector<1x288xf32> to vector<18x288xf32>
    %43 = arith.addf %20, %42 : vector<18x288xf32>
    %44 = arith.extf %1 : vector<18x288xbf16> to vector<18x288xf32>
    %45 = arith.mulf %44, %43 : vector<18x288xf32>
    %cst_19 = arith.constant 0.000000e+00 : f32
    %46 = vector.broadcast %cst_19 : f32 to vector<16x128xf32>
    %c0_20 = arith.constant 0 : index
    %c0_21 = arith.constant 0 : index
    %47 = vector.load %arg8[%c0_20, %c0_21] : memref<1x128xf32, #tpu.memory_space<vmem>>, vector<1x128xf32>
    %48 = vector.broadcast %47 : vector<1x128xf32> to vector<16x128xf32>
    %49 = arith.addf %46, %48 : vector<16x128xf32>
    %50 = vector.extract_strided_slice %45 {offsets = [0, 0], sizes = [16, 256], strides = [1, 1]} : vector<18x288xf32> to vector<16x256xf32>
    %51 = arith.truncf %50 : vector<16x256xf32> to vector<16x256xbf16>
    %c0_22 = arith.constant 0 : index
    %c0_23 = arith.constant 0 : index
    %52 = vector.load %arg7[%c0_22, %c0_23] : memref<2304x128xbf16, #tpu.memory_space<vmem>>, vector<256x128xbf16>
    %cst_24 = arith.constant dense<0.000000e+00> : vector<16x128xf32>
    %53 = tpu.matmul %51, %52, %cst_24 {dimension_numbers = #tpu.dot_dimension_numbers<[1], [0], [0], [1], [0, 0, 1, 1], [], []>} : vector<16x256xbf16>, vector<256x128xbf16>, vector<16x128xf32> -> vector<16x128xf32>
    %54 = arith.addf %49, %53 : vector<16x128xf32>
    %55 = vector.extract_strided_slice %45 {offsets = [0, 16], sizes = [16, 256], strides = [1, 1]} : vector<18x288xf32> to vector<16x256xf32>
    %56 = arith.truncf %55 : vector<16x256xf32> to vector<16x256xbf16>
    %c256 = arith.constant 256 : index
    %c0_25 = arith.constant 0 : index
    %57 = vector.load %arg7[%c256, %c0_25] : memref<2304x128xbf16, #tpu.memory_space<vmem>>, vector<256x128xbf16>
    %cst_26 = arith.constant dense<0.000000e+00> : vector<16x128xf32>
    %58 = tpu.matmul %56, %57, %cst_26 {dimension_numbers = #tpu.dot_dimension_numbers<[1], [0], [0], [1], [0, 0, 1, 1], [], []>} : vector<16x256xbf16>, vector<256x128xbf16>, vector<16x128xf32> -> vector<16x128xf32>
    %59 = arith.addf %54, %58 : vector<16x128xf32>
    %60 = vector.extract_strided_slice %45 {offsets = [0, 32], sizes = [16, 256], strides = [1, 1]} : vector<18x288xf32> to vector<16x256xf32>
    %61 = arith.truncf %60 : vector<16x256xf32> to vector<16x256xbf16>
    %c512 = arith.constant 512 : index
    %c0_27 = arith.constant 0 : index
    %62 = vector.load %arg7[%c512, %c0_27] : memref<2304x128xbf16, #tpu.memory_space<vmem>>, vector<256x128xbf16>
    %cst_28 = arith.constant dense<0.000000e+00> : vector<16x128xf32>
    %63 = tpu.matmul %61, %62, %cst_28 {dimension_numbers = #tpu.dot_dimension_numbers<[1], [0], [0], [1], [0, 0, 1, 1], [], []>} : vector<16x256xbf16>, vector<256x128xbf16>, vector<16x128xf32> -> vector<16x128xf32>
    %64 = arith.addf %59, %63 : vector<16x128xf32>
    %65 = vector.extract_strided_slice %45 {offsets = [1, 0], sizes = [16, 256], strides = [1, 1]} : vector<18x288xf32> to vector<16x256xf32>
    %66 = arith.truncf %65 : vector<16x256xf32> to vector<16x256xbf16>
    %c768 = arith.constant 768 : index
    %c0_29 = arith.constant 0 : index
    %67 = vector.load %arg7[%c768, %c0_29] : memref<2304x128xbf16, #tpu.memory_space<vmem>>, vector<256x128xbf16>
    %cst_30 = arith.constant dense<0.000000e+00> : vector<16x128xf32>
    %68 = tpu.matmul %66, %67, %cst_30 {dimension_numbers = #tpu.dot_dimension_numbers<[1], [0], [0], [1], [0, 0, 1, 1], [], []>} : vector<16x256xbf16>, vector<256x128xbf16>, vector<16x128xf32> -> vector<16x128xf32>
    %69 = arith.addf %64, %68 : vector<16x128xf32>
    %70 = vector.extract_strided_slice %45 {offsets = [1, 16], sizes = [16, 256], strides = [1, 1]} : vector<18x288xf32> to vector<16x256xf32>
    %71 = arith.truncf %70 : vector<16x256xf32> to vector<16x256xbf16>
    %c1024 = arith.constant 1024 : index
    %c0_31 = arith.constant 0 : index
    %72 = vector.load %arg7[%c1024, %c0_31] : memref<2304x128xbf16, #tpu.memory_space<vmem>>, vector<256x128xbf16>
    %cst_32 = arith.constant dense<0.000000e+00> : vector<16x128xf32>
    %73 = tpu.matmul %71, %72, %cst_32 {dimension_numbers = #tpu.dot_dimension_numbers<[1], [0], [0], [1], [0, 0, 1, 1], [], []>} : vector<16x256xbf16>, vector<256x128xbf16>, vector<16x128xf32> -> vector<16x128xf32>
    %74 = arith.addf %69, %73 : vector<16x128xf32>
    %75 = vector.extract_strided_slice %45 {offsets = [1, 32], sizes = [16, 256], strides = [1, 1]} : vector<18x288xf32> to vector<16x256xf32>
    %76 = arith.truncf %75 : vector<16x256xf32> to vector<16x256xbf16>
    %c1280 = arith.constant 1280 : index
    %c0_33 = arith.constant 0 : index
    %77 = vector.load %arg7[%c1280, %c0_33] : memref<2304x128xbf16, #tpu.memory_space<vmem>>, vector<256x128xbf16>
    %cst_34 = arith.constant dense<0.000000e+00> : vector<16x128xf32>
    %78 = tpu.matmul %76, %77, %cst_34 {dimension_numbers = #tpu.dot_dimension_numbers<[1], [0], [0], [1], [0, 0, 1, 1], [], []>} : vector<16x256xbf16>, vector<256x128xbf16>, vector<16x128xf32> -> vector<16x128xf32>
    %79 = arith.addf %74, %78 : vector<16x128xf32>
    %80 = vector.extract_strided_slice %45 {offsets = [2, 0], sizes = [16, 256], strides = [1, 1]} : vector<18x288xf32> to vector<16x256xf32>
    %81 = arith.truncf %80 : vector<16x256xf32> to vector<16x256xbf16>
    %c1536 = arith.constant 1536 : index
    %c0_35 = arith.constant 0 : index
    %82 = vector.load %arg7[%c1536, %c0_35] : memref<2304x128xbf16, #tpu.memory_space<vmem>>, vector<256x128xbf16>
    %cst_36 = arith.constant dense<0.000000e+00> : vector<16x128xf32>
    %83 = tpu.matmul %81, %82, %cst_36 {dimension_numbers = #tpu.dot_dimension_numbers<[1], [0], [0], [1], [0, 0, 1, 1], [], []>} : vector<16x256xbf16>, vector<256x128xbf16>, vector<16x128xf32> -> vector<16x128xf32>
    %84 = arith.addf %79, %83 : vector<16x128xf32>
    %85 = vector.extract_strided_slice %45 {offsets = [2, 16], sizes = [16, 256], strides = [1, 1]} : vector<18x288xf32> to vector<16x256xf32>
    %86 = arith.truncf %85 : vector<16x256xf32> to vector<16x256xbf16>
    %c1792 = arith.constant 1792 : index
    %c0_37 = arith.constant 0 : index
    %87 = vector.load %arg7[%c1792, %c0_37] : memref<2304x128xbf16, #tpu.memory_space<vmem>>, vector<256x128xbf16>
    %cst_38 = arith.constant dense<0.000000e+00> : vector<16x128xf32>
    %88 = tpu.matmul %86, %87, %cst_38 {dimension_numbers = #tpu.dot_dimension_numbers<[1], [0], [0], [1], [0, 0, 1, 1], [], []>} : vector<16x256xbf16>, vector<256x128xbf16>, vector<16x128xf32> -> vector<16x128xf32>
    %89 = arith.addf %84, %88 : vector<16x128xf32>
    %90 = vector.extract_strided_slice %45 {offsets = [2, 32], sizes = [16, 256], strides = [1, 1]} : vector<18x288xf32> to vector<16x256xf32>
    %91 = arith.truncf %90 : vector<16x256xf32> to vector<16x256xbf16>
    %c2048 = arith.constant 2048 : index
    %c0_39 = arith.constant 0 : index
    %92 = vector.load %arg7[%c2048, %c0_39] : memref<2304x128xbf16, #tpu.memory_space<vmem>>, vector<256x128xbf16>
    %cst_40 = arith.constant dense<0.000000e+00> : vector<16x128xf32>
    %93 = tpu.matmul %91, %92, %cst_40 {dimension_numbers = #tpu.dot_dimension_numbers<[1], [0], [0], [1], [0, 0, 1, 1], [], []>} : vector<16x256xbf16>, vector<256x128xbf16>, vector<16x128xf32> -> vector<16x128xf32>
    %94 = arith.addf %89, %93 : vector<16x128xf32>
    %cst_41 = arith.constant 0.000000e+00 : f32
    %95 = vector.broadcast %cst_41 : f32 to vector<16x128xf32>
    %96 = arith.maximumf %94, %95 : vector<16x128xf32>
    %cst_42 = arith.constant 0.000000e+00 : f32
    %97 = vector.broadcast %cst_42 : f32 to vector<16x8xf32>
    %98 = tpu.concatenate %97, %96, %97 in 1 : vector<16x8xf32>, vector<16x128xf32>, vector<16x8xf32> -> vector<16x144xf32>
    %cst_43 = arith.constant 0.000000e+00 : f32
    %99 = vector.broadcast %cst_43 : f32 to vector<1x144xf32>
    %100 = tpu.concatenate %99, %98, %99 in 0 : vector<1x144xf32>, vector<16x144xf32>, vector<1x144xf32> -> vector<18x144xf32>
    %cst_44 = arith.constant 0.000000e+00 : f32
    %101 = vector.broadcast %cst_44 : f32 to vector<16x128xf32>
    %c0_45 = arith.constant 0 : index
    %c0_46 = arith.constant 0 : index
    %102 = vector.load %arg10[%c0_45, %c0_46] : memref<1x128xf32, #tpu.memory_space<vmem>>, vector<1x128xf32>
    %103 = vector.broadcast %102 : vector<1x128xf32> to vector<16x128xf32>
    %104 = arith.addf %101, %103 : vector<16x128xf32>
    %105 = vector.extract_strided_slice %100 {offsets = [0, 0], sizes = [16, 128], strides = [1, 1]} : vector<18x144xf32> to vector<16x128xf32>
    %106 = arith.truncf %105 : vector<16x128xf32> to vector<16x128xbf16>
    %c0_47 = arith.constant 0 : index
    %c0_48 = arith.constant 0 : index
    %107 = vector.load %arg9[%c0_47, %c0_48] : memref<1152x128xbf16, #tpu.memory_space<vmem>>, vector<128x128xbf16>
    %cst_49 = arith.constant dense<0.000000e+00> : vector<16x128xf32>
    %108 = tpu.matmul %106, %107, %cst_49 {dimension_numbers = #tpu.dot_dimension_numbers<[1], [0], [0], [1], [0, 0, 1, 1], [], []>} : vector<16x128xbf16>, vector<128x128xbf16>, vector<16x128xf32> -> vector<16x128xf32>
    %109 = arith.addf %104, %108 : vector<16x128xf32>
    %110 = vector.extract_strided_slice %100 {offsets = [0, 8], sizes = [16, 128], strides = [1, 1]} : vector<18x144xf32> to vector<16x128xf32>
    %111 = arith.truncf %110 : vector<16x128xf32> to vector<16x128xbf16>
    %c128 = arith.constant 128 : index
    %c0_50 = arith.constant 0 : index
    %112 = vector.load %arg9[%c128, %c0_50] : memref<1152x128xbf16, #tpu.memory_space<vmem>>, vector<128x128xbf16>
    %cst_51 = arith.constant dense<0.000000e+00> : vector<16x128xf32>
    %113 = tpu.matmul %111, %112, %cst_51 {dimension_numbers = #tpu.dot_dimension_numbers<[1], [0], [0], [1], [0, 0, 1, 1], [], []>} : vector<16x128xbf16>, vector<128x128xbf16>, vector<16x128xf32> -> vector<16x128xf32>
    %114 = arith.addf %109, %113 : vector<16x128xf32>
    %115 = vector.extract_strided_slice %100 {offsets = [0, 16], sizes = [16, 128], strides = [1, 1]} : vector<18x144xf32> to vector<16x128xf32>
    %116 = arith.truncf %115 : vector<16x128xf32> to vector<16x128xbf16>
    %c256_52 = arith.constant 256 : index
    %c0_53 = arith.constant 0 : index
    %117 = vector.load %arg9[%c256_52, %c0_53] : memref<1152x128xbf16, #tpu.memory_space<vmem>>, vector<128x128xbf16>
    %cst_54 = arith.constant dense<0.000000e+00> : vector<16x128xf32>
    %118 = tpu.matmul %116, %117, %cst_54 {dimension_numbers = #tpu.dot_dimension_numbers<[1], [0], [0], [1], [0, 0, 1, 1], [], []>} : vector<16x128xbf16>, vector<128x128xbf16>, vector<16x128xf32> -> vector<16x128xf32>
    %119 = arith.addf %114, %118 : vector<16x128xf32>
    %120 = vector.extract_strided_slice %100 {offsets = [1, 0], sizes = [16, 128], strides = [1, 1]} : vector<18x144xf32> to vector<16x128xf32>
    %121 = arith.truncf %120 : vector<16x128xf32> to vector<16x128xbf16>
    %c384 = arith.constant 384 : index
    %c0_55 = arith.constant 0 : index
    %122 = vector.load %arg9[%c384, %c0_55] : memref<1152x128xbf16, #tpu.memory_space<vmem>>, vector<128x128xbf16>
    %cst_56 = arith.constant dense<0.000000e+00> : vector<16x128xf32>
    %123 = tpu.matmul %121, %122, %cst_56 {dimension_numbers = #tpu.dot_dimension_numbers<[1], [0], [0], [1], [0, 0, 1, 1], [], []>} : vector<16x128xbf16>, vector<128x128xbf16>, vector<16x128xf32> -> vector<16x128xf32>
    %124 = arith.addf %119, %123 : vector<16x128xf32>
    %125 = vector.extract_strided_slice %100 {offsets = [1, 8], sizes = [16, 128], strides = [1, 1]} : vector<18x144xf32> to vector<16x128xf32>
    %126 = arith.truncf %125 : vector<16x128xf32> to vector<16x128xbf16>
    %c512_57 = arith.constant 512 : index
    %c0_58 = arith.constant 0 : index
    %127 = vector.load %arg9[%c512_57, %c0_58] : memref<1152x128xbf16, #tpu.memory_space<vmem>>, vector<128x128xbf16>
    %cst_59 = arith.constant dense<0.000000e+00> : vector<16x128xf32>
    %128 = tpu.matmul %126, %127, %cst_59 {dimension_numbers = #tpu.dot_dimension_numbers<[1], [0], [0], [1], [0, 0, 1, 1], [], []>} : vector<16x128xbf16>, vector<128x128xbf16>, vector<16x128xf32> -> vector<16x128xf32>
    %129 = arith.addf %124, %128 : vector<16x128xf32>
    %130 = vector.extract_strided_slice %100 {offsets = [1, 16], sizes = [16, 128], strides = [1, 1]} : vector<18x144xf32> to vector<16x128xf32>
    %131 = arith.truncf %130 : vector<16x128xf32> to vector<16x128xbf16>
    %c640 = arith.constant 640 : index
    %c0_60 = arith.constant 0 : index
    %132 = vector.load %arg9[%c640, %c0_60] : memref<1152x128xbf16, #tpu.memory_space<vmem>>, vector<128x128xbf16>
    %cst_61 = arith.constant dense<0.000000e+00> : vector<16x128xf32>
    %133 = tpu.matmul %131, %132, %cst_61 {dimension_numbers = #tpu.dot_dimension_numbers<[1], [0], [0], [1], [0, 0, 1, 1], [], []>} : vector<16x128xbf16>, vector<128x128xbf16>, vector<16x128xf32> -> vector<16x128xf32>
    %134 = arith.addf %129, %133 : vector<16x128xf32>
    %135 = vector.extract_strided_slice %100 {offsets = [2, 0], sizes = [16, 128], strides = [1, 1]} : vector<18x144xf32> to vector<16x128xf32>
    %136 = arith.truncf %135 : vector<16x128xf32> to vector<16x128xbf16>
    %c768_62 = arith.constant 768 : index
    %c0_63 = arith.constant 0 : index
    %137 = vector.load %arg9[%c768_62, %c0_63] : memref<1152x128xbf16, #tpu.memory_space<vmem>>, vector<128x128xbf16>
    %cst_64 = arith.constant dense<0.000000e+00> : vector<16x128xf32>
    %138 = tpu.matmul %136, %137, %cst_64 {dimension_numbers = #tpu.dot_dimension_numbers<[1], [0], [0], [1], [0, 0, 1, 1], [], []>} : vector<16x128xbf16>, vector<128x128xbf16>, vector<16x128xf32> -> vector<16x128xf32>
    %139 = arith.addf %134, %138 : vector<16x128xf32>
    %140 = vector.extract_strided_slice %100 {offsets = [2, 8], sizes = [16, 128], strides = [1, 1]} : vector<18x144xf32> to vector<16x128xf32>
    %141 = arith.truncf %140 : vector<16x128xf32> to vector<16x128xbf16>
    %c896 = arith.constant 896 : index
    %c0_65 = arith.constant 0 : index
    %142 = vector.load %arg9[%c896, %c0_65] : memref<1152x128xbf16, #tpu.memory_space<vmem>>, vector<128x128xbf16>
    %cst_66 = arith.constant dense<0.000000e+00> : vector<16x128xf32>
    %143 = tpu.matmul %141, %142, %cst_66 {dimension_numbers = #tpu.dot_dimension_numbers<[1], [0], [0], [1], [0, 0, 1, 1], [], []>} : vector<16x128xbf16>, vector<128x128xbf16>, vector<16x128xf32> -> vector<16x128xf32>
    %144 = arith.addf %139, %143 : vector<16x128xf32>
    %145 = vector.extract_strided_slice %100 {offsets = [2, 16], sizes = [16, 128], strides = [1, 1]} : vector<18x144xf32> to vector<16x128xf32>
    %146 = arith.truncf %145 : vector<16x128xf32> to vector<16x128xbf16>
    %c1024_67 = arith.constant 1024 : index
    %c0_68 = arith.constant 0 : index
    %147 = vector.load %arg9[%c1024_67, %c0_68] : memref<1152x128xbf16, #tpu.memory_space<vmem>>, vector<128x128xbf16>
    %cst_69 = arith.constant dense<0.000000e+00> : vector<16x128xf32>
    %148 = tpu.matmul %146, %147, %cst_69 {dimension_numbers = #tpu.dot_dimension_numbers<[1], [0], [0], [1], [0, 0, 1, 1], [], []>} : vector<16x128xbf16>, vector<128x128xbf16>, vector<16x128xf32> -> vector<16x128xf32>
    %149 = arith.addf %144, %148 : vector<16x128xf32>
    %150 = vector.extract_strided_slice %45 {offsets = [1, 16], sizes = [16, 256], strides = [1, 1]} : vector<18x288xf32> to vector<16x256xf32>
    %151 = arith.truncf %150 : vector<16x256xf32> to vector<16x256xbf16>
    %c0_70 = arith.constant 0 : index
    %c0_71 = arith.constant 0 : index
    %152 = vector.load %arg11[%c0_70, %c0_71] : memref<256x128xbf16, #tpu.memory_space<vmem>>, vector<256x128xbf16>
    %cst_72 = arith.constant dense<0.000000e+00> : vector<16x128xf32>
    %153 = tpu.matmul %151, %152, %cst_72 {dimension_numbers = #tpu.dot_dimension_numbers<[1], [0], [0], [1], [0, 0, 1, 1], [], []>} : vector<16x256xbf16>, vector<256x128xbf16>, vector<16x128xf32> -> vector<16x128xf32>
    %c0_73 = arith.constant 0 : index
    %c0_74 = arith.constant 0 : index
    %154 = vector.load %arg12[%c0_73, %c0_74] : memref<1x128xf32, #tpu.memory_space<vmem>>, vector<1x128xf32>
    %155 = vector.broadcast %154 : vector<1x128xf32> to vector<16x128xf32>
    %156 = arith.addf %153, %155 : vector<16x128xf32>
    %157 = arith.addf %149, %156 : vector<16x128xf32>
    %cst_75 = arith.constant 0.000000e+00 : f32
    %158 = vector.broadcast %cst_75 : f32 to vector<16x128xf32>
    %159 = arith.maximumf %157, %158 : vector<16x128xf32>
    %cst_76 = arith.constant 0.000000e+00 : f32
    %160 = vector.broadcast %cst_76 : f32 to vector<16x8xf32>
    %161 = tpu.concatenate %160, %159, %160 in 1 : vector<16x8xf32>, vector<16x128xf32>, vector<16x8xf32> -> vector<16x144xf32>
    %cst_77 = arith.constant 0.000000e+00 : f32
    %162 = vector.broadcast %cst_77 : f32 to vector<1x144xf32>
    %163 = tpu.concatenate %162, %161, %162 in 0 : vector<1x144xf32>, vector<16x144xf32>, vector<1x144xf32> -> vector<18x144xf32>
    %cst_78 = arith.constant 0.000000e+00 : f32
    %164 = vector.broadcast %cst_78 : f32 to vector<16x128xf32>
    %c0_79 = arith.constant 0 : index
    %c0_80 = arith.constant 0 : index
    %165 = vector.load %arg14[%c0_79, %c0_80] : memref<1x128xf32, #tpu.memory_space<vmem>>, vector<1x128xf32>
    %166 = vector.broadcast %165 : vector<1x128xf32> to vector<16x128xf32>
    %167 = arith.addf %164, %166 : vector<16x128xf32>
    %168 = vector.extract_strided_slice %163 {offsets = [0, 0], sizes = [16, 128], strides = [1, 1]} : vector<18x144xf32> to vector<16x128xf32>
    %169 = arith.truncf %168 : vector<16x128xf32> to vector<16x128xbf16>
    %c0_81 = arith.constant 0 : index
    %c0_82 = arith.constant 0 : index
    %170 = vector.load %arg13[%c0_81, %c0_82] : memref<1152x128xbf16, #tpu.memory_space<vmem>>, vector<128x128xbf16>
    %cst_83 = arith.constant dense<0.000000e+00> : vector<16x128xf32>
    %171 = tpu.matmul %169, %170, %cst_83 {dimension_numbers = #tpu.dot_dimension_numbers<[1], [0], [0], [1], [0, 0, 1, 1], [], []>} : vector<16x128xbf16>, vector<128x128xbf16>, vector<16x128xf32> -> vector<16x128xf32>
    %172 = arith.addf %167, %171 : vector<16x128xf32>
    %173 = vector.extract_strided_slice %163 {offsets = [0, 8], sizes = [16, 128], strides = [1, 1]} : vector<18x144xf32> to vector<16x128xf32>
    %174 = arith.truncf %173 : vector<16x128xf32> to vector<16x128xbf16>
    %c128_84 = arith.constant 128 : index
    %c0_85 = arith.constant 0 : index
    %175 = vector.load %arg13[%c128_84, %c0_85] : memref<1152x128xbf16, #tpu.memory_space<vmem>>, vector<128x128xbf16>
    %cst_86 = arith.constant dense<0.000000e+00> : vector<16x128xf32>
    %176 = tpu.matmul %174, %175, %cst_86 {dimension_numbers = #tpu.dot_dimension_numbers<[1], [0], [0], [1], [0, 0, 1, 1], [], []>} : vector<16x128xbf16>, vector<128x128xbf16>, vector<16x128xf32> -> vector<16x128xf32>
    %177 = arith.addf %172, %176 : vector<16x128xf32>
    %178 = vector.extract_strided_slice %163 {offsets = [0, 16], sizes = [16, 128], strides = [1, 1]} : vector<18x144xf32> to vector<16x128xf32>
    %179 = arith.truncf %178 : vector<16x128xf32> to vector<16x128xbf16>
    %c256_87 = arith.constant 256 : index
    %c0_88 = arith.constant 0 : index
    %180 = vector.load %arg13[%c256_87, %c0_88] : memref<1152x128xbf16, #tpu.memory_space<vmem>>, vector<128x128xbf16>
    %cst_89 = arith.constant dense<0.000000e+00> : vector<16x128xf32>
    %181 = tpu.matmul %179, %180, %cst_89 {dimension_numbers = #tpu.dot_dimension_numbers<[1], [0], [0], [1], [0, 0, 1, 1], [], []>} : vector<16x128xbf16>, vector<128x128xbf16>, vector<16x128xf32> -> vector<16x128xf32>
    %182 = arith.addf %177, %181 : vector<16x128xf32>
    %183 = vector.extract_strided_slice %163 {offsets = [1, 0], sizes = [16, 128], strides = [1, 1]} : vector<18x144xf32> to vector<16x128xf32>
    %184 = arith.truncf %183 : vector<16x128xf32> to vector<16x128xbf16>
    %c384_90 = arith.constant 384 : index
    %c0_91 = arith.constant 0 : index
    %185 = vector.load %arg13[%c384_90, %c0_91] : memref<1152x128xbf16, #tpu.memory_space<vmem>>, vector<128x128xbf16>
    %cst_92 = arith.constant dense<0.000000e+00> : vector<16x128xf32>
    %186 = tpu.matmul %184, %185, %cst_92 {dimension_numbers = #tpu.dot_dimension_numbers<[1], [0], [0], [1], [0, 0, 1, 1], [], []>} : vector<16x128xbf16>, vector<128x128xbf16>, vector<16x128xf32> -> vector<16x128xf32>
    %187 = arith.addf %182, %186 : vector<16x128xf32>
    %188 = vector.extract_strided_slice %163 {offsets = [1, 8], sizes = [16, 128], strides = [1, 1]} : vector<18x144xf32> to vector<16x128xf32>
    %189 = arith.truncf %188 : vector<16x128xf32> to vector<16x128xbf16>
    %c512_93 = arith.constant 512 : index
    %c0_94 = arith.constant 0 : index
    %190 = vector.load %arg13[%c512_93, %c0_94] : memref<1152x128xbf16, #tpu.memory_space<vmem>>, vector<128x128xbf16>
    %cst_95 = arith.constant dense<0.000000e+00> : vector<16x128xf32>
    %191 = tpu.matmul %189, %190, %cst_95 {dimension_numbers = #tpu.dot_dimension_numbers<[1], [0], [0], [1], [0, 0, 1, 1], [], []>} : vector<16x128xbf16>, vector<128x128xbf16>, vector<16x128xf32> -> vector<16x128xf32>
    %192 = arith.addf %187, %191 : vector<16x128xf32>
    %193 = vector.extract_strided_slice %163 {offsets = [1, 16], sizes = [16, 128], strides = [1, 1]} : vector<18x144xf32> to vector<16x128xf32>
    %194 = arith.truncf %193 : vector<16x128xf32> to vector<16x128xbf16>
    %c640_96 = arith.constant 640 : index
    %c0_97 = arith.constant 0 : index
    %195 = vector.load %arg13[%c640_96, %c0_97] : memref<1152x128xbf16, #tpu.memory_space<vmem>>, vector<128x128xbf16>
    %cst_98 = arith.constant dense<0.000000e+00> : vector<16x128xf32>
    %196 = tpu.matmul %194, %195, %cst_98 {dimension_numbers = #tpu.dot_dimension_numbers<[1], [0], [0], [1], [0, 0, 1, 1], [], []>} : vector<16x128xbf16>, vector<128x128xbf16>, vector<16x128xf32> -> vector<16x128xf32>
    %197 = arith.addf %192, %196 : vector<16x128xf32>
    %198 = vector.extract_strided_slice %163 {offsets = [2, 0], sizes = [16, 128], strides = [1, 1]} : vector<18x144xf32> to vector<16x128xf32>
    %199 = arith.truncf %198 : vector<16x128xf32> to vector<16x128xbf16>
    %c768_99 = arith.constant 768 : index
    %c0_100 = arith.constant 0 : index
    %200 = vector.load %arg13[%c768_99, %c0_100] : memref<1152x128xbf16, #tpu.memory_space<vmem>>, vector<128x128xbf16>
    %cst_101 = arith.constant dense<0.000000e+00> : vector<16x128xf32>
    %201 = tpu.matmul %199, %200, %cst_101 {dimension_numbers = #tpu.dot_dimension_numbers<[1], [0], [0], [1], [0, 0, 1, 1], [], []>} : vector<16x128xbf16>, vector<128x128xbf16>, vector<16x128xf32> -> vector<16x128xf32>
    %202 = arith.addf %197, %201 : vector<16x128xf32>
    %203 = vector.extract_strided_slice %163 {offsets = [2, 8], sizes = [16, 128], strides = [1, 1]} : vector<18x144xf32> to vector<16x128xf32>
    %204 = arith.truncf %203 : vector<16x128xf32> to vector<16x128xbf16>
    %c896_102 = arith.constant 896 : index
    %c0_103 = arith.constant 0 : index
    %205 = vector.load %arg13[%c896_102, %c0_103] : memref<1152x128xbf16, #tpu.memory_space<vmem>>, vector<128x128xbf16>
    %cst_104 = arith.constant dense<0.000000e+00> : vector<16x128xf32>
    %206 = tpu.matmul %204, %205, %cst_104 {dimension_numbers = #tpu.dot_dimension_numbers<[1], [0], [0], [1], [0, 0, 1, 1], [], []>} : vector<16x128xbf16>, vector<128x128xbf16>, vector<16x128xf32> -> vector<16x128xf32>
    %207 = arith.addf %202, %206 : vector<16x128xf32>
    %208 = vector.extract_strided_slice %163 {offsets = [2, 16], sizes = [16, 128], strides = [1, 1]} : vector<18x144xf32> to vector<16x128xf32>
    %209 = arith.truncf %208 : vector<16x128xf32> to vector<16x128xbf16>
    %c1024_105 = arith.constant 1024 : index
    %c0_106 = arith.constant 0 : index
    %210 = vector.load %arg13[%c1024_105, %c0_106] : memref<1152x128xbf16, #tpu.memory_space<vmem>>, vector<128x128xbf16>
    %cst_107 = arith.constant dense<0.000000e+00> : vector<16x128xf32>
    %211 = tpu.matmul %209, %210, %cst_107 {dimension_numbers = #tpu.dot_dimension_numbers<[1], [0], [0], [1], [0, 0, 1, 1], [], []>} : vector<16x128xbf16>, vector<128x128xbf16>, vector<16x128xf32> -> vector<16x128xf32>
    %212 = arith.addf %207, %211 : vector<16x128xf32>
    %cst_108 = arith.constant 0.000000e+00 : f32
    %213 = vector.broadcast %cst_108 : f32 to vector<16x128xf32>
    %214 = arith.maximumf %212, %213 : vector<16x128xf32>
    %cst_109 = arith.constant 0.000000e+00 : f32
    %215 = vector.broadcast %cst_109 : f32 to vector<16x8xf32>
    %216 = tpu.concatenate %215, %214, %215 in 1 : vector<16x8xf32>, vector<16x128xf32>, vector<16x8xf32> -> vector<16x144xf32>
    %cst_110 = arith.constant 0.000000e+00 : f32
    %217 = vector.broadcast %cst_110 : f32 to vector<1x144xf32>
    %218 = tpu.concatenate %217, %216, %217 in 0 : vector<1x144xf32>, vector<16x144xf32>, vector<1x144xf32> -> vector<18x144xf32>
    %cst_111 = arith.constant 0.000000e+00 : f32
    %219 = vector.broadcast %cst_111 : f32 to vector<16x128xf32>
    %c0_112 = arith.constant 0 : index
    %c0_113 = arith.constant 0 : index
    %220 = vector.load %arg16[%c0_112, %c0_113] : memref<1x128xf32, #tpu.memory_space<vmem>>, vector<1x128xf32>
    %221 = vector.broadcast %220 : vector<1x128xf32> to vector<16x128xf32>
    %222 = arith.addf %219, %221 : vector<16x128xf32>
    %223 = vector.extract_strided_slice %218 {offsets = [0, 0], sizes = [16, 128], strides = [1, 1]} : vector<18x144xf32> to vector<16x128xf32>
    %224 = arith.truncf %223 : vector<16x128xf32> to vector<16x128xbf16>
    %c0_114 = arith.constant 0 : index
    %c0_115 = arith.constant 0 : index
    %225 = vector.load %arg15[%c0_114, %c0_115] : memref<1152x128xbf16, #tpu.memory_space<vmem>>, vector<128x128xbf16>
    %cst_116 = arith.constant dense<0.000000e+00> : vector<16x128xf32>
    %226 = tpu.matmul %224, %225, %cst_116 {dimension_numbers = #tpu.dot_dimension_numbers<[1], [0], [0], [1], [0, 0, 1, 1], [], []>} : vector<16x128xbf16>, vector<128x128xbf16>, vector<16x128xf32> -> vector<16x128xf32>
    %227 = arith.addf %222, %226 : vector<16x128xf32>
    %228 = vector.extract_strided_slice %218 {offsets = [0, 8], sizes = [16, 128], strides = [1, 1]} : vector<18x144xf32> to vector<16x128xf32>
    %229 = arith.truncf %228 : vector<16x128xf32> to vector<16x128xbf16>
    %c128_117 = arith.constant 128 : index
    %c0_118 = arith.constant 0 : index
    %230 = vector.load %arg15[%c128_117, %c0_118] : memref<1152x128xbf16, #tpu.memory_space<vmem>>, vector<128x128xbf16>
    %cst_119 = arith.constant dense<0.000000e+00> : vector<16x128xf32>
    %231 = tpu.matmul %229, %230, %cst_119 {dimension_numbers = #tpu.dot_dimension_numbers<[1], [0], [0], [1], [0, 0, 1, 1], [], []>} : vector<16x128xbf16>, vector<128x128xbf16>, vector<16x128xf32> -> vector<16x128xf32>
    %232 = arith.addf %227, %231 : vector<16x128xf32>
    %233 = vector.extract_strided_slice %218 {offsets = [0, 16], sizes = [16, 128], strides = [1, 1]} : vector<18x144xf32> to vector<16x128xf32>
    %234 = arith.truncf %233 : vector<16x128xf32> to vector<16x128xbf16>
    %c256_120 = arith.constant 256 : index
    %c0_121 = arith.constant 0 : index
    %235 = vector.load %arg15[%c256_120, %c0_121] : memref<1152x128xbf16, #tpu.memory_space<vmem>>, vector<128x128xbf16>
    %cst_122 = arith.constant dense<0.000000e+00> : vector<16x128xf32>
    %236 = tpu.matmul %234, %235, %cst_122 {dimension_numbers = #tpu.dot_dimension_numbers<[1], [0], [0], [1], [0, 0, 1, 1], [], []>} : vector<16x128xbf16>, vector<128x128xbf16>, vector<16x128xf32> -> vector<16x128xf32>
    %237 = arith.addf %232, %236 : vector<16x128xf32>
    %238 = vector.extract_strided_slice %218 {offsets = [1, 0], sizes = [16, 128], strides = [1, 1]} : vector<18x144xf32> to vector<16x128xf32>
    %239 = arith.truncf %238 : vector<16x128xf32> to vector<16x128xbf16>
    %c384_123 = arith.constant 384 : index
    %c0_124 = arith.constant 0 : index
    %240 = vector.load %arg15[%c384_123, %c0_124] : memref<1152x128xbf16, #tpu.memory_space<vmem>>, vector<128x128xbf16>
    %cst_125 = arith.constant dense<0.000000e+00> : vector<16x128xf32>
    %241 = tpu.matmul %239, %240, %cst_125 {dimension_numbers = #tpu.dot_dimension_numbers<[1], [0], [0], [1], [0, 0, 1, 1], [], []>} : vector<16x128xbf16>, vector<128x128xbf16>, vector<16x128xf32> -> vector<16x128xf32>
    %242 = arith.addf %237, %241 : vector<16x128xf32>
    %243 = vector.extract_strided_slice %218 {offsets = [1, 8], sizes = [16, 128], strides = [1, 1]} : vector<18x144xf32> to vector<16x128xf32>
    %244 = arith.truncf %243 : vector<16x128xf32> to vector<16x128xbf16>
    %c512_126 = arith.constant 512 : index
    %c0_127 = arith.constant 0 : index
    %245 = vector.load %arg15[%c512_126, %c0_127] : memref<1152x128xbf16, #tpu.memory_space<vmem>>, vector<128x128xbf16>
    %cst_128 = arith.constant dense<0.000000e+00> : vector<16x128xf32>
    %246 = tpu.matmul %244, %245, %cst_128 {dimension_numbers = #tpu.dot_dimension_numbers<[1], [0], [0], [1], [0, 0, 1, 1], [], []>} : vector<16x128xbf16>, vector<128x128xbf16>, vector<16x128xf32> -> vector<16x128xf32>
    %247 = arith.addf %242, %246 : vector<16x128xf32>
    %248 = vector.extract_strided_slice %218 {offsets = [1, 16], sizes = [16, 128], strides = [1, 1]} : vector<18x144xf32> to vector<16x128xf32>
    %249 = arith.truncf %248 : vector<16x128xf32> to vector<16x128xbf16>
    %c640_129 = arith.constant 640 : index
    %c0_130 = arith.constant 0 : index
    %250 = vector.load %arg15[%c640_129, %c0_130] : memref<1152x128xbf16, #tpu.memory_space<vmem>>, vector<128x128xbf16>
    %cst_131 = arith.constant dense<0.000000e+00> : vector<16x128xf32>
    %251 = tpu.matmul %249, %250, %cst_131 {dimension_numbers = #tpu.dot_dimension_numbers<[1], [0], [0], [1], [0, 0, 1, 1], [], []>} : vector<16x128xbf16>, vector<128x128xbf16>, vector<16x128xf32> -> vector<16x128xf32>
    %252 = arith.addf %247, %251 : vector<16x128xf32>
    %253 = vector.extract_strided_slice %218 {offsets = [2, 0], sizes = [16, 128], strides = [1, 1]} : vector<18x144xf32> to vector<16x128xf32>
    %254 = arith.truncf %253 : vector<16x128xf32> to vector<16x128xbf16>
    %c768_132 = arith.constant 768 : index
    %c0_133 = arith.constant 0 : index
    %255 = vector.load %arg15[%c768_132, %c0_133] : memref<1152x128xbf16, #tpu.memory_space<vmem>>, vector<128x128xbf16>
    %cst_134 = arith.constant dense<0.000000e+00> : vector<16x128xf32>
    %256 = tpu.matmul %254, %255, %cst_134 {dimension_numbers = #tpu.dot_dimension_numbers<[1], [0], [0], [1], [0, 0, 1, 1], [], []>} : vector<16x128xbf16>, vector<128x128xbf16>, vector<16x128xf32> -> vector<16x128xf32>
    %257 = arith.addf %252, %256 : vector<16x128xf32>
    %258 = vector.extract_strided_slice %218 {offsets = [2, 8], sizes = [16, 128], strides = [1, 1]} : vector<18x144xf32> to vector<16x128xf32>
    %259 = arith.truncf %258 : vector<16x128xf32> to vector<16x128xbf16>
    %c896_135 = arith.constant 896 : index
    %c0_136 = arith.constant 0 : index
    %260 = vector.load %arg15[%c896_135, %c0_136] : memref<1152x128xbf16, #tpu.memory_space<vmem>>, vector<128x128xbf16>
    %cst_137 = arith.constant dense<0.000000e+00> : vector<16x128xf32>
    %261 = tpu.matmul %259, %260, %cst_137 {dimension_numbers = #tpu.dot_dimension_numbers<[1], [0], [0], [1], [0, 0, 1, 1], [], []>} : vector<16x128xbf16>, vector<128x128xbf16>, vector<16x128xf32> -> vector<16x128xf32>
    %262 = arith.addf %257, %261 : vector<16x128xf32>
    %263 = vector.extract_strided_slice %218 {offsets = [2, 16], sizes = [16, 128], strides = [1, 1]} : vector<18x144xf32> to vector<16x128xf32>
    %264 = arith.truncf %263 : vector<16x128xf32> to vector<16x128xbf16>
    %c1024_138 = arith.constant 1024 : index
    %c0_139 = arith.constant 0 : index
    %265 = vector.load %arg15[%c1024_138, %c0_139] : memref<1152x128xbf16, #tpu.memory_space<vmem>>, vector<128x128xbf16>
    %cst_140 = arith.constant dense<0.000000e+00> : vector<16x128xf32>
    %266 = tpu.matmul %264, %265, %cst_140 {dimension_numbers = #tpu.dot_dimension_numbers<[1], [0], [0], [1], [0, 0, 1, 1], [], []>} : vector<16x128xbf16>, vector<128x128xbf16>, vector<16x128xf32> -> vector<16x128xf32>
    %267 = arith.addf %262, %266 : vector<16x128xf32>
    %268 = vector.extract_strided_slice %163 {offsets = [1, 8], sizes = [16, 128], strides = [1, 1]} : vector<18x144xf32> to vector<16x128xf32>
    %269 = arith.addf %267, %268 : vector<16x128xf32>
    %cst_141 = arith.constant 0.000000e+00 : f32
    %270 = vector.broadcast %cst_141 : f32 to vector<16x128xf32>
    %271 = arith.maximumf %269, %270 : vector<16x128xf32>
    %272 = arith.truncf %271 : vector<16x128xf32> to vector<16x128xbf16>
    %c0_142 = arith.constant 0 : index
    %c0_143 = arith.constant 0 : index
    %c0_144 = arith.constant 0 : index
    %273 = vector.load %arg17[%c0_142, %c0_143, %c0_144] : memref<1x16x128xbf16, #tpu.memory_space<vmem>>, vector<1x16x128xbf16>
    %274 = vector.shape_cast %273 : vector<1x16x128xbf16> to vector<16x128xbf16>
    %275 = vector.shape_cast %272 : vector<16x128xbf16> to vector<1x16x128xbf16>
    tpu.vector_store %arg17[%c0_142, %c0_143, %c0_144], %275 {strides = array<i32>} : memref<1x16x128xbf16, #tpu.memory_space<vmem>>, vector<1x16x128xbf16>,
    return
  }
  func.func @transform_0(%arg0: i32) -> (i32, i32, i32) {
    %c0_i32 = arith.constant 0 : i32
    %c0_i32_0 = arith.constant 0 : i32
    %c0_i32_1 = arith.constant 0 : i32
    return %arg0, %c0_i32, %c0_i32_0 : i32, i32, i32
  }
  func.func @transform_1(%arg0: i32) -> (i32, i32) {
    %c0_i32 = arith.constant 0 : i32
    %c0_i32_0 = arith.constant 0 : i32
    %c0_i32_1 = arith.constant 0 : i32
    return %c0_i32, %c0_i32_0 : i32, i32
  }
  func.func @transform_2(%arg0: i32) -> (i32, i32) {
    %c0_i32 = arith.constant 0 : i32
    %c0_i32_0 = arith.constant 0 : i32
    %c0_i32_1 = arith.constant 0 : i32
    return %c0_i32, %c0_i32_0 : i32, i32
  }
  func.func @transform_3(%arg0: i32) -> (i32, i32) {
    %c0_i32 = arith.constant 0 : i32
    %c0_i32_0 = arith.constant 0 : i32
    %c0_i32_1 = arith.constant 0 : i32
    return %c0_i32, %c0_i32_0 : i32, i32
  }
  func.func @transform_4(%arg0: i32) -> (i32, i32) {
    %c0_i32 = arith.constant 0 : i32
    %c0_i32_0 = arith.constant 0 : i32
    %c0_i32_1 = arith.constant 0 : i32
    return %c0_i32, %c0_i32_0 : i32, i32
  }
  func.func @transform_5(%arg0: i32) -> (i32, i32) {
    %c0_i32 = arith.constant 0 : i32
    %c0_i32_0 = arith.constant 0 : i32
    %c0_i32_1 = arith.constant 0 : i32
    return %c0_i32, %c0_i32_0 : i32, i32
  }
  func.func @transform_6(%arg0: i32) -> (i32, i32) {
    %c0_i32 = arith.constant 0 : i32
    %c0_i32_0 = arith.constant 0 : i32
    %c0_i32_1 = arith.constant 0 : i32
    return %c0_i32, %c0_i32_0 : i32, i32
  }
  func.func @transform_7(%arg0: i32) -> (i32, i32) {
    %c0_i32 = arith.constant 0 : i32
    %c0_i32_0 = arith.constant 0 : i32
    %c0_i32_1 = arith.constant 0 : i32
    return %c0_i32, %c0_i32_0 : i32, i32
  }
  func.func @transform_8(%arg0: i32) -> (i32, i32) {
    %c0_i32 = arith.constant 0 : i32
    %c0_i32_0 = arith.constant 0 : i32
    %c0_i32_1 = arith.constant 0 : i32
    return %c0_i32, %c0_i32_0 : i32, i32
  }
  func.func @transform_9(%arg0: i32) -> (i32, i32) {
    %c0_i32 = arith.constant 0 : i32
    %c0_i32_0 = arith.constant 0 : i32
    %c0_i32_1 = arith.constant 0 : i32
    return %c0_i32, %c0_i32_0 : i32, i32
  }
  func.func @transform_10(%arg0: i32) -> (i32, i32) {
    %c0_i32 = arith.constant 0 : i32
    %c0_i32_0 = arith.constant 0 : i32
    %c0_i32_1 = arith.constant 0 : i32
    return %c0_i32, %c0_i32_0 : i32, i32
  }
  func.func @transform_11(%arg0: i32) -> (i32, i32) {
    %c0_i32 = arith.constant 0 : i32
    %c0_i32_0 = arith.constant 0 : i32
    %c0_i32_1 = arith.constant 0 : i32
    return %c0_i32, %c0_i32_0 : i32, i32
  }
  func.func @transform_12(%arg0: i32) -> (i32, i32) {
    %c0_i32 = arith.constant 0 : i32
    %c0_i32_0 = arith.constant 0 : i32
    %c0_i32_1 = arith.constant 0 : i32
    return %c0_i32, %c0_i32_0 : i32, i32
  }
  func.func @transform_13(%arg0: i32) -> (i32, i32) {
    %c0_i32 = arith.constant 0 : i32
    %c0_i32_0 = arith.constant 0 : i32
    %c0_i32_1 = arith.constant 0 : i32
    return %c0_i32, %c0_i32_0 : i32, i32
  }
  func.func @transform_14(%arg0: i32) -> (i32, i32) {
    %c0_i32 = arith.constant 0 : i32
    %c0_i32_0 = arith.constant 0 : i32
    %c0_i32_1 = arith.constant 0 : i32
    return %c0_i32, %c0_i32_0 : i32, i32
  }
  func.func @transform_15(%arg0: i32) -> (i32, i32) {
    %c0_i32 = arith.constant 0 : i32
    %c0_i32_0 = arith.constant 0 : i32
    %c0_i32_1 = arith.constant 0 : i32
    return %c0_i32, %c0_i32_0 : i32, i32
  }
  func.func @transform_16(%arg0: i32) -> (i32, i32, i32) {
    %c0_i32 = arith.constant 0 : i32
    %c0_i32_0 = arith.constant 0 : i32
    %c0_i32_1 = arith.constant 0 : i32
    return %arg0, %c0_i32, %c0_i32_0 : i32, i32, i32
  }
}

</mosaic_0001>

<bundles_post_ra>
// kernel: attention_up_block_forward.1
= control target key start
LH: loop header
LB: loop body
LE: loop exit
PB: predicated region body
PF: predicated region fallthrough
CT: control target
= control target key end

     0   :  { %s7539_s23 = smov 0   ;;  %s9132_s0 = inlined_call_operand.vmem [shape: bf16[4,18,288], index: 0, kind: input, shape index: {}]   ;;  %s9133_s1 = inlined_call_operand.vmem [shape: bf16[288,72], index: 1, kind: input, shape index: {}]   ;;  %s9134_s2 = inlined_call_operand.vmem [shape: f32[1,72], index: 2, kind: input, shape index: {}]   ;;  %s9135_s3 = inlined_call_operand.vmem [shape: f32[72,18], index: 3, kind: input, shape index: {}]   ;;  %s9136_s4 = inlined_call_operand.<no memory space> [shape: f32[1,1], index: 4, kind: input, shape index: {}]   ;;  %s9137_s5 = inlined_call_operand.vmem [shape: f32[18,288], index: 5, kind: input, shape index: {}]   ;;  %s9138_s6 = inlined_call_operand.vmem [shape: bf16[2304,128], index: 6, kind: input, shape index: {}]   ;;  %s9139_s7 = inlined_call_operand.vmem [shape: f32[1,128], index: 7, kind: input, shape index: {}]   ;;  %s9140_s8 = inlined_call_operand.vmem [shape: bf16[1152,128], index: 8, kind: input, shape index: {}]   ;;  %s9141_s9 = inlined_call_operand.vmem [shape: f32[1,128], index: 9, kind: input, shape index: {}]   ;;  %s9142_s10 = inlined_call_operand.vmem [shape: bf16[256,128], index: 10, kind: input, shape index: {}]   ;;  %s9143_s11 = inlined_call_operand.vmem [shape: f32[1,128], index: 11, kind: input, shape index: {}]   ;;  %s9144_s12 = inlined_call_operand.vmem [shape: bf16[1152,128], index: 12, kind: input, shape index: {}]   ;;  %s9145_s13 = inlined_call_operand.vmem [shape: f32[1,128], index: 13, kind: input, shape index: {}]   ;;  %s9146_s14 = inlined_call_operand.vmem [shape: bf16[1152,128], index: 14, kind: input, shape index: {}]   ;;  %s9147_s15 = inlined_call_operand.vmem [shape: f32[1,128], index: 15, kind: input, shape index: {}]   ;;  %s9148_s16 = inlined_call_operand.vmem [shape: bf16[4,16,128], index: 16, kind: output, shape index: {}]  }
   0x1   :  { %9151 = sst [smem:[#allocation3_spill]] %s9132_s0 }
   0x2   :  { %21 = sst [smem:[#allocation2]] %s9136_s4 }
   0x3 LB: > { %s5358_s24 = sadd.s32 4294967295, %s7443_s23   ;;  %p5362_p0 = scmp.ge.s32.totalorder %s7443_s23, 1  ;;  %s7443_s23 = sphi %s7539_s23, %s27_s23  }
   0x4   : > { %p463_p1 = scmp.lt.s32.totalorder %s7443_s23, 5 }
   0x6   : > { %p464_p2 = pnand %p5362_p0, %p463_p1 }
   0x7   : > { %p513_p3 = scmp.lt.s32.totalorder (!%p464_p2), %s5358_s24, 3  ;;  %s9152_s29 = sld [smem:[#allocation3_spill]] (!%p464_p2) }
   0x8   : > { %467 = sbr.rel (%p464_p2) target bundleno = 2062 (0x80e), region = 84  ;;  %s776_s17 = sld [smem:[#allocation2]] (!%p464_p2) }
   0x9   : > { %s7446_s0 = smov (!%p464_p2), 112  }
   0xd   : > { %v7002_v0 = vld [vmem:[%s9133_s1 + $0x38] sm:$0xff]  ;;  %v7001_v2 = vld [vmem:[%s9133_s1 + $0x30] sm:$0xff]  ;;  %v7012_v4 = vld [vmem:[%s9133_s1 + $0x88] sm:$0xff]  ;;  %s9157_s24 = smov (!%p513_p3, %s5358_s24), 3  ;;  %vm703_vm0 = vcmask 261120   ;;  %vm778_vm1 = vcmask 588800  }
   0xe   : > { %v7010_v1 = vld [vmem:[%s9133_s1 + $0x78] sm:$0xff]  ;;  %710 = vmatpush.bf16.msra.mxu0 %v7002_v0  ;;  %v7009_v3 = vld [vmem:[%s9133_s1 + $0x70] sm:$0xff]  ;;  %752 = vmatpush.bf16.msra.mxu2 %v7012_v4  ;;  %v7011_v5 = vld [vmem:[%s9133_s1 + $0x80] sm:$0xff]  ;;  %s7394_s21 = smul.u32 36, %s9157_s24  ;;  %vm939_vm2 = vcmask 1041408   ;;  %vm929_vm6 = vcmask 146432  }
   0xf   : > { %728 = vmatpush.bf16.msra.mxu1 %v7010_v1  ;;  %v7000_v6 = vld [vmem:[%s9133_s1 + $0x28] sm:$0xff]  ;;  %v6999_v11 = vld [vmem:[%s9133_s1 + $0x20] sm:$0xff]  ;;  %v6998_v13 = vld [vmem:[%s9133_s1 + $0x18] sm:$0xff]  ;;  %s6991_s18 = sshll.u32 %s9157_s24, 3 }
  0x10   : > { %v7008_v7 = vld [vmem:[%s9133_s1 + $0x68] sm:$0xff]  ;;  %s7577_s30 = scalar_lea.vmem %s9152_s29, %s7394_s21  ;;  %v7007_v12 = vld [vmem:[%s9133_s1 + $0x60] sm:$0xff]  ;;  %v7006_v14 = vld [vmem:[%s9133_s1 + $0x58] sm:$0xff]  ;;  %s9149_s29 = smov 120  }
  0x11   : > { %v5376_v8 = vld [vmem:[%s7577_s30 + $0x8] sm:$0xf]  ;;  %v6994_v9 = vld [vmem:[%s7577_s30 + $0x10] sm:$0xf0]  ;;  %v7595_v15 = vld [vmem:[%s7577_s30 + $0x20] sm:$0x1]  ;;  %s522_s20 = scalar_lea.vmem %s9148_s16, %s6991_s18 }
  0x12   : > { %711 = vmatpush.bf16.msra.mxu0 %v7001_v2  ;;  %753 = vmatpush.bf16.msra.mxu2 %v7011_v5  ;;  %v5377_v10 = vor.u32 %v6994_v9, %v5376_v8  ;;  %v775_v16 = vld [vmem:[%s9135_s3 + $0x40] sm:$0xff]  ;;  %v6997_v17 = vld [vmem:[%s9133_s1 + $0x10] sm:$0xff]  ;;  %v774_v19 = vld [vmem:[%s9135_s3 + $0x38] sm:$0xff]  ;;  %v584_v20 = vunpack.c.l.b16 %v7595_v15 }
  0x13   : > { %729 = vmatpush.bf16.msra.mxu1 %v7009_v3  ;;  %v7005_v18 = vld [vmem:[%s9133_s1 + $0x50] sm:$0xff]  ;;  %795 = vmatpush.msra.mxu3 %v775_v16  ;;  %v6996_v21 = vld [vmem:[%s9133_s1 + $0x8] sm:$0xff]  ;;  %v6995_v24 = vld [vmem:[%s9133_s1] sm:$0xff] }
  0x14   : > { %v7004_v22 = vld [vmem:[%s9133_s1 + $0x48] sm:$0xff]  ;;  %v590_v23 = vpack.c.b16 %v584_v20, %v584_v20  ;;  %v7003_v25 = vld [vmem:[%s9133_s1 + $0x40] sm:$0xff]  ;;  %v5370_v29 = vld [vmem:[%s7577_s30 + $0xc] sm:$0xf0] }
  0x15   : > { %5450 = vmatmul.msk.bf16.vlgmr.msra.gmra.mxu2 %vm703_vm0, %v5377_v10  ;;  %796 = vmatpush.msra.mxu3 %v774_v19  ;;  %v5368_v26 = vld [vmem:[%s7577_s30] sm:$0xf]  ;;  %v6993_v27 = vld [vmem:[%s7577_s30 + $0x8] sm:$0xf0]  ;;  %v6992_v28 = vld [vmem:[%s7577_s30 + $0x4] sm:$0xf] }
  0x16   : > { %712 = vmatpush.bf16.msra.mxu0 %v7000_v6  ;;  %v5369_v30 = vor.u32 %v6993_v27, %v5368_v26  ;;  %v5373_v31 = vor.u32 %v6992_v28, %v5370_v29  ;;  %v7628_v32 = vld [vmem:[%s7577_s30 + $0x18] sm:$0x11]  ;;  %v773_v37 = vld [vmem:[%s9135_s3 + $0x30] sm:$0xff]  ;;  %v772_v38 = vld [vmem:[%s9135_s3 + $0x28] sm:$0xff] }
  0x17   : > { %730 = vmatpush.bf16.msra.mxu1 %v7008_v7  ;;  %v582_v33 = vunpack.c.l.b16 %v7628_v32  ;;  %v583_v34 = vunpack.c.h.b16 %v7628_v32  ;;  %797 = vmatpush.msra.mxu3 %v773_v37  ;;  %v771_v39 = vld [vmem:[%s9135_s3 + $0x20] sm:$0xff]  ;;  %v770_v40 = vld [vmem:[%s9135_s3 + $0x18] sm:$0xff]  ;;  %v769_v41 = vld [vmem:[%s9135_s3 + $0x10] sm:$0xff] }
  0x18   : > { %v768_v42 = vld [vmem:[%s9135_s3 + $0x8] sm:$0xff]  ;;  %v767_v43 = vld [vmem:[%s9135_s3] sm:$0xff]  ;;  %v877_v5 = vld [vmem:[%s9137_s5 + $0x30] sm:$0x3] }
  0x19   : > { %v588_v35 = vpack.c.b16 %v582_v33, %v582_v33  ;;  %v589_v36 = vpack.c.b16 %v583_v34, %v583_v34  ;;  %798 = vmatpush.msra.mxu3 %v772_v38  ;;  %v7419_v46 = vld [vmem:[%s9134_s2] ss:$0 sm:$0xff]  ;;  %5461 = vmatpush.msk.msrb.mxu2 %vm939_vm2, %v877_v5  ;;  %v878_v6 = vld [vmem:[%s9137_s5 + $0x38] sm:$0x3]  ;;  %v876_v10 = vld [vmem:[%s9137_s5 + $0x28] sm:$0xff] }
  0x1a   : > { %713 = vmatpush.bf16.msra.mxu0 %v6999_v11  ;;  %v879_v7 = vld [vmem:[%s9137_s5 + $0x40] sm:$0x3]  ;;  %v874_v8 = vld [vmem:[%s9137_s5 + $0x18] sm:$0xff]  ;;  %v7019_v28 = vld [vmem:[%s9138_s6 + $0x30] sm:$0xff] }
  0x1b   : > { %731 = vmatpush.bf16.msra.mxu1 %v7007_v12  ;;  %799 = vmatpush.msra.mxu3 %v771_v39  ;;  %v875_v9 = vld [vmem:[%s9137_s5 + $0x20] sm:$0xff]  ;;  %v872_v12 = vld [vmem:[%s9137_s5 + $0x8] sm:$0xff]  ;;  %v7028_v26 = vld [vmem:[%s9138_s6 + $0x78] sm:$0xff] }
  0x1c   : > { %963 = vmatpush.msrb.mxu2 %v874_v8  ;;  %v871_v11 = vld [vmem:[%s9137_s5] sm:$0xff]  ;;  %v7027_v29 = vld [vmem:[%s9138_s6 + $0x70] sm:$0xff]  ;;  %v7026_v37 = vld [vmem:[%s9138_s6 + $0x68] sm:$0xff] }
  0x1d   : > { %800 = vmatpush.msra.mxu3 %v770_v40  ;;  %v7025_v5 = vld [vmem:[%s9138_s6 + $0x60] sm:$0xff]  ;;  %v7015_v8 = vld [vmem:[%s9138_s6 + $0x10] sm:$0xff] }
  0x1e   : > { %714 = vmatpush.bf16.msra.mxu0 %v6998_v13  ;;  %v873_v13 = vld [vmem:[%s9137_s5 + $0x10] sm:$0xff]  ;;  %964 = vmatpush.msrb.mxu2 %v871_v11  ;;  %v7022_v11 = vld [vmem:[%s9138_s6 + $0x48] sm:$0xff] }
  0x1f   : > { %732 = vmatpush.bf16.msra.mxu1 %v7006_v14  ;;  %801 = vmatpush.msra.mxu3 %v769_v41  ;;  %v777_v14 = vstv %s776_s17  ;;  %s7448_s17 = smov 8  }
  0x20   : > { %1194 = vmatpush.bf16.msra.mxu2 %v7028_v26  ;;  %v527_v26 = vld [vmem:[%s7577_s30 + $0x14] sm:$0xf] }
  0x21   : > { %802 = vmatpush.msra.mxu3 %v768_v42 }
  0x22   : > { %715 = vmatpush.bf16.msra.mxu0 %v6997_v17 }
  0x23   : > { %733 = vmatpush.bf16.msra.mxu1 %v7005_v18  ;;  %803 = vmatpush.msra.mxu3 %v767_v43 }
  0x24   : > { %1195 = vmatpush.bf16.msra.mxu2 %v7027_v29 }
  0x25   : > { %5451 = vmatmul.msk.bf16.gmra.mxu2 %vm703_vm0, %v590_v23  ;;  %5465 = vmatpush.msk.msrb.mxu3 %vm939_vm2, %v878_v6  ;;  %v7016_v6 = vld [vmem:[%s9138_s6 + $0x18] sm:$0xff] }
  0x26   : > { %716 = vmatpush.bf16.msra.mxu0 %v6996_v21 }
  0x27   : > { %734 = vmatpush.bf16.msra.mxu1 %v7004_v22  ;;  %989 = vmatpush.msrb.mxu3 %v875_v9  ;;  %v7023_v9 = vld [vmem:[%s9138_s6 + $0x50] sm:$0xff] }
  0x28   : > { %1196 = vmatpush.bf16.msra.mxu2 %v7026_v37 }
  0x29   : > { %990 = vmatpush.msrb.mxu3 %v872_v12  ;;  %v7013_v12 = vld [vmem:[%s9138_s6] sm:$0xff] }
  0x2a   : > { %717 = vmatpush.bf16.msra.mxu0 %v6995_v24 }
  0x2b   : > { %735 = vmatpush.bf16.msra.mxu1 %v7003_v25  ;;  %v7020_v25 = vld [vmem:[%s9138_s6 + $0x38] sm:$0xff] }
  0x2c   : > { %1197 = vmatpush.bf16.msra.mxu2 %v7025_v5 }
  0x2d   : > { %718 = vmatmul.bf16.vlgmr.msra.gmra.mxu0 %v5369_v30 }
  0x2e   : > { %736 = vmatmul.bf16.vlgmr.msra.gmra.mxu1 %v5373_v31  ;;  %5469 = vmatpush.msk.msrb.mxu0 %vm939_vm2, %v879_v7  ;;  %v7024_v7 = vld [vmem:[%s9138_s6 + $0x58] sm:$0xff] }
  0x2f   : > { %1180 = vmatpush.bf16.msrb.mxu1 %v7020_v25 }
  0x30   : > { %1015 = vmatpush.msrb.mxu0 %v876_v10  ;;  %1198 = vmatpush.bf16.msra.mxu2 %v7024_v7  ;;  %v7014_v10 = vld [vmem:[%s9138_s6 + $0x8] sm:$0xff] }
  0x32   : > { %1016 = vmatpush.msrb.mxu0 %v873_v13  ;;  %v7021_v13 = vld [vmem:[%s9138_s6 + $0x40] sm:$0xff] }
  0x33   : > { %1181 = vmatpush.bf16.msrb.mxu1 %v7019_v28 }
  0x34   : > { %1199 = vmatpush.bf16.msra.mxu2 %v7023_v9 }
  0x38   : > { %1200 = vmatpush.bf16.msra.mxu2 %v7022_v11 }
  0x3c   : > { %1201 = vmatpush.bf16.msra.mxu2 %v7021_v13 }
  0x3d   : > { %723 = vmatmul.bf16.gmra.mxu0 %v588_v35 }
  0x3e   : > { %741 = vmatmul.bf16.gmra.mxu1 %v589_v36  ;;  %v7018_v36 = vld [vmem:[%s9138_s6 + $0x28] sm:$0xff] }
  0x3f   : > { %1182 = vmatpush.bf16.msrb.mxu1 %v7018_v36 }
  0x98   : > { %v755_v44 = vpop.f32.mrf.mxu2 }
  0xa0   : > { %v757_v45 = vpop.f32.mrf.mxu2 }
  0xa8   : > { %v760_v50 = vpop.f32.mrf.mxu2 }
  0xaa   : > { %v719_v47 = vpop.f32.mrf.mxu0 }
  0xab   : > { %v737_v48 = vpop.f32.mrf.mxu1  ;;  %v720_v49 = vadd.f32 %v7419_v46, %v719_v47 }
  0xad   : > { %v738_v51 = vadd.f32 %v737_v48, %v720_v49 }
  0xaf   : > { %v756_v52 = vadd.f32 %v755_v44, %v738_v51 }
  0xb0   : > { %v762_v57 = vpop.f32.mrf.mxu2 }
  0xb1   : > { %v764_v53 = vmax.f32 %v756_v52, 0.0 }
  0xb2   : > { %v721_v54 = vpop.f32.mrf.mxu0 }
  0xb3   : > { %v739_v55 = vpop.f32.mrf.mxu1  ;;  %v722_v56 = vadd.f32 %v7419_v46, %v721_v54  ;;  %5452 = vmatmul.msk.f32.vlgmr.msra.gmra.mxu3 %vm778_vm1, %v764_v53 }
  0xb5   : > { %v740_v58 = vadd.f32 %v739_v55, %v722_v56 }
  0xb7   : > { %v758_v59 = vadd.f32 %v757_v45, %v740_v58 }
  0xb9   : > { %v765_v60 = vmax.f32 %v758_v59, 0.0 }
  0xba   : > { %v724_v61 = vpop.f32.mrf.mxu0 }
  0xbb   : > { %v742_v62 = vpop.f32.mrf.mxu1  ;;  %v725_v63 = vadd.f32 %v7419_v46, %v724_v61  ;;  %5453 = vmatmul.msk.f32.gmra.mxu3 %vm778_vm1, %v765_v60 }
  0xbd   : > { %v743_v0 = vadd.f32 %v742_v62, %v725_v63 }
  0xbf   : > { %v761_v1 = vadd.f32 %v760_v50, %v743_v0 }
  0xc1   : > { %v766_v2 = vmax.f32 %v761_v1, 0.0 }
  0xc2   : > { %v726_v3 = vpop.f32.mrf.mxu0 }
  0xc3   : > { %v744_v4 = vpop.f32.mrf.mxu1  ;;  %5454 = vmatmul.msk.f32.gmra.mxu3 %vm778_vm1, %v766_v2 }
  0xc4   : > { %v7017_v4 = vld [vmem:[%s9138_s6 + $0x20] sm:$0xff] }
  0xc5   : > { %1183 = vmatpush.bf16.msrb.mxu1 %v7017_v4 }
  0xc9   : > { %1184 = vmatpush.bf16.msrb.mxu1 %v7016_v6 }
  0xcd   : > { %1185 = vmatpush.bf16.msrb.mxu1 %v7015_v8 }
  0xd1   : > { %1186 = vmatpush.bf16.msrb.mxu1 %v7014_v10 }
  0xd5   : > { %1187 = vmatpush.bf16.msrb.mxu1 %v7013_v12 }
 0x136   : > { %v805_v16 = vpop.f32.mrf.mxu3 }
 0x137   : > { %v806_v17 = vadd.f32 %v805_v16, %v777_v14 }
 0x139   : > { %v5455_v18 = vmul.f32 -1.442695, %v806_v17 }
 0x13b   : > { %7425 = vpow2.f32 %v5455_v18 }
 0x13e   : > { %v808_v19 = vpop.f32.mrf.mxu3 }
 0x13f   : > { %v809_v20 = vadd.f32 %v808_v19, %v777_v14 }
 0x141   : > { %v7426_v21 = vpop.eup %7425  ;;  %v5456_v22 = vmul.f32 -1.442695, %v809_v20 }
 0x142   : > { %v823_v23 = vadd.f32 1.0, %v7426_v21 }
 0x143   : > { %7427 = vpow2.f32 %v5456_v22 }
 0x144   : > { %7429 = vrcp.f32 %v823_v23  ;;  %v837_v39 = vand.u32 2147483648, %v823_v23  ;;  %v835_v41 = vand.u32 2147483647, %v823_v23  ;;  %vm831_vm4 = vweird.f32 %v823_v23 }
 0x146   : > { %v811_v24 = vpop.f32.mrf.mxu3  ;;  %v838_v46 = vor.u32 1.1754944e-38, %v837_v39  ;;  %vm836_vm7 = vcmp.eq.f32.partialorder %v835_v41, 8.507059e+37 }
 0x147   : > { %v812_v27 = vadd.f32 %v811_v24, %v777_v14  ;;  %v880_v14 = vlaneseq  ;;  %v7445_v24 = vmov 0.0  }
 0x149   : > { %v7428_v30 = vpop.eup %7427  ;;  %v5457_v31 = vmul.f32 -1.442695, %v812_v27  ;;  %v881_v16 = vand.u32 127, %v880_v14 }
 0x14a   : > { %v7430_v33 = vpop.eup %7429  ;;  %v824_v34 = vadd.f32 1.0, %v7428_v30 }
 0x14b   : > { %7431 = vpow2.f32 %v5457_v31  ;;  %v827_v35 = vmul.f32 %v7430_v33, %v823_v23  ;;  %vm832_vm3 = vweird.f32 %v7430_v33  ;;  %v883_v17 = vadd.s32 256, %v881_v16  ;;  %v525_v23 = vld [vmem:[%s7577_s30 + $0x8] sm:$0xf] }
 0x14c   : > { %7433 = vrcp.f32 %v824_v34  ;;  %vm833_vm5 = vmor %vm831_vm4, %vm832_vm3  ;;  %v852_v51 = vand.u32 2147483648, %v824_v34  ;;  %v850_v53 = vand.u32 2147483647, %v824_v34  ;;  %vm846_vm9 = vweird.f32 %v824_v34 }
 0x14d   : > { %v828_v38 = vsub.f32 1.0, %v827_v35  ;;  %v902_v18 = vand.u32 15, %v883_v17  ;;  %v882_v19 = vadd.s32 128, %v881_v16  ;;  %v888_v21 = vand.u32 15, %v881_v16  ;;  %v7052_v17 = vld [vmem:[%s9138_s6 + $0x138] sm:$0xff] }
 0x14e   : > { %v853_v56 = vor.u32 1.1754944e-38, %v852_v51  ;;  %vm851_vm11 = vcmp.eq.f32.partialorder %v850_v53, 8.507059e+37  ;;  %v1029_v30 = vunpack.c.l.bf16 %v525_v23  ;;  %v1032_v31 = vunpack.c.l.bf16 %v527_v26  ;;  %v7060_v23 = vld [vmem:[%s9138_s6 + $0x178] sm:$0xff]  ;;  %1522 = vmatpush.bf16.msra.mxu1 %v7052_v17  ;;  %v7051_v26 = vld [vmem:[%s9138_s6 + $0x130] sm:$0xff]  ;;  %v7074_v17 = vld [vmem:[%s9138_s6 + $0x1e8] sm:$0xff] }
 0x14f   : > { %v829_v40 = vmul.f32 %v7430_v33, %v828_v38  ;;  %vm922_vm0 = vcmp.ge.s32.totalorder %v902_v18, 8  ;;  %v895_v22 = vand.u32 15, %v882_v19  ;;  %vm920_vm1 = vcmp.ge.s32.totalorder %v888_v21, 8  ;;  %v526_v38 = vld [vmem:[%s7577_s30 + $0xc] sm:$0xff]  ;;  %v7036_v18 = vld [vmem:[%s9138_s6 + $0xb8] sm:$0xff] }
 0x150   : > { %v5460_v25 = vsel %vm922_vm0, 1.0, %v7445_v24  ;;  %v5458_v35 = vsel %vm920_vm1, 1.0, %v7445_v24  ;;  %vm1586_vm3 = vsmask.f32 7424  ;;  %1353 = vmatpush.bf16.msra.mxu3 %v7036_v18  ;;  %vm2122_vm4 = vcmask 1046528   ;;  %v7090_v18 = vld [vmem:[%s9138_s6 + $0x268] sm:$0xff] }
 0x151   : > { %v7432_v42 = vpop.eup %7431  ;;  %v830_v43 = vadd.f32 %v7430_v33, %v829_v40  ;;  %vm921_vm2 = vcmp.ge.s32.totalorder %v895_v22, 8  ;;  %v7044_v22 = vld [vmem:[%s9138_s6 + $0xf8] sm:$0xff] }
 0x152   : > { %v7434_v44 = vpop.eup %7433  ;;  %v825_v45 = vadd.f32 1.0, %v7432_v42  ;;  %v5459_v36 = vsel %vm921_vm2, 1.0, %v7445_v24  ;;  %1367 = vmatpush.bf16.msra.mxu0 %v7044_v22  ;;  %1523 = vmatpush.bf16.msra.mxu1 %v7051_v26  ;;  %v7079_v22 = vld [vmem:[%s9138_s6 + $0x210] sm:$0xff]  ;;  %v7088_v26 = vld [vmem:[%s9138_s6 + $0x258] sm:$0xff] }
 0x153   : > { %v834_v47 = vsel %vm833_vm5, %v7430_v33, %v830_v43  ;;  %v842_v48 = vmul.f32 %v7434_v44, %v824_v34  ;;  %vm847_vm8 = vweird.f32 %v7434_v44  ;;  %v524_v33 = vld [vmem:[%s7577_s30] sm:$0xff]  ;;  %s7447_s30 = smov 96   ;;  %vm1421_vm5 = vcmask 785408  }
 0x154   : > { %7435 = vrcp.f32 %v825_v45  ;;  %v839_v49 = vsel %vm836_vm7, %v838_v46, %v834_v47  ;;  %vm848_vm10 = vmor %vm846_vm9, %vm847_vm8  ;;  %v867_v60 = vand.u32 2147483648, %v825_v45  ;;  %vm861_vm12 = vweird.f32 %v825_v45 }
 0x155   : > { %5462 = vmatmul.msk.f32.vlgmr.msrb.gmra.mxu2 %vm929_vm6, %v839_v49  ;;  %5466 = vmatmul.msk.f32.vlgmr.msrb.gmra.mxu3 %vm929_vm6, %v839_v49  ;;  %v843_v50 = vsub.f32 1.0, %v842_v48  ;;  %v865_v62 = vand.u32 2147483647, %v825_v45  ;;  %v1027_v40 = vunpack.c.l.bf16 %v524_v33  ;;  %v1028_v41 = vunpack.c.h.bf16 %v524_v33 }
 0x156   : > { %5470 = vmatmul.msk.f32.vlgmr.msrb.gmra.mxu0 %vm929_vm6, %v839_v49  ;;  %v868_v0 = vor.u32 1.1754944e-38, %v867_v60  ;;  %v1031_v46 = vunpack.c.h.bf16 %v526_v38  ;;  %1536 = vmatpush.bf16.msrb.mxu2 %v7060_v23  ;;  %v7089_v23 = vld [vmem:[%s9138_s6 + $0x260] sm:$0xff]  ;;  %vm2607_vm7 = vcmask 64512   ;;  %vm2616_vm8 = vcmask 1040384  }
 0x157   : > { %v844_v52 = vmul.f32 %v7434_v44, %v843_v50  ;;  %vm866_vm15 = vcmp.eq.f32.partialorder %v865_v62, 8.507059e+37  ;;  %v1033_v62 = vunpack.c.l.bf16 %v7628_v32  ;;  %vm6081_vm9 = vmneg %vm2616_vm8 }
 0x159   : > { %v845_v54 = vadd.f32 %v7434_v44, %v844_v52  ;;  %v1035_v52 = vunpack.c.l.bf16 %v7595_v15  ;;  %v1034_v15 = vunpack.c.h.bf16 %v7628_v32 }
 0x15a   : > { %v7436_v55 = vpop.eup %7435 }
 0x15b   : > { %v849_v57 = vsel %vm848_vm10, %v7434_v44, %v845_v54  ;;  %v857_v58 = vmul.f32 %v7436_v55, %v825_v45  ;;  %vm862_vm13 = vweird.f32 %v7436_v55  ;;  %v1030_v45 = vunpack.c.l.bf16 %v526_v38  ;;  %v7034_v38 = vld [vmem:[%s9138_s6 + $0xa8] sm:$0xff] }
 0x15c   : > { %v854_v59 = vsel %vm851_vm11, %v853_v56, %v849_v57  ;;  %vm863_vm14 = vmor %vm861_vm12, %vm862_vm13  ;;  %vm7449_vm10 = vmmov 1   ;;  %vm2742_vm12 = vcmask 982016  }
 0x15d   : > { %5463 = vmatmul.msk.f32.gmra.mxu2 %vm929_vm6, %v854_v59  ;;  %5467 = vmatmul.msk.f32.gmra.mxu3 %vm929_vm6, %v854_v59  ;;  %v858_v61 = vsub.f32 1.0, %v857_v58  ;;  %vm8305_vm11 = vmpackc.low %vm7449_vm10, %vm6081_vm9 }
 0x15e   : > { %5471 = vmatmul.msk.f32.gmra.mxu0 %vm929_vm6, %v854_v59 }
 0x15f   : > { %v859_v63 = vmul.f32 %v7436_v55, %v858_v61 }
 0x161   : > { %v860_v1 = vadd.f32 %v7436_v55, %v859_v63 }
 0x163   : > { %v864_v2 = vsel %vm863_vm14, %v7436_v55, %v860_v1 }
 0x164   : > { %v869_v3 = vsel %vm866_vm15, %v868_v0, %v864_v2 }
 0x165   : > { %5464 = vmatmul.msk.f32.gmra.mxu2 %vm929_vm6, %v869_v3  ;;  %5468 = vmatmul.msk.f32.gmra.mxu3 %vm929_vm6, %v869_v3 }
 0x166   : > { %5472 = vmatmul.msk.f32.gmra.mxu0 %vm929_vm6, %v869_v3  ;;  %vm1252_vm6 = vcmask 916480  }
 0x1d3   : > { %v1018_v20 = vpop.f32.mrf.mxu0 }
 0x1d4   : > { %v1019_v29 = vadd.f32 %v5460_v25, %v1018_v20 }
 0x1d6   : > { %v1038_v39 = vmul.f32 %v1029_v30, %v1019_v29 }
 0x1d8   : > { %v966_v27 = vpop.f32.mrf.mxu2  ;;  %v992_v28 = vpop.f32.mrf.mxu3 }
 0x1d9   : > { %v967_v43 = vadd.f32 %v5458_v35, %v966_v27  ;;  %v993_v44 = vadd.f32 %v5459_v36, %v992_v28  ;;  %v7035_v27 = vld [vmem:[%s9138_s6 + $0xb0] sm:$0xff] }
 0x1da   : > { %1354 = vmatpush.bf16.msra.mxu3 %v7035_v27  ;;  %v7078_v27 = vld [vmem:[%s9138_s6 + $0x208] sm:$0xff] }
 0x1db   : > { %v1021_v34 = vpop.f32.mrf.mxu0  ;;  %v1036_v53 = vmul.f32 %v1027_v40, %v967_v43  ;;  %v1037_v54 = vmul.f32 %v1028_v41, %v993_v44  ;;  %v7042_v40 = vld [vmem:[%s9138_s6 + $0xe8] sm:$0xff]  ;;  %v7033_v43 = vld [vmem:[%s9138_s6 + $0xa0] sm:$0xff] }
 0x1dc   : > { %v1022_v37 = vadd.f32 %v5460_v25, %v1021_v34  ;;  %v7059_v34 = vld [vmem:[%s9138_s6 + $0x170] sm:$0xff]  ;;  %v7058_v41 = vld [vmem:[%s9138_s6 + $0x168] sm:$0xff]  ;;  %v7041_v44 = vld [vmem:[%s9138_s6 + $0xe0] sm:$0xff] }
 0x1dd   : > { %1537 = vmatpush.bf16.msrb.mxu2 %v7059_v34  ;;  %v7062_v34 = vld [vmem:[%s9138_s6 + $0x188] sm:$0xff] }
 0x1de   : > { %v1041_v42 = vmul.f32 %v1032_v31, %v1022_v37  ;;  %v7043_v31 = vld [vmem:[%s9138_s6 + $0xf0] sm:$0xff]  ;;  %v7050_v37 = vld [vmem:[%s9138_s6 + $0x128] sm:$0xff]  ;;  %1355 = vmatpush.bf16.msra.mxu3 %v7034_v38  ;;  %v7069_v38 = vld [vmem:[%s9138_s6 + $0x1c0] sm:$0xff] }
 0x1df   : > { %1368 = vmatpush.bf16.msra.mxu0 %v7043_v31  ;;  %1524 = vmatpush.bf16.msra.mxu1 %v7050_v37  ;;  %v7077_v31 = vld [vmem:[%s9138_s6 + $0x200] sm:$0xff] }
 0x1e0   : > { %v7747_v47 = vpack.c.bf16 %v1041_v42, %v1038_v39  ;;  %v969_v48 = vpop.f32.mrf.mxu2  ;;  %v995_v49 = vpop.f32.mrf.mxu3  ;;  %v7049_v42 = vld [vmem:[%s9138_s6 + $0x120] sm:$0xff] }
 0x1e1   : > { %v970_v50 = vadd.f32 %v5458_v35, %v969_v48  ;;  %v996_v51 = vadd.f32 %v5459_v36, %v995_v49  ;;  %1538 = vmatpush.bf16.msrb.mxu2 %v7058_v41  ;;  %v7032_v48 = vld [vmem:[%s9138_s6 + $0x98] sm:$0xff]  ;;  %v7061_v37 = vld [vmem:[%s9138_s6 + $0x180] sm:$0xff] }
 0x1e2   : > { %1250 = vrot.lane.b32.xlu2 %v7747_v47, %s7446_s0  ;;  %v1775_v32 = vshll.u32 %v7747_v47, 16  ;;  %1356 = vmatpush.bf16.msra.mxu3 %v7033_v43 }
 0x1e3   : > { %v1039_v55 = vmul.f32 %v1030_v45, %v970_v50  ;;  %v1040_v56 = vmul.f32 %v1031_v46, %v996_v51  ;;  %v1024_v57 = vpop.f32.mrf.mxu0  ;;  %1369 = vmatpush.bf16.msra.mxu0 %v7042_v40  ;;  %v7057_v45 = vld [vmem:[%s9138_s6 + $0x160] sm:$0xff]  ;;  %1525 = vmatpush.bf16.msra.mxu1 %v7049_v42  ;;  %v7048_v46 = vld [vmem:[%s9138_s6 + $0x118] sm:$0xff] }
 0x1e4   : > { %v1025_v58 = vadd.f32 %v5460_v25, %v1024_v57  ;;  %v1777_v16 = vrot.slane %v1775_v32, 1  ;;  %v1773_v25 = vshrl.u32 %v7747_v47, 16  ;;  %v7040_v50 = vld [vmem:[%s9138_s6 + $0xd8] sm:$0xff]  ;;  %v7046_v57 = vld [vmem:[%s9138_s6 + $0x108] sm:$0xff]  ;;  %v7053_v32 = vld [vmem:[%s9138_s6 + $0x140] sm:$0xff] }
 0x1e5   : > { %v7752_v59 = vpack.c.bf16 %v1039_v55, %v1036_v53  ;;  %v7754_v60 = vpack.c.bf16 %v1040_v56, %v1037_v54  ;;  %1539 = vmatpush.bf16.msrb.mxu2 %v7057_v45  ;;  %v7056_v51 = vld [vmem:[%s9138_s6 + $0x158] sm:$0xff]  ;;  %v7047_v53 = vld [vmem:[%s9138_s6 + $0x110] sm:$0xff]  ;;  %v7085_v40 = vld [vmem:[%s9138_s6 + $0x240] sm:$0xff] }
 0x1e6   : > { %v1044_v61 = vmul.f32 %v1035_v52, %v1025_v58  ;;  %v1778_v33 = vor.u32 %v1777_v16, %v1773_v25  ;;  %1357 = vmatpush.bf16.msra.mxu3 %v7032_v48  ;;  %v7066_v16 = vld [vmem:[%s9138_s6 + $0x1a8] sm:$0xff]  ;;  %v7072_v25 = vld [vmem:[%s9138_s6 + $0x1d8] sm:$0xff]  ;;  %v7115_v48 = vld [vmem:[%s9138_s6 + $0x330] sm:$0xff] }
 0x1e7   : > { %1417 = vrot.lane.b32.xlu1 %v7754_v60, %s7447_s30  ;;  %1202 = vmatmul.bf16.vlgmr.msra.gmra.mxu2 %v7754_v60  ;;  %v1590_v3 = vshll.u32 %v7752_v59, 16  ;;  %v1602_v10 = vshll.u32 %v7754_v60, 16  ;;  %v1588_v14 = vshrl.u32 %v7752_v59, 16  ;;  %v1600_v29 = vshrl.u32 %v7754_v60, 16  ;;  %v7116_v42 = vld [vmem:[%s9138_s6 + $0x338] sm:$0xff] }
 0x1e8   : > { %1246 = vrot.lane.b32.xlu0 %v7752_v59, %s7446_s0  ;;  %1188 = vmatmul.bf16.vlgmr.msrb.gmra.mxu1 %v7752_v59  ;;  %v972_v63 = vpop.f32.mrf.mxu2  ;;  %v998_v0 = vpop.f32.mrf.mxu3  ;;  %v7765_v4 = vpack.c.bf16 %v1044_v61, %v1044_v61  ;;  %v2126_v52 = vrot.slane %v7754_v60, 1  ;;  %v2123_v56 = vrot.slane %v7752_v59, 1 }
 0x1e9   : > { %v973_v1 = vadd.f32 %v5458_v35, %v972_v63  ;;  %v999_v2 = vadd.f32 %v5459_v36, %v998_v0  ;;  %v1592_v9 = vrot.slane %v1590_v3, 1  ;;  %v1604_v21 = vrot.slane %v1602_v10, 1  ;;  %1370 = vmatpush.bf16.msra.mxu0 %v7041_v44  ;;  %1526 = vmatpush.bf16.msra.mxu1 %v7048_v46  ;;  %v7045_v63 = vld [vmem:[%s9138_s6 + $0x100] sm:$0xff]  ;;  %v7084_v0 = vld [vmem:[%s9138_s6 + $0x238] sm:$0xff]  ;;  %v7054_v3 = vld [vmem:[%s9138_s6 + $0x148] sm:$0xff] }
 0x1ea   : > { %1415 = vrot.lane.b32.xlu2 %v7752_v59, %s7447_s30  ;;  %v1780_v11 = vshll.u32 %v7765_v4, 16  ;;  %1540 = vmatpush.bf16.msrb.mxu2 %v7056_v51  ;;  %v2290_v59 = vrot.slane %v7747_v47, 1  ;;  %v7092_v10 = vld [vmem:[%s9138_s6 + $0x278] sm:$0xff] }
 0x1eb   : > { %v1042_v5 = vmul.f32 %v1033_v62, %v973_v1  ;;  %v1043_v6 = vmul.f32 %v1034_v15, %v999_v2  ;;  %v1593_v19 = vor.u32 %v1592_v9, %v1588_v14  ;;  %v1605_v35 = vor.u32 %v1604_v21, %v1600_v29  ;;  %v7031_v62 = vld [vmem:[%s9138_s6 + $0x90] sm:$0xff]  ;;  %v7030_v1 = vld [vmem:[%s9138_s6 + $0x88] sm:$0xff]  ;;  %v7073_v21 = vld [vmem:[%s9138_s6 + $0x1e0] sm:$0xff] }
 0x1ec   : > { %v1782_v24 = vrot.slane %v1780_v11, 1  ;;  %v7039_v15 = vld [vmem:[%s9138_s6 + $0xd0] sm:$0xff]  ;;  %1358 = vmatpush.bf16.msra.mxu3 %v7031_v62  ;;  %v7038_v2 = vld [vmem:[%s9138_s6 + $0xc8] sm:$0xff]  ;;  %v7108_v51 = vld [vmem:[%s9138_s6 + $0x2f8] sm:$0xff] }
 0x1ed   : > { %v7770_v7 = vpack.c.bf16 %v1042_v5, %v1042_v5  ;;  %v7772_v8 = vpack.c.bf16 %v1043_v6, %v1043_v6  ;;  %1371 = vmatpush.bf16.msra.mxu0 %v7040_v50  ;;  %1527 = vmatpush.bf16.msra.mxu1 %v7047_v53  ;;  %v7029_v5 = vld [vmem:[%s9138_s6 + $0x80] sm:$0xff]  ;;  %v7082_v9 = vld [vmem:[%s9138_s6 + $0x228] sm:$0xff]  ;;  %v7067_v11 = vld [vmem:[%s9138_s6 + $0x1b0] sm:$0xff] }
 0x1ee   : > { %v1783_v36 = vsel %vm1586_vm3, %v1778_v33, %v1782_v24  ;;  %v7037_v6 = vld [vmem:[%s9138_s6 + $0xc0] sm:$0xff]  ;;  %v7091_v14 = vld [vmem:[%s9138_s6 + $0x270] sm:$0xff]  ;;  %v7064_v24 = vld [vmem:[%s9138_s6 + $0x198] sm:$0xff] }
 0x1ef   : > { %v1595_v12 = vshll.u32 %v7770_v7, 16  ;;  %v1607_v13 = vshll.u32 %v7772_v8, 16  ;;  %1419 = vrot.lane.b32.xlu1 %v7747_v47, %s7447_s30  ;;  %v2127_v49 = vrot.slane %v7772_v8, 1  ;;  %v2124_v55 = vrot.slane %v7770_v7, 1  ;;  %v7055_v47 = vld [vmem:[%s9138_s6 + $0x150] sm:$0xff]  ;;  %v7068_v7 = vld [vmem:[%s9138_s6 + $0x1b8] sm:$0xff] }
 0x1f0   : > { %1248 = vrot.lane.b32.xlu0 %v7754_v60, %s7446_s0  ;;  %v2291_v60 = vrot.slane %v7765_v4, 1  ;;  %1541 = vmatpush.bf16.msrb.mxu2 %v7055_v47  ;;  %v7083_v4 = vld [vmem:[%s9138_s6 + $0x230] sm:$0xff]  ;;  %v7076_v8 = vld [vmem:[%s9138_s6 + $0x1f8] sm:$0xff]  ;;  %v7113_v62 = vld [vmem:[%s9138_s6 + $0x320] sm:$0xff] }
 0x1f1   : > { %v1597_v20 = vrot.slane %v1595_v12, 1  ;;  %v1609_v30 = vrot.slane %v1607_v13, 1  ;;  %v7868_v54 = vsel %vm2122_vm4, %v2126_v52, %v2127_v49  ;;  %v7880_v58 = vsel %vm2122_vm4, %v2123_v56, %v2124_v55  ;;  %1528 = vmatpush.bf16.msra.mxu1 %v7046_v57  ;;  %1372 = vmatpush.bf16.msra.mxu0 %v7039_v15  ;;  %v7075_v12 = vld [vmem:[%s9138_s6 + $0x1f0] sm:$0xff]  ;;  %v7081_v13 = vld [vmem:[%s9138_s6 + $0x220] sm:$0xff]  ;;  %v7100_v50 = vld [vmem:[%s9138_s6 + $0x2b8] sm:$0xff] }
 0x1f2   : > { %v2292_v61 = vsel %vm2122_vm4, %v2290_v59, %v2291_v60  ;;  %1359 = vmatpush.bf16.msra.mxu3 %v7030_v1  ;;  %v7063_v29 = vld [vmem:[%s9138_s6 + $0x190] sm:$0xff]  ;;  %v7114_v55 = vld [vmem:[%s9138_s6 + $0x328] sm:$0xff]  ;;  %v7124_v56 = vld [vmem:[%s9138_s6 + $0x378] sm:$0xff] }
 0x1f3   : > { %v7803_v28 = vsel %vm1586_vm3, %v1593_v19, %v1597_v20  ;;  %v7823_v39 = vsel %vm1586_vm3, %v1605_v35, %v1609_v30  ;;  %v7080_v19 = vld [vmem:[%s9138_s6 + $0x218] sm:$0xff]  ;;  %v7065_v20 = vld [vmem:[%s9138_s6 + $0x1a0] sm:$0xff]  ;;  %v7071_v30 = vld [vmem:[%s9138_s6 + $0x1d0] sm:$0xff] }
 0x1f4   : > { %1784 = vrot.lane.b32.xlu2 %v7803_v28, %s7446_s0  ;;  %1542 = vmatpush.bf16.msrb.mxu2 %v7054_v3  ;;  %v7087_v33 = vld [vmem:[%s9138_s6 + $0x250] sm:$0xff]  ;;  %v7070_v35 = vld [vmem:[%s9138_s6 + $0x1c8] sm:$0xff] }
 0x1f5   : > { %1529 = vmatpush.bf16.msra.mxu1 %v7045_v63  ;;  %1373 = vmatpush.bf16.msra.mxu0 %v7038_v2  ;;  %v7099_v59 = vld [vmem:[%s9138_s6 + $0x2b0] sm:$0xff]  ;;  %v7098_v63 = vld [vmem:[%s9138_s6 + $0x2a8] sm:$0xff]  ;;  %v7112_v2 = vld [vmem:[%s9138_s6 + $0x318] sm:$0xff] }
 0x1f6   : > { %1360 = vmatpush.bf16.msra.mxu3 %v7029_v5  ;;  %v7123_v15 = vld [vmem:[%s9138_s6 + $0x370] sm:$0xff]  ;;  %v7106_v47 = vld [vmem:[%s9138_s6 + $0x2e8] sm:$0xff]  ;;  %v7097_v5 = vld [vmem:[%s9138_s6 + $0x2a0] sm:$0xff] }
 0x1f7   : > { %1788 = vrot.lane.b32.xlu1 %v1783_v36, %s7446_s0  ;;  %v7122_v3 = vld [vmem:[%s9138_s6 + $0x368] sm:$0xff] }
 0x1f8   : > { %1786 = vrot.lane.b32.xlu0 %v7823_v39, %s7446_s0  ;;  %1543 = vmatpush.bf16.msrb.mxu2 %v7053_v32  ;;  %v7111_v32 = vld [vmem:[%s9138_s6 + $0x310] sm:$0xff] }
 0x1f9   : > { %1890 = vmatpush.bf16.msrb.mxu1 %v7084_v0  ;;  %1374 = vmatpush.bf16.msra.mxu0 %v7037_v6  ;;  %v7105_v6 = vld [vmem:[%s9138_s6 + $0x2e0] sm:$0xff] }
 0x1fa   : > { %1709 = vmatpush.bf16.msrb.mxu3 %v7068_v7  ;;  %v7121_v7 = vld [vmem:[%s9138_s6 + $0x360] sm:$0xff] }
 0x1fc   : > { %1956 = vrot.lane.b32.xlu2 %v1783_v36, %s7447_s30  ;;  %1904 = vmatpush.bf16.msra.mxu2 %v7092_v10  ;;  %v7086_v36 = vld [vmem:[%s9138_s6 + $0x248] sm:$0xff]  ;;  %v7104_v10 = vld [vmem:[%s9138_s6 + $0x2d8] sm:$0xff] }
 0x1fd   : > { %1891 = vmatpush.bf16.msrb.mxu1 %v7083_v4  ;;  %1723 = vmatpush.bf16.msrb.mxu0 %v7076_v8 }
 0x1fe   : > { %1710 = vmatpush.bf16.msrb.mxu3 %v7067_v11 }
 0x1ff   : > { %1954 = vrot.lane.b32.xlu1 %v7823_v39, %s7447_s30 }
 0x200   : > { %1952 = vrot.lane.b32.xlu0 %v7803_v28, %s7447_s30  ;;  %1905 = vmatpush.bf16.msra.mxu2 %v7091_v14  ;;  %v7095_v14 = vld [vmem:[%s9138_s6 + $0x290] sm:$0xff] }
 0x201   : > { %1892 = vmatpush.bf16.msrb.mxu1 %v7082_v9  ;;  %1724 = vmatpush.bf16.msrb.mxu0 %v7075_v12  ;;  %v7096_v9 = vld [vmem:[%s9138_s6 + $0x298] sm:$0xff]  ;;  %v7110_v12 = vld [vmem:[%s9138_s6 + $0x308] sm:$0xff] }
 0x202   : > { %1711 = vmatpush.bf16.msrb.mxu3 %v7066_v16  ;;  %v7103_v16 = vld [vmem:[%s9138_s6 + $0x2d0] sm:$0xff] }
 0x204   : > { %2463 = vrot.lane.b32.xlu2 %v7868_v54, %s7447_s30  ;;  %1906 = vmatpush.bf16.msra.mxu2 %v7090_v18  ;;  %v7094_v18 = vld [vmem:[%s9138_s6 + $0x288] sm:$0xff] }
 0x205   : > { %1893 = vmatpush.bf16.msrb.mxu1 %v7081_v13  ;;  %1725 = vmatpush.bf16.msrb.mxu0 %v7074_v17  ;;  %v7120_v13 = vld [vmem:[%s9138_s6 + $0x358] sm:$0xff]  ;;  %v7109_v17 = vld [vmem:[%s9138_s6 + $0x300] sm:$0xff] }
 0x206   : > { %1712 = vmatpush.bf16.msrb.mxu3 %v7065_v20  ;;  %v7118_v20 = vld [vmem:[%s9138_s6 + $0x348] sm:$0xff] }
 0x207   : > { %2295 = vrot.lane.b32.xlu1 %v7868_v54, %s7446_s0 }
 0x208   : > { %2293 = vrot.lane.b32.xlu0 %v7880_v58, %s7446_s0  ;;  %1907 = vmatpush.bf16.msra.mxu2 %v7089_v23  ;;  %v7101_v23 = vld [vmem:[%s9138_s6 + $0x2c0] sm:$0xff] }
 0x209   : > { %1894 = vmatpush.bf16.msrb.mxu1 %v7080_v19  ;;  %1726 = vmatpush.bf16.msrb.mxu0 %v7073_v21  ;;  %v7102_v19 = vld [vmem:[%s9138_s6 + $0x2c8] sm:$0xff]  ;;  %v7147_v21 = vld [vmem:[%s9138_s6 + $0x430] sm:$0xff] }
 0x20a   : > { %1713 = vmatpush.bf16.msrb.mxu3 %v7064_v24  ;;  %v7117_v24 = vld [vmem:[%s9138_s6 + $0x340] sm:$0xff] }
 0x20c   : > { %2461 = vrot.lane.b32.xlu2 %v7880_v58, %s7447_s30  ;;  %1908 = vmatpush.bf16.msra.mxu2 %v7088_v26  ;;  %v7140_v26 = vld [vmem:[%s9138_s6 + $0x3f8] sm:$0xff] }
 0x20d   : > { %1895 = vmatpush.bf16.msrb.mxu1 %v7079_v22  ;;  %1727 = vmatpush.bf16.msrb.mxu0 %v7072_v25  ;;  %v7093_v22 = vld [vmem:[%s9138_s6 + $0x280] sm:$0xff]  ;;  %v7132_v25 = vld [vmem:[%s9138_s6 + $0x3b8] sm:$0xff] }
 0x20e   : > { %1714 = vmatpush.bf16.msrb.mxu3 %v7063_v29 }
 0x20f   : > { %2297 = vrot.lane.b32.xlu1 %v2292_v61, %s7446_s0 }
 0x210   : > { %2465 = vrot.lane.b32.xlu0 %v2292_v61, %s7447_s30  ;;  %1909 = vmatpush.bf16.msra.mxu2 %v7087_v33  ;;  %v7107_v61 = vld [vmem:[%s9138_s6 + $0x2f0] sm:$0xff]  ;;  %s9155_s30 = smov 120  }
 0x211   : > { %1896 = vmatpush.bf16.msrb.mxu1 %v7078_v27  ;;  %1728 = vmatpush.bf16.msrb.mxu0 %v7071_v30  ;;  %v7146_v27 = vld [vmem:[%s9138_s6 + $0x428] sm:$0xff]  ;;  %v7156_v30 = vld [vmem:[%s9138_s6 + $0x478] sm:$0xff]  ;;  %v7131_v33 = vld [vmem:[%s9138_s6 + $0x3b0] sm:$0xff] }
 0x212   : > { %1715 = vmatpush.bf16.msrb.mxu3 %v7062_v34 }
 0x214   : > { %1910 = vmatpush.bf16.msra.mxu2 %v7086_v36  ;;  %v7145_v36 = vld [vmem:[%s9138_s6 + $0x420] sm:$0xff] }
 0x215   : > { %1897 = vmatpush.bf16.msrb.mxu1 %v7077_v31  ;;  %1729 = vmatpush.bf16.msrb.mxu0 %v7070_v35  ;;  %v7139_v35 = vld [vmem:[%s9138_s6 + $0x3f0] sm:$0xff] }
 0x216   : > { %1716 = vmatpush.bf16.msrb.mxu3 %v7061_v37 }
 0x218   : > { %1911 = vmatpush.bf16.msra.mxu2 %v7085_v40  ;;  %v7130_v40 = vld [vmem:[%s9138_s6 + $0x3a8] sm:$0xff] }
 0x219   : > { %1730 = vmatpush.bf16.msrb.mxu0 %v7069_v38  ;;  %v7155_v38 = vld [vmem:[%s9138_s6 + $0x470] sm:$0xff] }
 0x23c   : > { %v1251_v41 = vpop.permute.xlu2 %1250 }
 0x244   : > { %v1416_v43 = vpop.permute.xlu2 %1415 }
 0x24e   : > { %v1785_v0 = vpop.permute.xlu2 %1784 }
 0x256   : > { %v1957_v31 = vpop.permute.xlu2 %1956 }
 0x259   : > { %v1418_v44 = vpop.permute.xlu1 %1417 }
 0x25a   : > { %v1422_v45 = vsel %vm1421_vm5, %v1416_v43, %v1418_v44  ;;  %v1247_v46 = vpop.permute.xlu0 %1246  ;;  %v7129_v43 = vld [vmem:[%s9138_s6 + $0x3a0] sm:$0xff] }
 0x25b   : > { %1530 = vmatmul.bf16.vlgmr.msra.gmra.mxu1 %v1422_v45  ;;  %v7143_v45 = vld [vmem:[%s9138_s6 + $0x410] sm:$0xff] }
 0x25c   : > { %2227 = vmatpush.bf16.msra.mxu1 %v7116_v42  ;;  %v7144_v42 = vld [vmem:[%s9138_s6 + $0x418] sm:$0xff] }
 0x260   : > { %2228 = vmatpush.bf16.msra.mxu1 %v7115_v48  ;;  %v7153_v48 = vld [vmem:[%s9138_s6 + $0x460] sm:$0xff] }
 0x261   : > { %v1420_v49 = vpop.permute.xlu1 %1419 }
 0x262   : > { %v1423_v52 = vsel %vm1421_vm5, %v1418_v44, %v1420_v49  ;;  %v1249_v53 = vpop.permute.xlu0 %1248  ;;  %v7137_v44 = vld [vmem:[%s9138_s6 + $0x3e0] sm:$0xff]  ;;  %v7128_v49 = vld [vmem:[%s9138_s6 + $0x398] sm:$0xff] }
 0x263   : > { %v1253_v57 = vsel %vm1252_vm6, %v1247_v46, %v1249_v53  ;;  %v1254_v60 = vsel %vm1252_vm6, %v1249_v53, %v1251_v41  ;;  %1544 = vmatmul.bf16.vlgmr.msrb.gmra.mxu2 %v1423_v52  ;;  %v7138_v41 = vld [vmem:[%s9138_s6 + $0x3e8] sm:$0xff]  ;;  %v2464_v46 = vpop.permute.xlu2 %2463  ;;  %v7152_v52 = vld [vmem:[%s9138_s6 + $0x458] sm:$0xff]  ;;  %v7127_v53 = vld [vmem:[%s9138_s6 + $0x390] sm:$0xff] }
 0x264   : > { %1361 = vmatmul.bf16.vlgmr.msra.gmra.mxu3 %v1253_v57  ;;  %1375 = vmatmul.bf16.vlgmr.msra.gmra.mxu0 %v1254_v60  ;;  %v7151_v60 = vld [vmem:[%s9138_s6 + $0x450] sm:$0xff] }
 0x265   : > { %2058 = vmatpush.bf16.msra.mxu3 %v7100_v50  ;;  %2072 = vmatpush.bf16.msra.mxu0 %v7108_v51  ;;  %v7136_v50 = vld [vmem:[%s9138_s6 + $0x3d8] sm:$0xff]  ;;  %v7142_v51 = vld [vmem:[%s9138_s6 + $0x408] sm:$0xff] }
 0x266   : > { %2229 = vmatpush.bf16.msra.mxu1 %v7114_v55  ;;  %2241 = vmatpush.bf16.msrb.mxu2 %v7124_v56  ;;  %v7135_v55 = vld [vmem:[%s9138_s6 + $0x3d0] sm:$0xff]  ;;  %v7141_v56 = vld [vmem:[%s9138_s6 + $0x400] sm:$0xff] }
 0x269   : > { %2059 = vmatpush.bf16.msra.mxu3 %v7099_v59  ;;  %2073 = vmatpush.bf16.msra.mxu0 %v7107_v61  ;;  %v1789_v8 = vpop.permute.xlu1 %1788 }
 0x26a   : > { %2230 = vmatpush.bf16.msra.mxu1 %v7113_v62  ;;  %2242 = vmatpush.bf16.msrb.mxu2 %v7123_v15  ;;  %v1787_v1 = vpop.permute.xlu0 %1786  ;;  %v7126_v62 = vld [vmem:[%s9138_s6 + $0x388] sm:$0xff] }
 0x26b   : > { %v8064_v4 = vsel %vm1252_vm6, %v1785_v0, %v1787_v1  ;;  %v8086_v11 = vsel %vm1252_vm6, %v1787_v1, %v1789_v8  ;;  %v2462_v61 = vpop.permute.xlu2 %2461  ;;  %v7134_v15 = vld [vmem:[%s9138_s6 + $0x3c8] sm:$0xff]  ;;  %v7125_v0 = vld [vmem:[%s9138_s6 + $0x380] sm:$0xff]  ;;  %v1189_v8 = vpop.f32.mrf.mxu1 }
 0x26c   : > { %1898 = vmatmul.bf16.vlgmr.msrb.gmra.mxu1 %v8064_v4  ;;  %v7133_v1 = vld [vmem:[%s9138_s6 + $0x3c0] sm:$0xff] }
 0x26d   : > { %2060 = vmatpush.bf16.msra.mxu3 %v7098_v63  ;;  %2074 = vmatpush.bf16.msra.mxu0 %v7106_v47  ;;  %v7150_v63 = vld [vmem:[%s9138_s6 + $0x448] sm:$0xff]  ;;  %v2467_v47 = vsel %vm1421_vm5, %v2462_v61, %v2464_v46 }
 0x26e   : > { %2231 = vmatpush.bf16.msra.mxu1 %v7112_v2  ;;  %2243 = vmatpush.bf16.msrb.mxu2 %v7122_v3  ;;  %v7149_v2 = vld [vmem:[%s9138_s6 + $0x440] sm:$0xff] }
 0x271   : > { %2061 = vmatpush.bf16.msra.mxu3 %v7097_v5  ;;  %2075 = vmatpush.bf16.msra.mxu0 %v7105_v6  ;;  %v1955_v29 = vpop.permute.xlu1 %1954 }
 0x272   : > { %2232 = vmatpush.bf16.msra.mxu1 %v7111_v32  ;;  %2244 = vmatpush.bf16.msrb.mxu2 %v7121_v7  ;;  %v1959_v37 = vsel %vm1421_vm5, %v1955_v29, %v1957_v31  ;;  %v7420_v31 = vld [vmem:[%s9139_s7] ss:$0 sm:$0xff] }
 0x273   : > { %1912 = vmatmul.bf16.vlgmr.msra.gmra.mxu2 %v8086_v11 }
 0x274   : > { %1717 = vmatmul.bf16.vlgmr.msrb.gmra.mxu3 %v7803_v28  ;;  %1731 = vmatmul.bf16.vlgmr.msrb.gmra.mxu0 %v7823_v39  ;;  %v7119_v28 = vld [vmem:[%s9138_s6 + $0x350] sm:$0xff]  ;;  %v7148_v39 = vld [vmem:[%s9138_s6 + $0x438] sm:$0xff] }
 0x275   : > { %2062 = vmatpush.bf16.msra.mxu3 %v7096_v9  ;;  %2076 = vmatpush.bf16.msra.mxu0 %v7104_v10  ;;  %v1203_v9 = vpop.f32.mrf.mxu2  ;;  %v1191_v10 = vpop.f32.mrf.mxu1 }
 0x276   : > { %2233 = vmatpush.bf16.msra.mxu1 %v7110_v12  ;;  %2245 = vmatpush.bf16.msrb.mxu2 %v7120_v13 }
 0x279   : > { %2063 = vmatpush.bf16.msra.mxu3 %v7095_v14  ;;  %2077 = vmatpush.bf16.msra.mxu0 %v7103_v16  ;;  %v2296_v57 = vpop.permute.xlu1 %2295 }
 0x27a   : > { %2234 = vmatpush.bf16.msra.mxu1 %v7109_v17  ;;  %2246 = vmatpush.bf16.msrb.mxu2 %v7119_v28 }
 0x27d   : > { %2064 = vmatpush.bf16.msra.mxu3 %v7094_v18  ;;  %2078 = vmatpush.bf16.msra.mxu0 %v7102_v19  ;;  %v1205_v12 = vpop.f32.mrf.mxu2 }
 0x27e   : > { %2567 = vmatpush.bf16.msrb.mxu1 %v7148_v39  ;;  %2247 = vmatpush.bf16.msrb.mxu2 %v7118_v20 }
 0x27f   : > { %2235 = vmatmul.bf16.vlgmr.msra.gmra.mxu1 %v7880_v58  ;;  %v1953_v58 = vpop.permute.xlu0 %1952 }
 0x280   : > { %v1958_v34 = vsel %vm1421_vm5, %v1953_v58, %v1955_v29 }
 0x281   : > { %2065 = vmatpush.bf16.msra.mxu3 %v7093_v22  ;;  %2079 = vmatpush.bf16.msra.mxu0 %v7101_v23  ;;  %v2298_v3 = vpop.permute.xlu1 %2297 }
 0x282   : > { %2568 = vmatpush.bf16.msrb.mxu1 %v7147_v21  ;;  %2248 = vmatpush.bf16.msrb.mxu2 %v7117_v24  ;;  %v2300_v32 = vsel %vm1252_vm6, %v2296_v57, %v2298_v3 }
 0x284   : > { %2066 = vmatmul.bf16.vlgmr.msra.gmra.mxu3 %v1958_v34  ;;  %2080 = vmatmul.bf16.vlgmr.msra.gmra.mxu0 %v1959_v37  ;;  %v1206_v37 = vadd.f32 %v1205_v12, %v1191_v10 }
 0x285   : > { %2399 = vmatpush.bf16.msrb.mxu3 %v7132_v25  ;;  %2413 = vmatpush.bf16.msrb.mxu0 %v7140_v26 }
 0x286   : > { %2569 = vmatpush.bf16.msrb.mxu1 %v7146_v27  ;;  %2581 = vmatpush.bf16.msra.mxu2 %v7156_v30 }
 0x287   : > { %2249 = vmatmul.bf16.vlgmr.msrb.gmra.mxu2 %v7868_v54  ;;  %v7154_v54 = vld [vmem:[%s9138_s6 + $0x468] sm:$0xff]  ;;  %v2294_v59 = vpop.permute.xlu0 %2293 }
 0x288   : > { %v2299_v6 = vsel %vm1252_vm6, %v2294_v59, %v2296_v57 }
 0x289   : > { %2400 = vmatpush.bf16.msrb.mxu3 %v7131_v33  ;;  %2414 = vmatpush.bf16.msrb.mxu0 %v7139_v35  ;;  %v1204_v33 = vadd.f32 %v1203_v9, %v1189_v8  ;;  %v7160_v8 = vld [vmem:[%s9140_s8 + $0x18] sm:$0xff] }
 0x28a   : > { %2570 = vmatpush.bf16.msrb.mxu1 %v7145_v36  ;;  %2582 = vmatpush.bf16.msra.mxu2 %v7155_v38  ;;  %v7164_v38 = vld [vmem:[%s9140_s8 + $0x38] sm:$0xff] }
 0x28b   : > { %v1208_v36 = vadd.f32 %v7420_v31, %v1204_v33  ;;  %v7184_v33 = vld [vmem:[%s9140_s8 + $0xd8] sm:$0xff] }
 0x28d   : > { %2401 = vmatpush.bf16.msrb.mxu3 %v7130_v40  ;;  %2415 = vmatpush.bf16.msrb.mxu0 %v7138_v41  ;;  %v7188_v40 = vld [vmem:[%s9140_s8 + $0xf8] sm:$0xff] }
 0x28e   : > { %2571 = vmatpush.bf16.msrb.mxu1 %v7144_v42  ;;  %2583 = vmatpush.bf16.msra.mxu2 %v7154_v54  ;;  %v7163_v54 = vld [vmem:[%s9140_s8 + $0x30] sm:$0xff] }
 0x28f   : > { %v2466_v5 = vpop.permute.xlu0 %2465 }
 0x290   : > { %v2468_v7 = vsel %vm1421_vm5, %v2464_v46, %v2466_v5 }
 0x291   : > { %2402 = vmatpush.bf16.msrb.mxu3 %v7129_v43  ;;  %2416 = vmatpush.bf16.msrb.mxu0 %v7137_v44  ;;  %v7187_v43 = vld [vmem:[%s9140_s8 + $0xf0] sm:$0xff] }
 0x292   : > { %2572 = vmatpush.bf16.msrb.mxu1 %v7143_v45  ;;  %2584 = vmatpush.bf16.msra.mxu2 %v7153_v48  ;;  %v1209_v45 = vadd.f32 %v7420_v31, %v1206_v37  ;;  %v7182_v37 = vld [vmem:[%s9140_s8 + $0xc8] sm:$0xff] }
 0x295   : > { %2403 = vmatpush.bf16.msrb.mxu3 %v7128_v49  ;;  %2417 = vmatpush.bf16.msrb.mxu0 %v7136_v50 }
 0x296   : > { %2573 = vmatpush.bf16.msrb.mxu1 %v7142_v51  ;;  %2585 = vmatpush.bf16.msra.mxu2 %v7152_v52 }
 0x299   : > { %2404 = vmatpush.bf16.msrb.mxu3 %v7127_v53  ;;  %2418 = vmatpush.bf16.msrb.mxu0 %v7135_v55  ;;  %v7162_v53 = vld [vmem:[%s9140_s8 + $0x28] sm:$0xff] }
 0x29a   : > { %2574 = vmatpush.bf16.msrb.mxu1 %v7141_v56  ;;  %2586 = vmatpush.bf16.msra.mxu2 %v7151_v60  ;;  %v7186_v55 = vld [vmem:[%s9140_s8 + $0xe8] sm:$0xff] }
 0x29d   : > { %2575 = vmatmul.bf16.vlgmr.msrb.gmra.mxu1 %v2467_v47  ;;  %2405 = vmatpush.bf16.msrb.mxu3 %v7126_v62  ;;  %v7185_v47 = vld [vmem:[%s9140_s8 + $0xe0] sm:$0xff] }
 0x29e   : > { %2419 = vmatpush.bf16.msrb.mxu0 %v7134_v15  ;;  %2587 = vmatpush.bf16.msra.mxu2 %v7150_v63  ;;  %v7161_v63 = vld [vmem:[%s9140_s8 + $0x20] sm:$0xff] }
 0x2a1   : > { %2406 = vmatpush.bf16.msrb.mxu3 %v7125_v0 }
 0x2a2   : > { %2420 = vmatpush.bf16.msrb.mxu0 %v7133_v1  ;;  %2588 = vmatpush.bf16.msra.mxu2 %v7149_v2 }
 0x2a4   : > { %2407 = vmatmul.bf16.vlgmr.msrb.gmra.mxu3 %v2299_v6 }
 0x2a5   : > { %2421 = vmatmul.bf16.vlgmr.msrb.gmra.mxu0 %v2300_v32  ;;  %2589 = vmatmul.bf16.vlgmr.msra.gmra.mxu2 %v2468_v7 }
 0x2a6   : > { %2703 = vmatpush.bf16.msra.mxu3 %v7164_v38  ;;  %2973 = vmatpush.bf16.msrb.mxu2 %v7188_v40  ;;  %v7181_v38 = vld [vmem:[%s9140_s8 + $0xc0] sm:$0xff] }
 0x2aa   : > { %2704 = vmatpush.bf16.msra.mxu3 %v7163_v54  ;;  %2974 = vmatpush.bf16.msrb.mxu2 %v7187_v43 }
 0x2ae   : > { %2705 = vmatpush.bf16.msra.mxu3 %v7162_v53  ;;  %2975 = vmatpush.bf16.msrb.mxu2 %v7186_v55  ;;  %v7171_v53 = vld [vmem:[%s9140_s8 + $0x70] sm:$0xff] }
 0x2b2   : > { %2706 = vmatpush.bf16.msra.mxu3 %v7161_v63  ;;  %2976 = vmatpush.bf16.msrb.mxu2 %v7185_v47  ;;  %v7196_v47 = vld [vmem:[%s9140_s8 + $0x138] sm:$0xff] }
 0x2b3   : > { %v7340_v63 = vld [vmem:[%s9146_s14 + $0xb8] sm:$0xff] }
 0x2b6   : > { %2707 = vmatpush.bf16.msra.mxu3 %v7160_v8  ;;  %2977 = vmatpush.bf16.msrb.mxu2 %v7184_v33  ;;  %v7165_v33 = vld [vmem:[%s9140_s8 + $0x40] sm:$0xff] }
 0x2d8   : > { %v1531_v14 = vpop.f32.mrf.mxu1 }
 0x2e0   : > { %v1533_v39 = vpop.f32.mrf.mxu1 }
 0x2e1   : > { %v1376_v13 = vpop.f32.mrf.mxu0 }
 0x2e6   : > { %v1545_v17 = vpop.f32.mrf.mxu2 }
 0x2e7   : > { %v1362_v16 = vpop.f32.mrf.mxu3  ;;  %v1546_v46 = vadd.f32 %v1545_v17, %v1531_v14  ;;  %v7159_v17 = vld [vmem:[%s9140_s8 + $0x10] sm:$0xff] }
 0x2e8   : > { %v1377_v35 = vadd.f32 %v1376_v13, %v1362_v16  ;;  %2708 = vmatpush.bf16.msra.mxu3 %v7159_v17  ;;  %v7169_v17 = vld [vmem:[%s9140_s8 + $0x60] sm:$0xff] }
 0x2e9   : > { %v1378_v28 = vpop.f32.mrf.mxu0  ;;  %v1899_v21 = vpop.f32.mrf.mxu1 }
 0x2ea   : > { %v1381_v41 = vadd.f32 %v1377_v35, %v1208_v36  ;;  %v7183_v35 = vld [vmem:[%s9140_s8 + $0xd0] sm:$0xff]  ;;  %v7157_v36 = vld [vmem:[%s9140_s8] sm:$0xff] }
 0x2eb   : > { %2978 = vmatpush.bf16.msrb.mxu2 %v7183_v35 }
 0x2ec   : > { %v1550_v51 = vadd.f32 %v1546_v46, %v1381_v41  ;;  %v7172_v46 = vld [vmem:[%s9140_s8 + $0x78] sm:$0xff] }
 0x2ed   : > { %2793 = vmatpush.bf16.msra.mxu0 %v7172_v46  ;;  %v7201_v46 = vld [vmem:[%s9140_s8 + $0x160] sm:$0xff] }
 0x2ee   : > { %v1547_v19 = vpop.f32.mrf.mxu2 }
 0x2ef   : > { %v1364_v18 = vpop.f32.mrf.mxu3  ;;  %v1548_v57 = vadd.f32 %v1547_v19, %v1533_v39  ;;  %2979 = vmatpush.bf16.msrb.mxu2 %v7182_v37 }
 0x2f0   : > { %v1379_v42 = vadd.f32 %v1378_v28, %v1364_v18 }
 0x2f1   : > { %v1732_v20 = vpop.f32.mrf.mxu0  ;;  %v1901_v25 = vpop.f32.mrf.mxu1  ;;  %2794 = vmatpush.bf16.msra.mxu0 %v7171_v53  ;;  %v7199_v53 = vld [vmem:[%s9140_s8 + $0x150] sm:$0xff] }
 0x2f2   : > { %v1382_v52 = vadd.f32 %v1379_v42, %v1209_v45 }
 0x2f3   : > { %2980 = vmatpush.bf16.msrb.mxu2 %v7181_v38  ;;  %v7174_v38 = vld [vmem:[%s9140_s8 + $0x88] sm:$0xff] }
 0x2f4   : > { %v1551_v61 = vadd.f32 %v1548_v57, %v1382_v52  ;;  %v7180_v52 = vld [vmem:[%s9140_s8 + $0xb8] sm:$0xff] }
 0x2f5   : > { %2879 = vmatpush.bf16.msra.mxu1 %v7180_v52  ;;  %v7189_v52 = vld [vmem:[%s9140_s8 + $0x100] sm:$0xff] }
 0x2f6   : > { %v1913_v23 = vpop.f32.mrf.mxu2 }
 0x2f7   : > { %v1718_v22 = vpop.f32.mrf.mxu3  ;;  %v1914_v62 = vadd.f32 %v1913_v23, %v1899_v21 }
 0x2f8   : > { %v1733_v48 = vadd.f32 %v1732_v20, %v1718_v22 }
 0x2f9   : > { %v1734_v24 = vpop.f32.mrf.mxu0 }
 0x2fa   : > { %v1737_v60 = vadd.f32 %v1733_v48, %v1550_v51 }
 0x2fc   : > { %v2236_v58 = vpop.f32.mrf.mxu1  ;;  %v1918_v1 = vadd.f32 %v1914_v62, %v1737_v60 }
 0x2fe   : > { %v1915_v27 = vpop.f32.mrf.mxu2 }
 0x2ff   : > { %v1720_v26 = vpop.f32.mrf.mxu3  ;;  %v1916_v6 = vadd.f32 %v1915_v27, %v1901_v25 }
 0x300   : > { %v1735_v59 = vadd.f32 %v1734_v24, %v1720_v26 }
 0x301   : > { %v2081_v29 = vpop.f32.mrf.mxu0 }
 0x302   : > { %v1738_v2 = vadd.f32 %v1735_v59, %v1551_v61 }
 0x304   : > { %v2238_v49 = vpop.f32.mrf.mxu1  ;;  %v1919_v10 = vadd.f32 %v1916_v6, %v1738_v2  ;;  %v7195_v6 = vld [vmem:[%s9140_s8 + $0x130] sm:$0xff] }
 0x307   : > { %v2067_v30 = vpop.f32.mrf.mxu3 }
 0x308   : > { %v2082_v15 = vadd.f32 %v2081_v29, %v2067_v30 }
 0x309   : > { %v2083_v44 = vpop.f32.mrf.mxu0 }
 0x30a   : > { %v2250_v34 = vpop.f32.mrf.mxu2  ;;  %v2086_v32 = vadd.f32 %v2082_v15, %v1918_v1 }
 0x30b   : > { %v2251_v12 = vadd.f32 %v2250_v34, %v2236_v58  ;;  %v7158_v34 = vld [vmem:[%s9140_s8 + $0x8] sm:$0xff] }
 0x30c   : > { %2709 = vmatpush.bf16.msra.mxu3 %v7158_v34 }
 0x30d   : > { %v2255_v14 = vadd.f32 %v2251_v12, %v2086_v32 }
 0x30f   : > { %v2069_v50 = vpop.f32.mrf.mxu3 }
 0x310   : > { %v2084_v7 = vadd.f32 %v2083_v44, %v2069_v50  ;;  %2710 = vmatpush.bf16.msra.mxu3 %v7157_v36  ;;  %v7204_v36 = vld [vmem:[%s9140_s8 + $0x178] sm:$0xff] }
 0x312   : > { %v2252_v56 = vpop.f32.mrf.mxu2  ;;  %v2087_v16 = vadd.f32 %v2084_v7, %v1919_v10 }
 0x313   : > { %v2253_v28 = vadd.f32 %v2252_v56, %v2238_v49 }
 0x314   : > { %3072 = vmatpush.bf16.msrb.mxu3 %v7196_v47  ;;  %v7207_v47 = vld [vmem:[%s9140_s8 + $0x190] sm:$0xff] }
 0x315   : > { %v2256_v20 = vadd.f32 %v2253_v28, %v2087_v16  ;;  %v7178_v16 = vld [vmem:[%s9140_s8 + $0xa8] sm:$0xff] }
 0x318   : > { %3073 = vmatpush.bf16.msrb.mxu3 %v7195_v6  ;;  %v7205_v6 = vld [vmem:[%s9140_s8 + $0x180] sm:$0xff] }
 0x31a   : > { %v2576_v3 = vpop.f32.mrf.mxu1 }
 0x322   : > { %v2422_v0 = vpop.f32.mrf.mxu0  ;;  %v2578_v23 = vpop.f32.mrf.mxu1 }
 0x327   : > { %v2408_v5 = vpop.f32.mrf.mxu3 }
 0x328   : > { %v2590_v9 = vpop.f32.mrf.mxu2  ;;  %v2423_v13 = vadd.f32 %v2422_v0, %v2408_v5  ;;  %v7170_v5 = vld [vmem:[%s9140_s8 + $0x68] sm:$0xff] }
 0x329   : > { %v2591_v21 = vadd.f32 %v2590_v9, %v2576_v3  ;;  %v7179_v3 = vld [vmem:[%s9140_s8 + $0xb0] sm:$0xff]  ;;  %2795 = vmatpush.bf16.msra.mxu0 %v7170_v5  ;;  %v7225_v5 = vld [vmem:[%s9140_s8 + $0x220] sm:$0xff] }
 0x32a   : > { %v2427_v39 = vadd.f32 %v2423_v13, %v2255_v14  ;;  %v2424_v18 = vpop.f32.mrf.mxu0  ;;  %2880 = vmatpush.bf16.msra.mxu1 %v7179_v3  ;;  %v7217_v3 = vld [vmem:[%s9140_s8 + $0x1e0] sm:$0xff] }
 0x32c   : > { %v2595_v25 = vadd.f32 %v2591_v21, %v2427_v39 }
 0x32d   : > { %2796 = vmatpush.bf16.msra.mxu0 %v7169_v17  ;;  %v7236_v17 = vld [vmem:[%s9142_s10 + $0x38] sm:$0xff] }
 0x32e   : > { %v2597_v58 = vmax.f32 %v2595_v25, 0.0  ;;  %2881 = vmatpush.bf16.msra.mxu1 %v7178_v16  ;;  %v7176_v25 = vld [vmem:[%s9140_s8 + $0x98] sm:$0xff] }
 0x32f   : > { %v2410_v19 = vpop.f32.mrf.mxu3 }
 0x330   : > { %v2425_v22 = vadd.f32 %v2424_v18, %v2410_v19  ;;  %v2592_v24 = vpop.f32.mrf.mxu2 }
 0x331   : > { %v2593_v27 = vadd.f32 %v2592_v24, %v2578_v23  ;;  %v7177_v23 = vld [vmem:[%s9140_s8 + $0xa0] sm:$0xff]  ;;  %v7168_v24 = vld [vmem:[%s9140_s8 + $0x58] sm:$0xff] }
 0x332   : > { %v2428_v26 = vadd.f32 %v2425_v22, %v2256_v20  ;;  %v7194_v20 = vld [vmem:[%s9140_s8 + $0x128] sm:$0xff]  ;;  %2882 = vmatpush.bf16.msra.mxu1 %v7177_v23  ;;  %2797 = vmatpush.bf16.msra.mxu0 %v7168_v24 }
 0x333   : > { %3074 = vmatpush.bf16.msrb.mxu3 %v7194_v20  ;;  %v7235_v20 = vld [vmem:[%s9142_s10 + $0x30] sm:$0xff] }
 0x334   : > { %v2596_v29 = vadd.f32 %v2593_v27, %v2428_v26  ;;  %v7167_v26 = vld [vmem:[%s9140_s8 + $0x50] sm:$0xff] }
 0x336   : > { %v2598_v30 = vmax.f32 %v2596_v29, 0.0  ;;  %2883 = vmatpush.bf16.msra.mxu1 %v7176_v25  ;;  %2798 = vmatpush.bf16.msra.mxu0 %v7167_v26 }
 0x338   : > { %v7409_v31 = vpack.i.bf16 %v2598_v30, %v2597_v58  ;;  %v7175_v58 = vld [vmem:[%s9140_s8 + $0x90] sm:$0xff]  ;;  %v7166_v30 = vld [vmem:[%s9140_s8 + $0x48] sm:$0xff] }
 0x33a   : > { %7410 = vrot.lane.b32.xlu0 %v7409_v31, %s7448_s17  ;;  %2884 = vmatpush.bf16.msra.mxu1 %v7175_v58 }
 0x33b   : > { %2799 = vmatpush.bf16.msra.mxu0 %v7166_v30  ;;  %v7232_v30 = vld [vmem:[%s9142_s10 + $0x18] sm:$0xff] }
 0x33e   : > { %2885 = vmatpush.bf16.msra.mxu1 %v7174_v38  ;;  %v7241_v38 = vld [vmem:[%s9142_s10 + $0x60] sm:$0xff] }
 0x33f   : > { %2800 = vmatpush.bf16.msra.mxu0 %v7165_v33  ;;  %v7242_v33 = vld [vmem:[%s9142_s10 + $0x68] sm:$0xff] }
 0x343   : > { %3158 = vmatpush.bf16.msrb.mxu0 %v7204_v36 }
 0x3ac   : > { %v7411_v40 = vpop.permute.xlu0 %7410 }
 0x3ad   : > { %v7413_v41 = vunpack.i.h.bf16 %v7411_v40  ;;  %v7412_v42 = vunpack.i.l.bf16 %v7411_v40  ;;  %v7193_v40 = vld [vmem:[%s9140_s8 + $0x120] sm:$0xff] }
 0x3ae   : > { %3075 = vmatpush.bf16.msrb.mxu3 %v7193_v40 }
 0x3af   : > { %v2609_v54 = vsel %vm2607_vm7, 0.0, %v7413_v41  ;;  %v2611_v43 = vsel %vm2607_vm7, %v7413_v41, 0.0  ;;  %v2608_v44 = vsel %vm2607_vm7, 0.0, %v7412_v42  ;;  %v2610_v45 = vsel %vm2607_vm7, %v7412_v42, 0.0  ;;  %v7203_v41 = vld [vmem:[%s9140_s8 + $0x170] sm:$0xff]  ;;  %v7173_v42 = vld [vmem:[%s9140_s8 + $0x80] sm:$0xff] }
 0x3b0   : > { %v2619_v48 = vrot.slane %v2609_v54, 7  ;;  %v2621_v49 = vrot.slane %v2611_v43, 7  ;;  %v2617_v50 = vrot.slane %v2608_v44, 7  ;;  %v2618_v51 = vrot.slane %v2610_v45, 7  ;;  %v7192_v54 = vld [vmem:[%s9140_s8 + $0x118] sm:$0xff]  ;;  %3159 = vmatpush.bf16.msrb.mxu0 %v7203_v41  ;;  %v7202_v43 = vld [vmem:[%s9140_s8 + $0x168] sm:$0xff]  ;;  %2886 = vmatpush.bf16.msra.mxu1 %v7173_v42 }
 0x3b1   : > { %v7212_v44 = vld [vmem:[%s9140_s8 + $0x1b8] sm:$0xff]  ;;  %v7191_v45 = vld [vmem:[%s9140_s8 + $0x110] sm:$0xff]  ;;  %v7230_v41 = vld [vmem:[%s9142_s10 + $0x8] sm:$0xff] }
 0x3b2   : > { %v2631_v55 = vsel %vm2616_vm8, %v2619_v48, 0.0  ;;  %v2632_v56 = vsel %vm2616_vm8, %v2621_v49, 0.0  ;;  %v2620_v57 = vsel %vm2616_vm8, %v2617_v50, %v2619_v48  ;;  %v2622_v60 = vsel %vm2616_vm8, %v2618_v51, %v2621_v49  ;;  %3076 = vmatpush.bf16.msrb.mxu3 %v7192_v54  ;;  %v7211_v48 = vld [vmem:[%s9140_s8 + $0x1b0] sm:$0xff]  ;;  %v7190_v49 = vld [vmem:[%s9140_s8 + $0x108] sm:$0xff] }
 0x3b3   : > { %v2895_v59 = vpack.c.bf16 %v2631_v55, %v2631_v55  ;;  %v8301_v61 = vpack.c.bf16 %v2632_v56, %v2632_v56  ;;  %v2629_v62 = vsel %vm2616_vm8, 0.0, %v2617_v50  ;;  %v2630_v15 = vsel %vm2616_vm8, 0.0, %v2618_v51  ;;  %v7210_v51 = vld [vmem:[%s9140_s8 + $0x1a8] sm:$0xff]  ;;  %v7209_v55 = vld [vmem:[%s9140_s8 + $0x1a0] sm:$0xff]  ;;  %v7220_v56 = vld [vmem:[%s9140_s8 + $0x1f8] sm:$0xff] }
 0x3b4   : > { %v2638_v0 = vpack.c.bf16 %v2620_v57, %v2629_v62  ;;  %v6083_v1 = vpack.c.bf16 %v2620_v57, %v2617_v50  ;;  %v8312_v2 = vpack.c.bf16 %v2622_v60, %v2630_v15  ;;  %3160 = vmatpush.bf16.msrb.mxu0 %v7202_v43  ;;  %3243 = vmatpush.bf16.msrb.mxu1 %v7212_v44  ;;  %v7200_v50 = vld [vmem:[%s9140_s8 + $0x158] sm:$0xff]  ;;  %v7198_v60 = vld [vmem:[%s9140_s8 + $0x148] sm:$0xff]  ;;  %v7227_v62 = vld [vmem:[%s9140_s8 + $0x230] sm:$0xff] }
 0x3b5   : > { %v2920_v32 = vshll.u32 %v2895_v59, 16  ;;  %v3014_v9 = vshll.u32 %v8301_v61, 16  ;;  %v3192_v29 = vrot.slane %v2895_v59, 1  ;;  %v3277_v35 = vrot.slane %v8301_v61, 1  ;;  %v7228_v57 = vld [vmem:[%s9140_s8 + $0x238] sm:$0xff]  ;;  %3333 = vmatpush.bf16.msra.mxu2 %v7220_v56  ;;  %v7219_v61 = vld [vmem:[%s9140_s8 + $0x1f0] sm:$0xff] }
 0x3b6   : > { %2740 = vrot.lane.b32.xlu2 %v8312_v2, %s9149_s29  ;;  %6084 = vmatmul.msk.bf16.vlgmr.msra.gmra.mxu3 %vm8305_vm11, %v6083_v1  ;;  %v2915_v7 = vshll.u32 %v2638_v0, 16  ;;  %v3009_v8 = vshll.u32 %v8312_v2, 16  ;;  %v2913_v10 = vshrl.u32 %v2638_v0, 16  ;;  %v3007_v13 = vshrl.u32 %v8312_v2, 16  ;;  %v7208_v59 = vld [vmem:[%s9140_s8 + $0x198] sm:$0xff]  ;;  %v7197_v15 = vld [vmem:[%s9140_s8 + $0x140] sm:$0xff] }
 0x3b7   : > { %2825 = vrot.lane.b32.xlu0 %v2638_v0, %s7446_s0  ;;  %2738 = vrot.lane.b32.xlu1 %v2638_v0, %s9149_s29  ;;  %v2922_v39 = vrot.slane %v2920_v32, 1  ;;  %v3016_v19 = vrot.slane %v3014_v9, 1  ;;  %v3191_v27 = vrot.slane %v2638_v0, 1  ;;  %v3276_v34 = vrot.slane %v8312_v2, 1  ;;  %v7218_v0 = vld [vmem:[%s9140_s8 + $0x1e8] sm:$0xff]  ;;  %v7216_v32 = vld [vmem:[%s9140_s8 + $0x1d8] sm:$0xff] }
 0x3b8   : > { %v2917_v12 = vrot.slane %v2915_v7, 1  ;;  %v3011_v14 = vrot.slane %v3009_v8, 1  ;;  %3077 = vmatpush.bf16.msrb.mxu3 %v7191_v45  ;;  %3161 = vmatpush.bf16.msrb.mxu0 %v7201_v46  ;;  %v7226_v1 = vld [vmem:[%s9140_s8 + $0x228] sm:$0xff]  ;;  %v7224_v7 = vld [vmem:[%s9140_s8 + $0x218] sm:$0xff]  ;;  %v7215_v8 = vld [vmem:[%s9140_s8 + $0x1d0] sm:$0xff] }
 0x3b9   : > { %v8366_v31 = vsel %vm2122_vm4, %v3191_v27, %v3192_v29  ;;  %v3278_v37 = vsel %vm2122_vm4, %v3276_v34, %v3277_v35  ;;  %3244 = vmatpush.bf16.msrb.mxu1 %v7211_v48  ;;  %3334 = vmatpush.bf16.msra.mxu2 %v7219_v61  ;;  %v7223_v9 = vld [vmem:[%s9140_s8 + $0x210] sm:$0xff]  ;;  %v7233_v27 = vld [vmem:[%s9142_s10 + $0x20] sm:$0xff]  ;;  %v7240_v43 = vld [vmem:[%s9142_s10 + $0x58] sm:$0xff] }
 0x3ba   : > { %v2918_v28 = vor.u32 %v2917_v12, %v2913_v10  ;;  %v3012_v18 = vor.u32 %v3011_v14, %v3007_v13  ;;  %v7214_v10 = vld [vmem:[%s9140_s8 + $0x1c8] sm:$0xff]  ;;  %v7213_v13 = vld [vmem:[%s9140_s8 + $0x1c0] sm:$0xff]  ;;  %v7243_v29 = vld [vmem:[%s9142_s10 + $0x70] sm:$0xff] }
 0x3bb   : > { %v7222_v12 = vld [vmem:[%s9140_s8 + $0x208] sm:$0xff]  ;;  %v7221_v14 = vld [vmem:[%s9140_s8 + $0x200] sm:$0xff]  ;;  %v7239_v48 = vld [vmem:[%s9142_s10 + $0x50] sm:$0xff] }
 0x3bc   : > { %v2923_v21 = vsel %vm1586_vm3, %v2918_v28, %v2922_v39  ;;  %v3017_v22 = vsel %vm1586_vm3, %v3012_v18, %v3016_v19  ;;  %3078 = vmatpush.bf16.msrb.mxu3 %v7190_v49  ;;  %3162 = vmatpush.bf16.msrb.mxu0 %v7200_v50  ;;  %v7229_v46 = vld [vmem:[%s9142_s10] sm:$0xff]  ;;  %v7238_v49 = vld [vmem:[%s9142_s10 + $0x48] sm:$0xff] }
 0x3bd   : > { %2981 = vmatmul.bf16.vlgmr.msrb.gmra.mxu2 %v2923_v21  ;;  %3245 = vmatpush.bf16.msrb.mxu1 %v7210_v51 }
 0x3be   : > { %3018 = vrot.lane.b32.xlu2 %v2923_v21, %s9149_s29  ;;  %3335 = vmatpush.bf16.msra.mxu2 %v7218_v0  ;;  %v7276_v0 = vld [vmem:[%s9144_s12 + $0xf8] sm:$0xff] }
 0x3bf   : > { %3020 = vrot.lane.b32.xlu0 %v3017_v22, %s9149_s29  ;;  %2827 = vrot.lane.b32.xlu1 %v8312_v2, %s7446_s0  ;;  %v7206_v2 = vld [vmem:[%s9140_s8 + $0x188] sm:$0xff] }
 0x3c0   : > { %3079 = vmatpush.bf16.msrb.mxu3 %v7189_v52  ;;  %3163 = vmatpush.bf16.msrb.mxu0 %v7199_v53 }
 0x3c1   : > { %3246 = vmatpush.bf16.msrb.mxu1 %v7209_v55 }
 0x3c2   : > { %3336 = vmatpush.bf16.msra.mxu2 %v7217_v3  ;;  %v7251_v3 = vld [vmem:[%s9144_s12 + $0x30] sm:$0xff] }
 0x3c4   : > { %3419 = vmatpush.bf16.msra.mxu3 %v7228_v57  ;;  %3164 = vmatpush.bf16.msrb.mxu0 %v7198_v60  ;;  %v7421_v57 = vld [vmem:[%s9141_s9] ss:$0 sm:$0xff] }
 0x3c5   : > { %3247 = vmatpush.bf16.msrb.mxu1 %v7208_v59 }
 0x3c6   : > { %3106 = vrot.lane.b32.xlu2 %v3017_v22, %s7446_s0  ;;  %3337 = vmatpush.bf16.msra.mxu2 %v7216_v32  ;;  %v7244_v22 = vld [vmem:[%s9142_s10 + $0x78] sm:$0xff] }
 0x3c7   : > { %3279 = vrot.lane.b32.xlu0 %v8366_v31, %s9149_s29  ;;  %3104 = vrot.lane.b32.xlu1 %v2923_v21, %s7446_s0  ;;  %v7234_v21 = vld [vmem:[%s9142_s10 + $0x28] sm:$0xff] }
 0x3c8   : > { %3420 = vmatpush.bf16.msra.mxu3 %v7227_v62  ;;  %3165 = vmatpush.bf16.msrb.mxu0 %v7197_v15 }
 0x3c9   : > { %3248 = vmatpush.bf16.msrb.mxu1 %v7207_v47 }
 0x3ca   : > { %3338 = vmatpush.bf16.msra.mxu2 %v7215_v8 }
 0x3cc   : > { %3421 = vmatpush.bf16.msra.mxu3 %v7226_v1 }
 0x3cd   : > { %3249 = vmatpush.bf16.msrb.mxu1 %v7206_v2 }
 0x3ce   : > { %3365 = vrot.lane.b32.xlu2 %v8366_v31, %s7446_s0  ;;  %3339 = vmatpush.bf16.msra.mxu2 %v7214_v10 }
 0x3cf   : > { %3367 = vrot.lane.b32.xlu0 %v3278_v37, %s7446_s0  ;;  %3281 = vrot.lane.b32.xlu1 %v3278_v37, %s9149_s29  ;;  %v7231_v37 = vld [vmem:[%s9142_s10 + $0x10] sm:$0xff] }
 0x3d0   : > { %3422 = vmatpush.bf16.msra.mxu3 %v7225_v5 }
 0x3d1   : > { %3250 = vmatpush.bf16.msrb.mxu1 %v7205_v6 }
 0x3d2   : > { %3340 = vmatpush.bf16.msra.mxu2 %v7213_v13 }
 0x3d4   : > { %3423 = vmatpush.bf16.msra.mxu3 %v7224_v7 }
 0x3d8   : > { %3424 = vmatpush.bf16.msra.mxu3 %v7223_v9  ;;  %v7250_v9 = vld [vmem:[%s9144_s12 + $0x28] sm:$0xff] }
 0x3dc   : > { %3425 = vmatpush.bf16.msra.mxu3 %v7222_v12 }
 0x3e0   : > { %3426 = vmatpush.bf16.msra.mxu3 %v7221_v14 }
 0x410   : > { %v2741_v16 = vpop.permute.xlu2 %2740 }
 0x418   : > { %v3019_v19 = vpop.permute.xlu2 %3018 }
 0x420   : > { %v3107_v58 = vpop.permute.xlu2 %3106 }
 0x428   : > { %v3366_v40 = vpop.permute.xlu2 %3365 }
 0x429   : > { %v2826_v28 = vpop.permute.xlu0 %2825  ;;  %v2739_v39 = vpop.permute.xlu1 %2738 }
 0x42a   : > { %v2743_v18 = vsel %vm2742_vm12, %v2739_v39, %v2741_v16  ;;  %v7422_v39 = vld [vmem:[%s9143_s11] ss:$0 sm:$0xff] }
 0x42b   : > { %2801 = vmatmul.bf16.vlgmr.msra.gmra.mxu0 %v2743_v18 }
 0x42c   : > { %3567 = vmatpush.bf16.msra.mxu0 %v7236_v17 }
 0x430   : > { %3568 = vmatpush.bf16.msra.mxu0 %v7235_v20 }
 0x431   : > { %v3021_v23 = vpop.permute.xlu0 %3020  ;;  %v2828_v24 = vpop.permute.xlu1 %2827 }
 0x432   : > { %v3022_v25 = vsel %vm2742_vm12, %v3019_v19, %v3021_v23  ;;  %v2829_v26 = vsel %vm1252_vm6, %v2826_v28, %v2828_v24 }
 0x433   : > { %2887 = vmatmul.bf16.vlgmr.msra.gmra.mxu1 %v2829_v26  ;;  %3080 = vmatmul.bf16.vlgmr.msrb.gmra.mxu3 %v3022_v25 }
 0x434   : > { %3569 = vmatpush.bf16.msra.mxu0 %v7234_v21  ;;  %3581 = vmatpush.bf16.msra.mxu1 %v7244_v22 }
 0x438   : > { %3570 = vmatpush.bf16.msra.mxu0 %v7233_v27  ;;  %3582 = vmatpush.bf16.msra.mxu1 %v7243_v29 }
 0x439   : > { %v3280_v34 = vpop.permute.xlu0 %3279  ;;  %v3105_v35 = vpop.permute.xlu1 %3104 }
 0x43a   : > { %v3108_v36 = vsel %vm1252_vm6, %v3105_v35, %v3107_v58  ;;  %v2712_v51 = vpop.f32.mrf.mxu3 }
 0x43b   : > { %3166 = vmatmul.bf16.vlgmr.msrb.gmra.mxu0 %v3108_v36  ;;  %v2717_v61 = vadd.f32 %v7421_v57, %v2712_v51  ;;  %v7270_v51 = vld [vmem:[%s9144_s12 + $0xc8] sm:$0xff] }
 0x43c   : > { %3571 = vmatpush.bf16.msra.mxu0 %v7232_v30  ;;  %3583 = vmatpush.bf16.msra.mxu1 %v7242_v33 }
 0x440   : > { %3572 = vmatpush.bf16.msra.mxu0 %v7231_v37  ;;  %3584 = vmatpush.bf16.msra.mxu1 %v7241_v38  ;;  %v2982_v56 = vpop.f32.mrf.mxu2 }
 0x441   : > { %v3368_v42 = vpop.permute.xlu0 %3367  ;;  %v3282_v54 = vpop.permute.xlu1 %3281 }
 0x442   : > { %v3369_v44 = vsel %vm1252_vm6, %v3366_v40, %v3368_v42  ;;  %v3283_v45 = vsel %vm2742_vm12, %v3280_v34, %v3282_v54  ;;  %v2714_v55 = vpop.f32.mrf.mxu3  ;;  %v7275_v42 = vld [vmem:[%s9144_s12 + $0xf0] sm:$0xff]  ;;  %v7249_v54 = vld [vmem:[%s9144_s12 + $0x20] sm:$0xff] }
 0x443   : > { %3251 = vmatmul.bf16.vlgmr.msrb.gmra.mxu1 %v8366_v31  ;;  %3341 = vmatmul.bf16.vlgmr.msra.gmra.mxu2 %v3283_v45  ;;  %v7237_v31 = vld [vmem:[%s9142_s10 + $0x40] sm:$0xff]  ;;  %v2718_v5 = vadd.f32 %v7421_v57, %v2714_v55 }
 0x444   : > { %3427 = vmatmul.bf16.vlgmr.msra.gmra.mxu3 %v3369_v44  ;;  %3573 = vmatpush.bf16.msra.mxu0 %v7230_v41  ;;  %v7248_v44 = vld [vmem:[%s9144_s12 + $0x18] sm:$0xff]  ;;  %v7273_v45 = vld [vmem:[%s9144_s12 + $0xe0] sm:$0xff] }
 0x445   : > { %3585 = vmatpush.bf16.msra.mxu1 %v7240_v43  ;;  %v7274_v43 = vld [vmem:[%s9144_s12 + $0xe8] sm:$0xff] }
 0x448   : > { %3574 = vmatpush.bf16.msra.mxu0 %v7229_v46  ;;  %v2984_v1 = vpop.f32.mrf.mxu2  ;;  %v7247_v46 = vld [vmem:[%s9144_s12 + $0x10] sm:$0xff] }
 0x449   : > { %3586 = vmatpush.bf16.msra.mxu1 %v7239_v48  ;;  %v7272_v48 = vld [vmem:[%s9144_s12 + $0xd8] sm:$0xff] }
 0x44b   : > { %3575 = vmatmul.bf16.vlgmr.msra.gmra.mxu0 %v8064_v4 }
 0x44d   : > { %3587 = vmatpush.bf16.msra.mxu1 %v7238_v49  ;;  %v7246_v49 = vld [vmem:[%s9144_s12 + $0x8] sm:$0xff] }
 0x451   : > { %3588 = vmatpush.bf16.msra.mxu1 %v7237_v31  ;;  %v7271_v31 = vld [vmem:[%s9144_s12 + $0xd0] sm:$0xff] }
 0x454   : > { %3589 = vmatmul.bf16.vlgmr.msra.gmra.mxu1 %v8086_v11  ;;  %v7252_v11 = vld [vmem:[%s9144_s12 + $0x38] sm:$0xff] }
 0x455   : > { %3701 = vmatpush.bf16.msrb.mxu2 %v7252_v11  ;;  %3970 = vmatpush.bf16.msrb.mxu1 %v7276_v0 }
 0x459   : > { %3702 = vmatpush.bf16.msrb.mxu2 %v7251_v3  ;;  %3971 = vmatpush.bf16.msrb.mxu1 %v7275_v42 }
 0x45d   : > { %3703 = vmatpush.bf16.msrb.mxu2 %v7250_v9  ;;  %3972 = vmatpush.bf16.msrb.mxu1 %v7274_v43  ;;  %v7282_v43 = vld [vmem:[%s9144_s12 + $0x128] sm:$0xff] }
 0x461   : > { %3704 = vmatpush.bf16.msrb.mxu2 %v7249_v54  ;;  %3973 = vmatpush.bf16.msrb.mxu1 %v7273_v45  ;;  %v7266_v54 = vld [vmem:[%s9144_s12 + $0xa8] sm:$0xff]  ;;  %v7265_v45 = vld [vmem:[%s9144_s12 + $0xa0] sm:$0xff] }
 0x465   : > { %3705 = vmatpush.bf16.msrb.mxu2 %v7248_v44  ;;  %3974 = vmatpush.bf16.msrb.mxu1 %v7272_v48  ;;  %v7257_v44 = vld [vmem:[%s9144_s12 + $0x60] sm:$0xff]  ;;  %v7256_v48 = vld [vmem:[%s9144_s12 + $0x58] sm:$0xff] }
 0x469   : > { %3706 = vmatpush.bf16.msrb.mxu2 %v7247_v46  ;;  %3975 = vmatpush.bf16.msrb.mxu1 %v7271_v31  ;;  %v7281_v46 = vld [vmem:[%s9144_s12 + $0x120] sm:$0xff]  ;;  %v7280_v31 = vld [vmem:[%s9144_s12 + $0x118] sm:$0xff] }
 0x46d   : > { %3707 = vmatpush.bf16.msrb.mxu2 %v7246_v49  ;;  %3976 = vmatpush.bf16.msrb.mxu1 %v7270_v51  ;;  %v7264_v49 = vld [vmem:[%s9144_s12 + $0x98] sm:$0xff] }
 0x4a8   : > { %v2802_v50 = vpop.f32.mrf.mxu0 }
 0x4a9   : > { %v2807_v62 = vadd.f32 %v2802_v50, %v2717_v61  ;;  %v7245_v50 = vld [vmem:[%s9144_s12] sm:$0xff] }
 0x4aa   : > { %3708 = vmatpush.bf16.msrb.mxu2 %v7245_v50  ;;  %v7255_v50 = vld [vmem:[%s9144_s12 + $0x50] sm:$0xff] }
 0x4b0   : > { %v2804_v52 = vpop.f32.mrf.mxu0  ;;  %v2888_v53 = vpop.f32.mrf.mxu1 }
 0x4b1   : > { %v2893_v15 = vadd.f32 %v2888_v53, %v2807_v62  ;;  %v2808_v7 = vadd.f32 %v2804_v52, %v2718_v5  ;;  %v7269_v52 = vld [vmem:[%s9144_s12 + $0xc0] sm:$0xff] }
 0x4b2   : > { %3977 = vmatpush.bf16.msrb.mxu1 %v7269_v52 }
 0x4b3   : > { %v2987_v6 = vadd.f32 %v2982_v56, %v2893_v15 }
 0x4b6   : > { %v3081_v59 = vpop.f32.mrf.mxu3 }
 0x4b7   : > { %v3086_v8 = vadd.f32 %v3081_v59, %v2987_v6 }
 0x4b8   : > { %v2890_v60 = vpop.f32.mrf.mxu1  ;;  %v3167_v4 = vpop.f32.mrf.mxu0 }
 0x4b9   : > { %v2894_v10 = vadd.f32 %v2890_v60, %v2808_v7  ;;  %v3172_v14 = vadd.f32 %v3167_v4, %v3086_v8 }
 0x4bb   : > { %v2988_v17 = vadd.f32 %v2984_v1, %v2894_v10 }
 0x4be   : > { %v3083_v32 = vpop.f32.mrf.mxu3 }
 0x4bf   : > { %v3087_v18 = vadd.f32 %v3083_v32, %v2988_v17 }
 0x4c0   : > { %v3252_v47 = vpop.f32.mrf.mxu1  ;;  %v3169_v2 = vpop.f32.mrf.mxu0 }
 0x4c1   : > { %v3257_v28 = vadd.f32 %v3252_v47, %v3172_v14  ;;  %v3173_v23 = vadd.f32 %v3169_v2, %v3087_v18 }
 0x4c6   : > { %v3342_v13 = vpop.f32.mrf.mxu2 }
 0x4c7   : > { %v3347_v19 = vadd.f32 %v3342_v13, %v3257_v28  ;;  %v3428_v20 = vpop.f32.mrf.mxu3  ;;  %v7260_v13 = vld [vmem:[%s9144_s12 + $0x78] sm:$0xff] }
 0x4c8   : > { %v3254_v12 = vpop.f32.mrf.mxu1  ;;  %v3576_v16 = vpop.f32.mrf.mxu0  ;;  %3790 = vmatpush.bf16.msrb.mxu3 %v7260_v13  ;;  %v7306_v13 = vld [vmem:[%s9144_s12 + $0x1e8] sm:$0xff] }
 0x4c9   : > { %v3577_v21 = vadd.f32 %v7422_v39, %v3576_v16  ;;  %v3433_v24 = vadd.f32 %v3428_v20, %v3347_v19  ;;  %v3258_v27 = vadd.f32 %v3254_v12, %v3173_v23  ;;  %v7268_v20 = vld [vmem:[%s9144_s12 + $0xb8] sm:$0xff] }
 0x4ca   : > { %3876 = vmatpush.bf16.msrb.mxu0 %v7268_v20  ;;  %v7304_v20 = vld [vmem:[%s9144_s12 + $0x1d8] sm:$0xff] }
 0x4ce   : > { %v3344_v26 = vpop.f32.mrf.mxu2 }
 0x4cf   : > { %v3348_v30 = vadd.f32 %v3344_v26, %v3258_v27  ;;  %v3430_v35 = vpop.f32.mrf.mxu3 }
 0x4d0   : > { %v3578_v58 = vpop.f32.mrf.mxu0 }
 0x4d1   : > { %v3590_v22 = vpop.f32.mrf.mxu1  ;;  %v3579_v34 = vadd.f32 %v7422_v39, %v3578_v58  ;;  %v3434_v37 = vadd.f32 %v3430_v35, %v3348_v30  ;;  %v7267_v58 = vld [vmem:[%s9144_s12 + $0xb0] sm:$0xff] }
 0x4d2   : > { %v3591_v25 = vadd.f32 %v3590_v22, %v3577_v21  ;;  %v7284_v21 = vld [vmem:[%s9144_s12 + $0x138] sm:$0xff]  ;;  %v7283_v30 = vld [vmem:[%s9144_s12 + $0x130] sm:$0xff]  ;;  %3877 = vmatpush.bf16.msrb.mxu0 %v7267_v58  ;;  %v7302_v58 = vld [vmem:[%s9144_s12 + $0x1c8] sm:$0xff] }
 0x4d3   : > { %4069 = vmatpush.bf16.msra.mxu2 %v7284_v21  ;;  %v7312_v21 = vld [vmem:[%s9144_s12 + $0x218] sm:$0xff] }
 0x4d4   : > { %v3595_v29 = vadd.f32 %v3591_v25, %v3433_v24  ;;  %v7259_v24 = vld [vmem:[%s9144_s12 + $0x70] sm:$0xff] }
 0x4d5   : > { %3791 = vmatpush.bf16.msrb.mxu3 %v7259_v24  ;;  %v7303_v24 = vld [vmem:[%s9144_s12 + $0x1d0] sm:$0xff] }
 0x4d6   : > { %v3597_v33 = vmax.f32 %v3595_v29, 0.0  ;;  %3878 = vmatpush.bf16.msrb.mxu0 %v7266_v54 }
 0x4d7   : > { %4070 = vmatpush.bf16.msra.mxu2 %v7283_v30  ;;  %v7310_v30 = vld [vmem:[%s9144_s12 + $0x208] sm:$0xff] }
 0x4d8   : > { %3601 = vrot.lane.b32.xlu1 %v3597_v33, %s7448_s17 }
 0x4d9   : > { %v3592_v36 = vpop.f32.mrf.mxu1 }
 0x4da   : > { %v3593_v38 = vadd.f32 %v3592_v36, %v3579_v34  ;;  %3879 = vmatpush.bf16.msrb.mxu0 %v7265_v45 }
 0x4db   : > { %4071 = vmatpush.bf16.msra.mxu2 %v7282_v43 }
 0x4dc   : > { %v3596_v40 = vadd.f32 %v3593_v38, %v3434_v37 }
 0x4de   : > { %v3598_v41 = vmax.f32 %v3596_v40, 0.0  ;;  %v7258_v40 = vld [vmem:[%s9144_s12 + $0x68] sm:$0xff]  ;;  %3880 = vmatpush.bf16.msrb.mxu0 %v7264_v49 }
 0x4df   : > { %3792 = vmatpush.bf16.msrb.mxu3 %v7258_v40  ;;  %4072 = vmatpush.bf16.msra.mxu2 %v7281_v46 }
 0x4e0   : > { %3603 = vrot.lane.b32.xlu2 %v3598_v41, %s7448_s17 }
 0x4e3   : > { %3793 = vmatpush.bf16.msrb.mxu3 %v7257_v44  ;;  %4073 = vmatpush.bf16.msra.mxu2 %v7280_v31 }
 0x4e7   : > { %3794 = vmatpush.bf16.msrb.mxu3 %v7256_v48 }
 0x4eb   : > { %3795 = vmatpush.bf16.msrb.mxu3 %v7255_v50 }
 0x53a   : > { %v3604_v53 = vpop.permute.xlu2 %3603 }
 0x53b   : > { %v3608_v55 = vsel %vm2607_vm7, 0.0, %v3604_v53  ;;  %v3610_v56 = vsel %vm2607_vm7, %v3604_v53, 0.0 }
 0x53c   : > { %v3617_v57 = vrot.slane %v3608_v55, 7  ;;  %v3619_v60 = vrot.slane %v3610_v56, 7  ;;  %v7254_v55 = vld [vmem:[%s9144_s12 + $0x48] sm:$0xff] }
 0x53d   : > { %3796 = vmatpush.bf16.msrb.mxu3 %v7254_v55 }
 0x53e   : > { %v3629_v4 = vsel %vm2616_vm8, %v3617_v57, 0.0  ;;  %v3630_v59 = vsel %vm2616_vm8, %v3619_v60, 0.0 }
 0x53f   : > { %v8618_v0 = vpack.c.bf16 %v3629_v4, %v3629_v4  ;;  %v8620_v1 = vpack.c.bf16 %v3630_v59, %v3630_v59  ;;  %v5278_v2 = vrot.slane %v3629_v4, 1  ;;  %v5280_v12 = vrot.slane %v3630_v59, 1  ;;  %v7253_v4 = vld [vmem:[%s9144_s12 + $0x40] sm:$0xff]  ;;  %v7263_v59 = vld [vmem:[%s9144_s12 + $0x90] sm:$0xff] }
 0x540   : > { %3881 = vmatpush.bf16.msrb.mxu0 %v7263_v59 }
 0x541   : > { %v3917_v39 = vshll.u32 %v8618_v0, 16  ;;  %v4011_v19 = vshll.u32 %v8620_v1, 16  ;;  %v4189_v52 = vrot.slane %v8618_v0, 1  ;;  %3797 = vmatpush.bf16.msrb.mxu3 %v7253_v4  ;;  %v7261_v0 = vld [vmem:[%s9144_s12 + $0x80] sm:$0xff] }
 0x543   : > { %v3919_v36 = vrot.slane %v3917_v39, 1  ;;  %v4013_v38 = vrot.slane %v4011_v19, 1  ;;  %v7313_v39 = vld [vmem:[%s9144_s12 + $0x220] sm:$0xff]  ;;  %v7296_v19 = vld [vmem:[%s9144_s12 + $0x198] sm:$0xff] }
 0x54a   : > { %v3602_v61 = vpop.permute.xlu1 %3601 }
 0x54b   : > { %v3607_v62 = vsel %vm2607_vm7, 0.0, %v3602_v61  ;;  %v3609_v15 = vsel %vm2607_vm7, %v3602_v61, 0.0  ;;  %v7279_v61 = vld [vmem:[%s9144_s12 + $0x110] sm:$0xff] }
 0x54c   : > { %v3615_v47 = vrot.slane %v3607_v62, 7  ;;  %v3616_v11 = vrot.slane %v3609_v15, 7  ;;  %v7292_v62 = vld [vmem:[%s9144_s12 + $0x178] sm:$0xff]  ;;  %v7262_v15 = vld [vmem:[%s9144_s12 + $0x88] sm:$0xff]  ;;  %4074 = vmatpush.bf16.msra.mxu2 %v7279_v61 }
 0x54d   : > { %4155 = vmatpush.bf16.msra.mxu3 %v7292_v62  ;;  %3882 = vmatpush.bf16.msrb.mxu0 %v7262_v15  ;;  %v7423_v15 = vld [vmem:[%s9145_s13] ss:$0 sm:$0xff] }
 0x54e   : > { %v3618_v3 = vsel %vm2616_vm8, %v3615_v47, %v3617_v57  ;;  %v3620_v5 = vsel %vm2616_vm8, %v3616_v11, %v3619_v60  ;;  %v3627_v6 = vsel %vm2616_vm8, 0.0, %v3615_v47  ;;  %v3628_v32 = vsel %vm2616_vm8, 0.0, %v3616_v11  ;;  %v7291_v11 = vld [vmem:[%s9144_s12 + $0x170] sm:$0xff] }
 0x54f   : > { %v8626_v7 = vpack.c.bf16 %v3618_v3, %v3627_v6  ;;  %v6439_v8 = vpack.c.bf16 %v3618_v3, %v3615_v47  ;;  %v8628_v9 = vpack.c.bf16 %v3620_v5, %v3628_v32  ;;  %v5275_v10 = vrot.slane %v3628_v32, 1  ;;  %v7278_v47 = vld [vmem:[%s9144_s12 + $0x108] sm:$0xff]  ;;  %v7289_v32 = vld [vmem:[%s9144_s12 + $0x160] sm:$0xff] }
 0x550   : > { %v5276_v14 = vrot.slane %v3620_v5, 1  ;;  %v5272_v16 = vrot.slane %v3627_v6, 1  ;;  %v5273_v17 = vrot.slane %v3618_v3, 1  ;;  %v4274_v57 = vrot.slane %v8620_v1, 1  ;;  %4075 = vmatpush.bf16.msra.mxu2 %v7278_v47  ;;  %v7277_v1 = vld [vmem:[%s9144_s12 + $0x100] sm:$0xff]  ;;  %v7300_v3 = vld [vmem:[%s9144_s12 + $0x1b8] sm:$0xff] }
 0x551   : > { %3738 = vrot.lane.b32.xlu1 %v8628_v9, %s9149_s29  ;;  %6440 = vmatmul.msk.bf16.vlgmr.msrb.gmra.mxu2 %vm8305_vm11, %v6439_v8  ;;  %v3912_v28 = vshll.u32 %v8626_v7, 16  ;;  %v4006_v18 = vshll.u32 %v8628_v9, 16  ;;  %v3910_v22 = vshrl.u32 %v8626_v7, 16  ;;  %v4004_v23 = vshrl.u32 %v8628_v9, 16  ;;  %v7308_v5 = vld [vmem:[%s9144_s12 + $0x1f8] sm:$0xff]  ;;  %v7307_v8 = vld [vmem:[%s9144_s12 + $0x1f0] sm:$0xff] }
 0x552   : > { %3736 = vrot.lane.b32.xlu0 %v8626_v7, %s9149_s29  ;;  %v8655_v25 = vsel %vm2122_vm4, %v5275_v10, %v5276_v14  ;;  %v8658_v26 = vsel %vm2122_vm4, %v5272_v16, %v5273_v17  ;;  %v8667_v33 = vsel %vm2122_vm4, %v5273_v17, %v5278_v2  ;;  %v8670_v34 = vsel %vm2122_vm4, %v5276_v14, %v5280_v12  ;;  %v7290_v2 = vld [vmem:[%s9144_s12 + $0x168] sm:$0xff]  ;;  %v7316_v6 = vld [vmem:[%s9144_s12 + $0x238] sm:$0xff]  ;;  %v7287_v16 = vld [vmem:[%s9144_s12 + $0x150] sm:$0xff] }
 0x553   : > { %v3914_v27 = vrot.slane %v3912_v28, 1  ;;  %v4008_v29 = vrot.slane %v4006_v18, 1  ;;  %v4188_v51 = vrot.slane %v8626_v7, 1  ;;  %v4273_v53 = vrot.slane %v8628_v9, 1  ;;  %4156 = vmatpush.bf16.msra.mxu3 %v7291_v11  ;;  %3883 = vmatpush.bf16.msrb.mxu0 %v7261_v0  ;;  %v7288_v10 = vld [vmem:[%s9144_s12 + $0x158] sm:$0xff]  ;;  %v7298_v12 = vld [vmem:[%s9144_s12 + $0x1a8] sm:$0xff] }
 0x554   : > { %4076 = vmatpush.bf16.msra.mxu2 %v7277_v1  ;;  %4330 = vmatpush.bf16.msra.mxu1 %v7308_v5  ;;  %v7314_v14 = vld [vmem:[%s9144_s12 + $0x228] sm:$0xff]  ;;  %v7297_v17 = vld [vmem:[%s9144_s12 + $0x1a0] sm:$0xff]  ;;  %v7324_v11 = vld [vmem:[%s9146_s14 + $0x38] sm:$0xff] }
 0x555   : > { %v3915_v35 = vor.u32 %v3914_v27, %v3910_v22  ;;  %v4009_v37 = vor.u32 %v4008_v29, %v4004_v23  ;;  %v8719_v56 = vsel %vm2122_vm4, %v4188_v51, %v4189_v52  ;;  %v4275_v60 = vsel %vm2122_vm4, %v4273_v53, %v4274_v57  ;;  %v7305_v28 = vld [vmem:[%s9144_s12 + $0x1e0] sm:$0xff]  ;;  %v7286_v18 = vld [vmem:[%s9144_s12 + $0x148] sm:$0xff]  ;;  %v7295_v23 = vld [vmem:[%s9144_s12 + $0x190] sm:$0xff] }
 0x556   : > { %v7285_v22 = vld [vmem:[%s9144_s12 + $0x140] sm:$0xff]  ;;  %v7311_v27 = vld [vmem:[%s9144_s12 + $0x210] sm:$0xff]  ;;  %v7294_v29 = vld [vmem:[%s9144_s12 + $0x188] sm:$0xff] }
 0x557   : > { %v3920_v41 = vsel %vm1586_vm3, %v3915_v35, %v3919_v36  ;;  %v4014_v42 = vsel %vm1586_vm3, %v4009_v37, %v4013_v38  ;;  %4157 = vmatpush.bf16.msra.mxu3 %v7290_v2  ;;  %4240 = vmatpush.bf16.msra.mxu0 %v7300_v3  ;;  %v7293_v35 = vld [vmem:[%s9144_s12 + $0x180] sm:$0xff]  ;;  %v7323_v5 = vld [vmem:[%s9146_s14 + $0x30] sm:$0xff] }
 0x558   : > { %4015 = vrot.lane.b32.xlu2 %v3920_v41, %s9149_s29  ;;  %3978 = vmatmul.bf16.vlgmr.msrb.gmra.mxu1 %v3920_v41  ;;  %v7301_v36 = vld [vmem:[%s9144_s12 + $0x1c0] sm:$0xff] }
 0x559   : > { %3822 = vrot.lane.b32.xlu1 %v8626_v7, %s7446_s0  ;;  %v7299_v7 = vld [vmem:[%s9144_s12 + $0x1b0] sm:$0xff]  ;;  %4416 = vmatpush.bf16.msrb.mxu2 %v7316_v6  ;;  %v7309_v37 = vld [vmem:[%s9144_s12 + $0x200] sm:$0xff] }
 0x55a   : > { %4017 = vrot.lane.b32.xlu0 %v4014_v42, %s9149_s29  ;;  %4331 = vmatpush.bf16.msra.mxu1 %v7307_v8  ;;  %v7347_v6 = vld [vmem:[%s9146_s14 + $0xf0] sm:$0xff] }
 0x55b   : > { %4158 = vmatpush.bf16.msra.mxu3 %v7289_v32  ;;  %4241 = vmatpush.bf16.msra.mxu0 %v7299_v7 }
 0x55e   : > { %4332 = vmatpush.bf16.msra.mxu1 %v7306_v13 }
 0x55f   : > { %4159 = vmatpush.bf16.msra.mxu3 %v7288_v10  ;;  %4242 = vmatpush.bf16.msra.mxu0 %v7298_v12  ;;  %v7322_v10 = vld [vmem:[%s9146_s14 + $0x28] sm:$0xff] }
 0x560   : > { %3824 = vrot.lane.b32.xlu2 %v8628_v9, %s7446_s0  ;;  %v7315_v9 = vld [vmem:[%s9144_s12 + $0x230] sm:$0xff]  ;;  %v7346_v12 = vld [vmem:[%s9146_s14 + $0xe8] sm:$0xff] }
 0x561   : > { %4103 = vrot.lane.b32.xlu1 %v4014_v42, %s7446_s0  ;;  %4417 = vmatpush.bf16.msrb.mxu2 %v7315_v9 }
 0x562   : > { %4101 = vrot.lane.b32.xlu0 %v3920_v41, %s7446_s0  ;;  %4333 = vmatpush.bf16.msra.mxu1 %v7305_v28 }
 0x563   : > { %4160 = vmatpush.bf16.msra.mxu3 %v7287_v16  ;;  %4243 = vmatpush.bf16.msra.mxu0 %v7297_v17 }
 0x565   : > { %4418 = vmatpush.bf16.msrb.mxu2 %v7314_v14 }
 0x566   : > { %4334 = vmatpush.bf16.msra.mxu1 %v7304_v20 }
 0x567   : > { %4161 = vmatpush.bf16.msra.mxu3 %v7286_v18  ;;  %4244 = vmatpush.bf16.msra.mxu0 %v7296_v19  ;;  %v7345_v18 = vld [vmem:[%s9146_s14 + $0xe0] sm:$0xff] }
 0x568   : > { %4362 = vrot.lane.b32.xlu2 %v8719_v56, %s7446_s0 }
 0x569   : > { %4276 = vrot.lane.b32.xlu1 %v8719_v56, %s9149_s29  ;;  %4419 = vmatpush.bf16.msrb.mxu2 %v7313_v39  ;;  %v7321_v39 = vld [vmem:[%s9146_s14 + $0x20] sm:$0xff] }
 0x56a   : > { %4364 = vrot.lane.b32.xlu0 %v4275_v60, %s7446_s0  ;;  %4335 = vmatpush.bf16.msra.mxu1 %v7303_v24 }
 0x56b   : > { %4162 = vmatpush.bf16.msra.mxu3 %v7285_v22  ;;  %4245 = vmatpush.bf16.msra.mxu0 %v7295_v23  ;;  %v7320_v23 = vld [vmem:[%s9146_s14 + $0x18] sm:$0xff] }
 0x56d   : > { %4420 = vmatpush.bf16.msrb.mxu2 %v7312_v21 }
 0x56e   : > { %4336 = vmatpush.bf16.msra.mxu1 %v7302_v58 }
 0x56f   : > { %4246 = vmatpush.bf16.msra.mxu0 %v7294_v29 }
 0x570   : > { %4278 = vrot.lane.b32.xlu2 %v4275_v60, %s9149_s29 }
 0x571   : > { %4421 = vmatpush.bf16.msrb.mxu2 %v7311_v27 }
 0x572   : > { %4337 = vmatpush.bf16.msra.mxu1 %v7301_v36  ;;  %v7319_v36 = vld [vmem:[%s9146_s14 + $0x10] sm:$0xff] }
 0x573   : > { %4247 = vmatpush.bf16.msra.mxu0 %v7293_v35 }
 0x575   : > { %4422 = vmatpush.bf16.msrb.mxu2 %v7310_v30 }
 0x576   : > { %4711 = vmatpush.bf16.msrb.mxu1 %v7340_v63 }
 0x579   : > { %4423 = vmatpush.bf16.msrb.mxu2 %v7309_v37 }
 0x5b2   : > { %v4016_v38 = vpop.permute.xlu2 %4015 }
 0x5ba   : > { %v3825_v54 = vpop.permute.xlu2 %3824 }
 0x5c2   : > { %v4363_v48 = vpop.permute.xlu2 %4362 }
 0x5c3   : > { %v3739_v40 = vpop.permute.xlu1 %3738 }
 0x5c4   : > { %v3737_v41 = vpop.permute.xlu0 %3736 }
 0x5c5   : > { %v3740_v42 = vsel %vm2742_vm12, %v3737_v41, %v3739_v40 }
 0x5c6   : > { %3798 = vmatmul.bf16.vlgmr.msrb.gmra.mxu3 %v3740_v42 }
 0x5c7   : > { %4536 = vmatpush.bf16.msrb.mxu3 %v7324_v11 }
 0x5ca   : > { %v4279_v51 = vpop.permute.xlu2 %4278 }
 0x5cb   : > { %v3823_v43 = vpop.permute.xlu1 %3822  ;;  %4537 = vmatpush.bf16.msrb.mxu3 %v7323_v5 }
 0x5cc   : > { %v3826_v44 = vsel %vm1252_vm6, %v3823_v43, %v3825_v54  ;;  %v4018_v45 = vpop.permute.xlu0 %4017 }
 0x5cd   : > { %v4019_v46 = vsel %vm2742_vm12, %v4016_v38, %v4018_v45  ;;  %3884 = vmatmul.bf16.vlgmr.msrb.gmra.mxu0 %v3826_v44 }
 0x5ce   : > { %4077 = vmatmul.bf16.vlgmr.msra.gmra.mxu2 %v4019_v46 }
 0x5cf   : > { %4538 = vmatpush.bf16.msrb.mxu3 %v7322_v10 }
 0x5d3   : > { %v4104_v49 = vpop.permute.xlu1 %4103  ;;  %4539 = vmatpush.bf16.msrb.mxu3 %v7321_v39 }
 0x5d4   : > { %v4102_v31 = vpop.permute.xlu0 %4101  ;;  %v3710_v60 = vpop.f32.mrf.mxu2 }
 0x5d5   : > { %v4105_v50 = vsel %vm1252_vm6, %v4102_v31, %v4104_v49  ;;  %v3979_v62 = vpop.f32.mrf.mxu1  ;;  %v3715_v47 = vadd.f32 %v7423_v15, %v3710_v60  ;;  %v7318_v49 = vld [vmem:[%s9146_s14 + $0x8] sm:$0xff]  ;;  %v7343_v31 = vld [vmem:[%s9146_s14 + $0xd0] sm:$0xff] }
 0x5d6   : > { %4163 = vmatmul.bf16.vlgmr.msra.gmra.mxu3 %v4105_v50  ;;  %v7317_v50 = vld [vmem:[%s9146_s14] sm:$0xff] }
 0x5d7   : > { %4540 = vmatpush.bf16.msrb.mxu3 %v7320_v23 }
 0x5db   : > { %v4277_v52 = vpop.permute.xlu1 %4276  ;;  %4541 = vmatpush.bf16.msrb.mxu3 %v7319_v36 }
 0x5dc   : > { %v4280_v53 = vsel %vm2742_vm12, %v4277_v52, %v4279_v51  ;;  %v4365_v55 = vpop.permute.xlu0 %4364  ;;  %v3712_v4 = vpop.f32.mrf.mxu2  ;;  %v7342_v51 = vld [vmem:[%s9146_s14 + $0xc8] sm:$0xff]  ;;  %v7341_v52 = vld [vmem:[%s9146_s14 + $0xc0] sm:$0xff] }
 0x5dd   : > { %v4366_v57 = vsel %vm1252_vm6, %v4363_v48, %v4365_v55  ;;  %4248 = vmatmul.bf16.vlgmr.msra.gmra.mxu0 %v8719_v56  ;;  %4338 = vmatmul.bf16.vlgmr.msra.gmra.mxu1 %v4280_v53  ;;  %v7348_v56 = vld [vmem:[%s9146_s14 + $0xf8] sm:$0xff]  ;;  %v3716_v32 = vadd.f32 %v7423_v15, %v3712_v4  ;;  %v3981_v7 = vpop.f32.mrf.mxu1 }
 0x5de   : > { %4424 = vmatmul.bf16.vlgmr.msrb.gmra.mxu2 %v4366_v57  ;;  %v7344_v48 = vld [vmem:[%s9146_s14 + $0xd8] sm:$0xff] }
 0x5df   : > { %4805 = vmatpush.bf16.msra.mxu2 %v7348_v56  ;;  %4542 = vmatpush.bf16.msrb.mxu3 %v7318_v49  ;;  %v7327_v49 = vld [vmem:[%s9146_s14 + $0x50] sm:$0xff] }
 0x5e3   : > { %4806 = vmatpush.bf16.msra.mxu2 %v7347_v6  ;;  %4543 = vmatpush.bf16.msrb.mxu3 %v7317_v50  ;;  %v7351_v50 = vld [vmem:[%s9146_s14 + $0x110] sm:$0xff] }
 0x5e7   : > { %4807 = vmatpush.bf16.msra.mxu2 %v7346_v12 }
 0x5eb   : > { %4808 = vmatpush.bf16.msra.mxu2 %v7345_v18 }
 0x5ef   : > { %4809 = vmatpush.bf16.msra.mxu2 %v7344_v48  ;;  %v7335_v48 = vld [vmem:[%s9146_s14 + $0x90] sm:$0xff] }
 0x5f3   : > { %4810 = vmatpush.bf16.msra.mxu2 %v7343_v31  ;;  %v7333_v31 = vld [vmem:[%s9146_s14 + $0x80] sm:$0xff] }
 0x5f7   : > { %4811 = vmatpush.bf16.msra.mxu2 %v7342_v51  ;;  %v7372_v51 = vld [vmem:[%s9146_s14 + $0x1b8] sm:$0xff] }
 0x5fb   : > { %4812 = vmatpush.bf16.msra.mxu2 %v7341_v52  ;;  %v7380_v52 = vld [vmem:[%s9146_s14 + $0x1f8] sm:$0xff] }
 0x5ff   : > { %5165 = vmatpush.bf16.msrb.mxu2 %v7380_v52 }
 0x649   : > { %v3799_v59 = vpop.f32.mrf.mxu3 }
 0x64a   : > { %v3885_v61 = vpop.f32.mrf.mxu0  ;;  %v3804_v2 = vadd.f32 %v3799_v59, %v3715_v47 }
 0x64c   : > { %v3890_v8 = vadd.f32 %v3885_v61, %v3804_v2 }
 0x64e   : > { %v3984_v16 = vadd.f32 %v3979_v62, %v3890_v8 }
 0x651   : > { %v3801_v0 = vpop.f32.mrf.mxu3  ;;  %v4078_v1 = vpop.f32.mrf.mxu2 }
 0x652   : > { %v3887_v3 = vpop.f32.mrf.mxu0  ;;  %v3805_v9 = vadd.f32 %v3801_v0, %v3716_v32  ;;  %v4083_v19 = vadd.f32 %v4078_v1, %v3984_v16 }
 0x654   : > { %v3891_v17 = vadd.f32 %v3887_v3, %v3805_v9 }
 0x656   : > { %v3985_v21 = vadd.f32 %v3981_v7, %v3891_v17 }
 0x659   : > { %v4080_v13 = vpop.f32.mrf.mxu2  ;;  %v4164_v14 = vpop.f32.mrf.mxu3 }
 0x65a   : > { %v4249_v28 = vpop.f32.mrf.mxu0  ;;  %v4339_v20 = vpop.f32.mrf.mxu1  ;;  %v4169_v22 = vadd.f32 %v4164_v14, %v4083_v19  ;;  %v4084_v24 = vadd.f32 %v4080_v13, %v3985_v21 }
 0x65c   : > { %v4254_v58 = vadd.f32 %v4249_v28, %v4169_v22 }
 0x65e   : > { %v4344_v38 = vadd.f32 %v4339_v20, %v4254_v58 }
 0x661   : > { %v4166_v27 = vpop.f32.mrf.mxu3  ;;  %v4425_v29 = vpop.f32.mrf.mxu2 }
 0x662   : > { %v4170_v30 = vadd.f32 %v4166_v27, %v4084_v24  ;;  %v4251_v35 = vpop.f32.mrf.mxu0  ;;  %v4341_v40 = vpop.f32.mrf.mxu1  ;;  %v4430_v41 = vadd.f32 %v4425_v29, %v4344_v38  ;;  %v7332_v24 = vld [vmem:[%s9146_s14 + $0x78] sm:$0xff]  ;;  %v7355_v38 = vld [vmem:[%s9146_s14 + $0x130] sm:$0xff] }
 0x663   : > { %v7356_v27 = vld [vmem:[%s9146_s14 + $0x138] sm:$0xff]  ;;  %4625 = vmatpush.bf16.msrb.mxu0 %v7332_v24 }
 0x664   : > { %v4255_v37 = vadd.f32 %v4251_v35, %v4170_v30  ;;  %v4432_v44 = vmax.f32 %v4430_v41, 0.0  ;;  %v7339_v30 = vld [vmem:[%s9146_s14 + $0xb0] sm:$0xff]  ;;  %4904 = vmatpush.bf16.msra.mxu3 %v7356_v27  ;;  %v7338_v41 = vld [vmem:[%s9146_s14 + $0xa8] sm:$0xff] }
 0x665   : > { %v7331_v35 = vld [vmem:[%s9146_s14 + $0x70] sm:$0xff]  ;;  %4712 = vmatpush.bf16.msrb.mxu1 %v7339_v30 }
 0x666   : > { %v4345_v42 = vadd.f32 %v4341_v40, %v4255_v37 }
 0x667   : > { %4626 = vmatpush.bf16.msrb.mxu0 %v7331_v35 }
 0x668   : > { %4905 = vmatpush.bf16.msra.mxu3 %v7355_v38 }
 0x669   : > { %v4427_v54 = vpop.f32.mrf.mxu2  ;;  %4713 = vmatpush.bf16.msrb.mxu1 %v7338_v41 }
 0x66a   : > { %v4431_v43 = vadd.f32 %v4427_v54, %v4345_v42  ;;  %v7330_v42 = vld [vmem:[%s9146_s14 + $0x68] sm:$0xff] }
 0x66b   : > { %4627 = vmatpush.bf16.msrb.mxu0 %v7330_v42 }
 0x66c   : > { %v4433_v45 = vmax.f32 %v4431_v43, 0.0  ;;  %v7354_v43 = vld [vmem:[%s9146_s14 + $0x128] sm:$0xff] }
 0x66d   : > { %4906 = vmatpush.bf16.msra.mxu3 %v7354_v43 }
 0x66e   : > { %v7414_v46 = vpack.i.bf16 %v4433_v45, %v4432_v44  ;;  %v7337_v44 = vld [vmem:[%s9146_s14 + $0xa0] sm:$0xff]  ;;  %v7336_v45 = vld [vmem:[%s9146_s14 + $0x98] sm:$0xff] }
 0x66f   : > { %4714 = vmatpush.bf16.msrb.mxu1 %v7337_v44 }
 0x670   : > { %7415 = vrot.lane.b32.xlu0 %v7414_v46, %s7448_s17  ;;  %v7329_v46 = vld [vmem:[%s9146_s14 + $0x60] sm:$0xff] }
 0x671   : > { %4628 = vmatpush.bf16.msrb.mxu0 %v7329_v46 }
 0x673   : > { %4715 = vmatpush.bf16.msrb.mxu1 %v7336_v45 }
 0x677   : > { %4716 = vmatpush.bf16.msrb.mxu1 %v7335_v48 }
 0x6e2   : > { %v7416_v53 = vpop.permute.xlu0 %7415 }
 0x6e3   : > { %v7418_v55 = vunpack.i.h.bf16 %v7416_v53  ;;  %v7417_v57 = vunpack.i.l.bf16 %v7416_v53  ;;  %v7326_v53 = vld [vmem:[%s9146_s14 + $0x48] sm:$0xff] }
 0x6e5   : > { %v4443_v60 = vsel %vm2607_vm7, 0.0, %v7418_v55  ;;  %v4445_v4 = vsel %vm2607_vm7, %v7418_v55, 0.0  ;;  %v4442_v59 = vsel %vm2607_vm7, 0.0, %v7417_v57  ;;  %v4444_v61 = vsel %vm2607_vm7, %v7417_v57, 0.0  ;;  %v7350_v55 = vld [vmem:[%s9146_s14 + $0x108] sm:$0xff]  ;;  %v7371_v57 = vld [vmem:[%s9146_s14 + $0x1b0] sm:$0xff] }
 0x6e6   : > { %v4452_v62 = vrot.slane %v4443_v60, 7  ;;  %v4454_v15 = vrot.slane %v4445_v4, 7  ;;  %v4450_v47 = vrot.slane %v4442_v59, 7  ;;  %v4451_v11 = vrot.slane %v4444_v61, 7  ;;  %v7379_v60 = vld [vmem:[%s9146_s14 + $0x1f0] sm:$0xff]  ;;  %v7325_v4 = vld [vmem:[%s9146_s14 + $0x40] sm:$0xff] }
 0x6e7   : > { %5166 = vmatpush.bf16.msrb.mxu2 %v7379_v60  ;;  %v7349_v59 = vld [vmem:[%s9146_s14 + $0x100] sm:$0xff]  ;;  %v7364_v61 = vld [vmem:[%s9146_s14 + $0x178] sm:$0xff] }
 0x6e8   : > { %v4464_v56 = vsel %vm2616_vm8, %v4452_v62, 0.0  ;;  %v4465_v0 = vsel %vm2616_vm8, %v4454_v15, 0.0  ;;  %v4453_v1 = vsel %vm2616_vm8, %v4450_v47, %v4452_v62  ;;  %v4455_v2 = vsel %vm2616_vm8, %v4451_v11, %v4454_v15  ;;  %v7370_v62 = vld [vmem:[%s9146_s14 + $0x1a8] sm:$0xff] }
 0x6e9   : > { %v4727_v3 = vpack.c.bf16 %v4464_v56, %v4464_v56  ;;  %v4821_v5 = vpack.c.bf16 %v4465_v0, %v4465_v0  ;;  %v4462_v6 = vsel %vm2616_vm8, 0.0, %v4450_v47  ;;  %v4463_v32 = vsel %vm2616_vm8, 0.0, %v4451_v11  ;;  %v7378_v15 = vld [vmem:[%s9146_s14 + $0x1e8] sm:$0xff]  ;;  %v7363_v11 = vld [vmem:[%s9146_s14 + $0x170] sm:$0xff]  ;;  %v7369_v56 = vld [vmem:[%s9146_s14 + $0x1a0] sm:$0xff] }
 0x6ea   : > { %v4471_v7 = vpack.c.bf16 %v4453_v1, %v4462_v6  ;;  %v6731_v8 = vpack.c.bf16 %v4453_v1, %v4450_v47  ;;  %v4552_v9 = vpack.c.bf16 %v4455_v2, %v4463_v32  ;;  %v7388_v47 = vld [vmem:[%s9146_s14 + $0x238] sm:$0xff]  ;;  %v7377_v0 = vld [vmem:[%s9146_s14 + $0x1e0] sm:$0xff]  ;;  %v7387_v1 = vld [vmem:[%s9146_s14 + $0x230] sm:$0xff] }
 0x6eb   : > { %v4752_v10 = vshll.u32 %v4727_v3, 16  ;;  %v4846_v14 = vshll.u32 %v4821_v5, 16  ;;  %v5109_v58 = vrot.slane %v4821_v5, 1  ;;  %v5024_v37 = vrot.slane %v4727_v3, 1  ;;  %5167 = vmatpush.bf16.msrb.mxu2 %v7378_v15  ;;  %v7362_v2 = vld [vmem:[%s9146_s14 + $0x168] sm:$0xff]  ;;  %v7368_v3 = vld [vmem:[%s9146_s14 + $0x198] sm:$0xff] }
 0x6ec   : > { %4659 = vrot.lane.b32.xlu0 %v4552_v9, %s7446_s0  ;;  %4573 = vrot.lane.b32.xlu2 %v4552_v9, %s9155_s30  ;;  %v4747_v12 = vshll.u32 %v4471_v7, 16  ;;  %v4841_v13 = vshll.u32 %v4552_v9, 16  ;;  %v4745_v16 = vshrl.u32 %v4471_v7, 16  ;;  %v4839_v28 = vshrl.u32 %v4552_v9, 16  ;;  %v7376_v5 = vld [vmem:[%s9146_s14 + $0x1d8] sm:$0xff]  ;;  %v7386_v6 = vld [vmem:[%s9146_s14 + $0x228] sm:$0xff] }
 0x6ed   : > { %6732 = vmatmul.msk.bf16.vlgmr.msrb.gmra.mxu3 %vm8305_vm11, %v6731_v8  ;;  %4571 = vrot.lane.b32.xlu1 %v4471_v7, %s9155_s30  ;;  %v4754_v18 = vrot.slane %v4752_v10, 1  ;;  %v4848_v21 = vrot.slane %v4846_v14, 1  ;;  %v5108_v29 = vrot.slane %v4552_v9, 1  ;;  %v5023_v36 = vrot.slane %v4471_v7, 1  ;;  %v7361_v32 = vld [vmem:[%s9146_s14 + $0x160] sm:$0xff]  ;;  %v7375_v8 = vld [vmem:[%s9146_s14 + $0x1d0] sm:$0xff] }
 0x6ee   : > { %v4749_v17 = vrot.slane %v4747_v12, 1  ;;  %v4843_v39 = vrot.slane %v4841_v13, 1  ;;  %v7385_v9 = vld [vmem:[%s9146_s14 + $0x220] sm:$0xff]  ;;  %v7360_v10 = vld [vmem:[%s9146_s14 + $0x158] sm:$0xff]  ;;  %v7366_v12 = vld [vmem:[%s9146_s14 + $0x188] sm:$0xff] }
 0x6ef   : > { %v5110_v40 = vsel %vm2122_vm4, %v5108_v29, %v5109_v58  ;;  %v8952_v54 = vsel %vm2122_vm4, %v5023_v36, %v5024_v37  ;;  %5168 = vmatpush.bf16.msrb.mxu2 %v7377_v0  ;;  %v7374_v13 = vld [vmem:[%s9146_s14 + $0x1c8] sm:$0xff]  ;;  %v7384_v14 = vld [vmem:[%s9146_s14 + $0x218] sm:$0xff] }
 0x6f0   : > { %v4750_v19 = vor.u32 %v4749_v17, %v4745_v16  ;;  %v4844_v20 = vor.u32 %v4843_v39, %v4839_v28  ;;  %v7359_v16 = vld [vmem:[%s9146_s14 + $0x150] sm:$0xff]  ;;  %v7365_v17 = vld [vmem:[%s9146_s14 + $0x180] sm:$0xff] }
 0x6f1   : > { %v7373_v28 = vld [vmem:[%s9146_s14 + $0x1c0] sm:$0xff]  ;;  %v7383_v39 = vld [vmem:[%s9146_s14 + $0x210] sm:$0xff] }
 0x6f2   : > { %v4755_v22 = vsel %vm1586_vm3, %v4750_v19, %v4754_v18  ;;  %v4849_v23 = vsel %vm1586_vm3, %v4844_v20, %v4848_v21  ;;  %v7358_v18 = vld [vmem:[%s9146_s14 + $0x148] sm:$0xff]  ;;  %v7357_v20 = vld [vmem:[%s9146_s14 + $0x140] sm:$0xff] }
 0x6f3   : > { %4813 = vmatmul.bf16.vlgmr.msra.gmra.mxu2 %v4755_v22  ;;  %v7382_v19 = vld [vmem:[%s9146_s14 + $0x208] sm:$0xff]  ;;  %v7381_v21 = vld [vmem:[%s9146_s14 + $0x200] sm:$0xff] }
 0x6f4   : > { %4657 = vrot.lane.b32.xlu2 %v4471_v7, %s7446_s0  ;;  %4850 = vrot.lane.b32.xlu0 %v4755_v22, %s9155_s30  ;;  %v7367_v7 = vld [vmem:[%s9146_s14 + $0x190] sm:$0xff] }
 0x6f5   : > { %4852 = vrot.lane.b32.xlu1 %v4849_v23, %s9155_s30  ;;  %5169 = vmatpush.bf16.msrb.mxu2 %v7376_v5 }
 0x6f9   : > { %5170 = vmatpush.bf16.msrb.mxu2 %v7375_v8 }
 0x6fc   : > { %5113 = vrot.lane.b32.xlu2 %v5110_v40, %s9155_s30  ;;  %4936 = vrot.lane.b32.xlu0 %v4755_v22, %s7446_s0 }
 0x6fd   : > { %5111 = vrot.lane.b32.xlu1 %v8952_v54, %s9155_s30  ;;  %5171 = vmatpush.bf16.msrb.mxu2 %v7374_v13 }
 0x701   : > { %5172 = vmatpush.bf16.msrb.mxu2 %v7373_v28 }
 0x704   : > { %5197 = vrot.lane.b32.xlu2 %v8952_v54, %s7446_s0  ;;  %5199 = vrot.lane.b32.xlu0 %v5110_v40, %s7446_s0 }
 0x705   : > { %4938 = vrot.lane.b32.xlu1 %v4849_v23, %s7446_s0 }
 0x70c   : > { %5284 = vrot.lane.b32.xlu2 %v8655_v25, %s9155_s30  ;;  %5286 = vrot.lane.b32.xlu0 %v8667_v33, %s9155_s30  ;;  %v7353_v25 = vld [vmem:[%s9146_s14 + $0x120] sm:$0xff]  ;;  %v7334_v33 = vld [vmem:[%s9146_s14 + $0x88] sm:$0xff] }
 0x70d   : > { %5282 = vrot.lane.b32.xlu1 %v8658_v26, %s9155_s30  ;;  %v7328_v26 = vld [vmem:[%s9146_s14 + $0x58] sm:$0xff]  ;;  %4907 = vmatpush.bf16.msra.mxu3 %v7353_v25 }
 0x70e   : > { %4629 = vmatpush.bf16.msrb.mxu0 %v7328_v26  ;;  %4717 = vmatpush.bf16.msrb.mxu1 %v7334_v33  ;;  %v7424_v33 = vld [vmem:[%s9147_s15] ss:$0 sm:$0xff] }
 0x712   : > { %4630 = vmatpush.bf16.msrb.mxu0 %v7327_v49  ;;  %4718 = vmatpush.bf16.msrb.mxu1 %v7333_v31 }
 0x715   : > { %5288 = vrot.lane.b32.xlu1 %v8670_v34, %s9155_s30  ;;  %v7352_v34 = vld [vmem:[%s9146_s14 + $0x118] sm:$0xff] }
 0x716   : > { %4908 = vmatpush.bf16.msra.mxu3 %v7352_v34  ;;  %5075 = vmatpush.bf16.msra.mxu1 %v7372_v51 }
 0x717   : > { %4631 = vmatpush.bf16.msrb.mxu0 %v7326_v53 }
 0x71a   : > { %4909 = vmatpush.bf16.msra.mxu3 %v7351_v50  ;;  %5076 = vmatpush.bf16.msra.mxu1 %v7371_v57 }
 0x71b   : > { %4632 = vmatpush.bf16.msrb.mxu0 %v7325_v4 }
 0x71e   : > { %4910 = vmatpush.bf16.msra.mxu3 %v7350_v55  ;;  %5077 = vmatpush.bf16.msra.mxu1 %v7370_v62 }
 0x71f   : > { %4990 = vmatpush.bf16.msra.mxu0 %v7364_v61 }
 0x722   : > { %4911 = vmatpush.bf16.msra.mxu3 %v7349_v59  ;;  %5078 = vmatpush.bf16.msra.mxu1 %v7369_v56 }
 0x723   : > { %4991 = vmatpush.bf16.msra.mxu0 %v7363_v11 }
 0x726   : > { %5251 = vmatpush.bf16.msrb.mxu3 %v7388_v47  ;;  %5079 = vmatpush.bf16.msra.mxu1 %v7368_v3 }
 0x727   : > { %4992 = vmatpush.bf16.msra.mxu0 %v7362_v2 }
 0x72a   : > { %5252 = vmatpush.bf16.msrb.mxu3 %v7387_v1  ;;  %5080 = vmatpush.bf16.msra.mxu1 %v7367_v7 }
 0x72b   : > { %4993 = vmatpush.bf16.msra.mxu0 %v7361_v32 }
 0x72e   : > { %5253 = vmatpush.bf16.msrb.mxu3 %v7386_v6  ;;  %5081 = vmatpush.bf16.msra.mxu1 %v7366_v12 }
 0x72f   : > { %4994 = vmatpush.bf16.msra.mxu0 %v7360_v10 }
 0x732   : > { %5254 = vmatpush.bf16.msrb.mxu3 %v7385_v9  ;;  %5082 = vmatpush.bf16.msra.mxu1 %v7365_v17 }
 0x733   : > { %4995 = vmatpush.bf16.msra.mxu0 %v7359_v16 }
 0x736   : > { %5255 = vmatpush.bf16.msrb.mxu3 %v7384_v14 }
 0x737   : > { %4996 = vmatpush.bf16.msra.mxu0 %v7358_v18 }
 0x73a   : > { %5256 = vmatpush.bf16.msrb.mxu3 %v7383_v39 }
 0x73b   : > { %4997 = vmatpush.bf16.msra.mxu0 %v7357_v20 }
 0x73e   : > { %5257 = vmatpush.bf16.msrb.mxu3 %v7382_v19 }
 0x742   : > { %5258 = vmatpush.bf16.msrb.mxu3 %v7381_v21 }
 0x746   : > { %v4574_v22 = vpop.permute.xlu2 %4573 }
 0x74e   : > { %v4658_v23 = vpop.permute.xlu2 %4657 }
 0x756   : > { %v5114_v36 = vpop.permute.xlu2 %5113 }
 0x75e   : > { %v4660_v63 = vpop.permute.xlu0 %4659  ;;  %v5198_v41 = vpop.permute.xlu2 %5197 }
 0x75f   : > { %v4661_v24 = vsel %vm1252_vm6, %v4658_v23, %v4660_v63  ;;  %v4572_v27 = vpop.permute.xlu1 %4571 }
 0x760   : > { %v4575_v29 = vsel %vm2742_vm12, %v4572_v27, %v4574_v22  ;;  %4719 = vmatmul.bf16.vlgmr.msrb.gmra.mxu1 %v4661_v24 }
 0x761   : > { %4633 = vmatmul.bf16.vlgmr.msrb.gmra.mxu0 %v4575_v29 }
 0x766   : > { %v4851_v58 = vpop.permute.xlu0 %4850  ;;  %v5285_v12 = vpop.permute.xlu2 %5284 }
 0x767   : > { %v4853_v30 = vpop.permute.xlu1 %4852 }
 0x768   : > { %v4854_v35 = vsel %vm2742_vm12, %v4851_v58, %v4853_v30 }
 0x769   : > { %4912 = vmatmul.bf16.vlgmr.msra.gmra.mxu3 %v4854_v35 }
 0x76e   : > { %v4937_v37 = vpop.permute.xlu0 %4936 }
 0x76f   : > { %v5112_v38 = vpop.permute.xlu1 %5111 }
 0x770   : > { %v5115_v40 = vsel %vm2742_vm12, %v5112_v38, %v5114_v36  ;;  %5083 = vmatmul.bf16.vlgmr.msra.gmra.mxu1 %v8952_v54  ;;  %v4545_v46 = vpop.f32.mrf.mxu3 }
 0x771   : > { %5173 = vmatmul.bf16.vlgmr.msrb.gmra.mxu2 %v5115_v40  ;;  %v4550_v54 = vadd.f32 %v7424_v33, %v4545_v46 }
 0x776   : > { %v5200_v42 = vpop.permute.xlu0 %5199  ;;  %v4814_v34 = vpop.f32.mrf.mxu2 }
 0x777   : > { %v4939_v43 = vpop.permute.xlu1 %4938  ;;  %v5201_v44 = vsel %vm1252_vm6, %v5198_v41, %v5200_v42 }
 0x778   : > { %v4940_v45 = vsel %vm1252_vm6, %v4937_v37, %v4939_v43  ;;  %v4547_v25 = vpop.f32.mrf.mxu3 }
 0x779   : > { %4998 = vmatmul.bf16.vlgmr.msra.gmra.mxu0 %v4940_v45  ;;  %5259 = vmatmul.bf16.vlgmr.msrb.gmra.mxu3 %v5201_v44  ;;  %v4551_v55 = vadd.f32 %v7424_v33, %v4547_v25 }
 0x77e   : > { %v4816_v53 = vpop.f32.mrf.mxu2  ;;  %v5287_v28 = vpop.permute.xlu0 %5286 }
 0x77f   : > { %v5283_v56 = vpop.permute.xlu1 %5282 }
 0x780   : > { %v5291_v16 = vsel %vm2742_vm12, %v5283_v56, %v5285_v12 }
 0x787   : > { %v5289_v13 = vpop.permute.xlu1 %5288 }
 0x788   : > { %v5292_v19 = vsel %vm2742_vm12, %v5287_v28, %v5289_v13 }
 0x7dd   : > { %v4720_v48 = vpop.f32.mrf.mxu1 }
 0x7de   : > { %v4634_v26 = vpop.f32.mrf.mxu0 }
 0x7df   : > { %v4639_v49 = vadd.f32 %v4634_v26, %v4550_v54 }
 0x7e1   : > { %v4725_v52 = vadd.f32 %v4720_v48, %v4639_v49 }
 0x7e3   : > { %v4819_v60 = vadd.f32 %v4814_v34, %v4725_v52 }
 0x7e5   : > { %v4722_v31 = vpop.f32.mrf.mxu1 }
 0x7e6   : > { %v4636_v51 = vpop.f32.mrf.mxu0 }
 0x7e7   : > { %v4640_v57 = vadd.f32 %v4636_v51, %v4551_v55 }
 0x7e9   : > { %v4726_v15 = vadd.f32 %v4722_v31, %v4640_v57 }
 0x7eb   : > { %v4820_v1 = vadd.f32 %v4816_v53, %v4726_v15 }
 0x7ec   : > { %v4913_v50 = vpop.f32.mrf.mxu3 }
 0x7ed   : > { %v4918_v59 = vadd.f32 %v4913_v50, %v4819_v60  ;;  %v5084_v61 = vpop.f32.mrf.mxu1 }
 0x7f4   : > { %v4915_v4 = vpop.f32.mrf.mxu3  ;;  %v5174_v11 = vpop.f32.mrf.mxu2 }
 0x7f5   : > { %v4919_v3 = vadd.f32 %v4915_v4, %v4820_v1  ;;  %v5086_v7 = vpop.f32.mrf.mxu1 }
 0x7f6   : > { %v4999_v62 = vpop.f32.mrf.mxu0 }
 0x7f7   : > { %v5004_v47 = vadd.f32 %v4999_v62, %v4918_v59 }
 0x7f9   : > { %v5089_v0 = vadd.f32 %v5084_v61, %v5004_v47 }
 0x7fb   : > { %v5179_v5 = vadd.f32 %v5174_v11, %v5089_v0 }
 0x7fc   : > { %v5260_v2 = vpop.f32.mrf.mxu3  ;;  %v5176_v10 = vpop.f32.mrf.mxu2 }
 0x7fd   : > { %v5265_v8 = vadd.f32 %v5260_v2, %v5179_v5 }
 0x7fe   : > { %v5001_v6 = vpop.f32.mrf.mxu0 }
 0x7ff   : > { %v5005_v32 = vadd.f32 %v5001_v6, %v4919_v3  ;;  %v5295_v39 = vadd.f32 %v5291_v16, %v5265_v8 }
 0x801   : > { %v5090_v9 = vadd.f32 %v5086_v7, %v5005_v32  ;;  %v5297_v21 = vmax.f32 %v5295_v39, 0.0 }
 0x803   : > { %v5180_v14 = vadd.f32 %v5176_v10, %v5090_v9 }
 0x804   : > { %v5262_v17 = vpop.f32.mrf.mxu3 }
 0x805   : > { %v5266_v18 = vadd.f32 %v5262_v17, %v5180_v14 }
 0x807   : > { %v5296_v20 = vadd.f32 %v5292_v19, %v5266_v18 }
 0x809   : > { %v5298_v22 = vmax.f32 %v5296_v20, 0.0 }
 0x80b   : > { %v7392_v23 = vpack.c.bf16 %v5298_v22, %v5297_v21 }
 0x80d   : > { %7393 = vst [vmem:[%s522_s20] sm:$0xff] %v7392_v23  }
 0x80e PF: > { %s27_s23 = sadd.s32 1, %s7443_s23  }
 0x80f   : > { %p24_p4 = scmp.ge.s32.totalorder %s27_s23, 6  }
 0x811   :  { %26 = sbr.rel (!%p24_p4) target bundleno = 3 (0x3), region = 114 }

</bundles_post_ra>
